<compile_context>
chip_gen: v6e
topology: v6e:2x2x1
jax: 0.10.0
libtpu: 0.0.40
codegen_flags: <defaults>
</compile_context>

<pallas_src>
import functools

import numpy as np
import jax
import jax.numpy as jnp
from jax import lax
from jax.experimental import pallas as pl
from jax.experimental.pallas import tpu as pltpu

LOGIT_PAD = 128          # lane-dense classifier output width
NEG_INF = -1e30          # additive mask value for cross-head score entries


def _layer_norm(y, g, b):
    mean = jnp.mean(y, axis=-1, keepdims=True)
    var = jnp.mean(jnp.square(y - mean), axis=-1, keepdims=True)
    return (y - mean) * lax.rsqrt(var + 1e-5) * g + b


def _fused_forward_kernel(x_ref, pos_ref, mask_ref, wqkv_ref, bqkv_ref,
                          wo_ref, bo_ref, ln1g_ref, ln1b_ref,
                          w1_ref, b1_ref, w2_ref, b2_ref,
                          ln2g_ref, ln2b_ref, wc_ref, bc_ref, o_ref,
                          *, num_head, num_encoder, scale):
    Bt, S, D = x_ref.shape
    H = num_head
    Dh = D // H

    # token embeddings + position encoding, batch folded into rows
    x2d = (x_ref[...] + pos_ref[...]).reshape(Bt * S, D)      # [Bt*S, D]
    mask = mask_ref[...]                                      # [H*S, H*S] (+0 / -1e30)

    wqkv = wqkv_ref[...]          # [D, 3D]   q | k | v lane-concatenated
    bqkv = bqkv_ref[...]          # [1, 3D]
    wo_t = wo_ref[...]            # [D, D]    (pre-transposed to [in, out])
    bo = bo_ref[...]              # [1, D]
    w1_t = w1_ref[...]            # [D, hidden]
    b1 = b1_ref[...]              # [1, hidden]
    w2_t = w2_ref[...]            # [hidden, D]
    b2 = b2_ref[...]              # [1, D]

    for _ in range(num_encoder):  # both encoder layers share one weight set
        # ---- fused QKV projection: one MXU push, M = Bt*S, N = 3D ----------
        qkv = jnp.dot(x2d, wqkv, preferred_element_type=jnp.float32) + bqkv
        qkv3 = qkv.reshape(Bt, S, 3 * D)

        # raw-.view() pseudo-head layout: per batch element, row j = c*S + s
        # (c = Dh-wide lane chunk, s = token).  Built with H lane-slices + one
        # sublane concat; the block-diagonal mask (precomputed on host) turns
        # the single masked softmax into exact per-pseudo-head attention.
        def head_cat(base):
            return jnp.concatenate(
                [qkv3[:, :, base + c * Dh: base + (c + 1) * Dh]
                 for c in range(H)], axis=1)                  # [Bt, H*S, Dh]

        q_cat = head_cat(0)
        k_cat = head_cat(D)
        v_cat = head_cat(2 * D)

        # batched (per batch element) masked attention over all heads at once
        s_mat = jnp.einsum('bik,bjk->bij', q_cat, k_cat,
                           preferred_element_type=jnp.float32) * scale + mask
        s_mat = s_mat - jnp.max(s_mat, axis=-1, keepdims=True)
        p = jnp.exp(s_mat)
        p = p * pl.reciprocal(jnp.sum(p, axis=-1, keepdims=True), approx=True)
        ctx = jnp.einsum('bij,bjk->bik', p, v_cat,
                         preferred_element_type=jnp.float32)  # [Bt, H*S, Dh]

        # merge heads back (raw .view) and do ONE output projection (K = D)
        ctx3 = jnp.concatenate(
            [ctx[:, c * S:(c + 1) * S, :] for c in range(H)], axis=2)
        attn = jnp.dot(ctx3.reshape(Bt * S, D), wo_t,
                       preferred_element_type=jnp.float32) + bo

        # dropout (p=0.5) is identity at inference.
        # TODO(synk): training-mode dropout (random masking) not implemented.
        x2d = _layer_norm(attn + x2d, ln1g_ref[...], ln1b_ref[...])

        # ---- position-wise FFN (NO residual, per the PyTorch source) -------
        h1 = jnp.maximum(
            jnp.dot(x2d, w1_t, preferred_element_type=jnp.float32) + b1, 0.0)
        y = jnp.dot(h1, w2_t, preferred_element_type=jnp.float32) + b2
        x2d = _layer_norm(y, ln2g_ref[...], ln2b_ref[...])

    # ---- classifier: flatten each sequence into lanes (col = s*D + d) and do
    # a single K = S*D matmul with a lane-dense 128-wide output --------------
    x3 = x2d.reshape(Bt, S, D)
    xflat = jnp.concatenate([x3[:, s, :] for s in range(S)], axis=1)  # [Bt, S*D]
    o_ref[...] = jnp.dot(xflat, wc_ref[...],
                         preferred_element_type=jnp.float32) + bc_ref[...]


@functools.partial(jax.jit, static_argnames=("num_head", "num_encoder",
                                              "num_classes", "block_b"))
def transformer_forward(token_ids, embedding, kp, *, num_head, num_encoder,
                        num_classes, block_b=8):
    B, S = token_ids.shape
    D = kp["pos"].shape[1]
    Dh = D // num_head
    hidden = kp["w1_t"].shape[1]

    assert block_b % 8 == 0, "block_b must be a multiple of the f32 sublane (8)"

    # embedding lookup (gather) stays in XLA; everything else is one kernel
    x_emb = jnp.take(embedding, token_ids, axis=0)            # [B, S, D]

    # pad batch to a multiple of the per-step batch block
    Bt = block_b
    pad = (-B) % Bt
    if pad:
        x_emb = jnp.concatenate(
            [x_emb, jnp.zeros((pad, S, D), x_emb.dtype)], axis=0)
    Bp = B + pad

    def const_spec(shape):
        zeros = (0,) * len(shape)
        return pl.BlockSpec(shape, lambda b: zeros)

    kernel = functools.partial(
        _fused_forward_kernel, num_head=num_head, num_encoder=num_encoder,
        scale=float(Dh) ** -0.5)

    logits = pl.pallas_call(
        kernel,
        grid=(Bp // Bt,),
        in_specs=[
            pl.BlockSpec((Bt, S, D), lambda b: (b, 0, 0)),    # x_emb batch block
            const_spec((S, D)),                               # pos encoding
            const_spec((num_head * S, num_head * S)),         # additive head mask
            const_spec((D, 3 * D)),                           # fused qkv weight
            const_spec((1, 3 * D)),                           # fused qkv bias
            const_spec((D, D)),                               # wo^T
            const_spec((1, D)),                               # bo
            const_spec((1, D)),                               # ln1 gamma
            const_spec((1, D)),                               # ln1 beta
            const_spec((D, hidden)),                          # w1^T
            const_spec((1, hidden)),                          # b1
            const_spec((hidden, D)),                          # w2^T
            const_spec((1, D)),                               # b2
            const_spec((1, D)),                               # ln2 gamma
            const_spec((1, D)),                               # ln2 beta
            const_spec((S * D, LOGIT_PAD)),                   # classifier weight
            const_spec((1, LOGIT_PAD)),                       # classifier bias
        ],
        out_specs=pl.BlockSpec((Bt, LOGIT_PAD), lambda b: (b, 0)),
        out_shape=jax.ShapeDtypeStruct((Bp, LOGIT_PAD), jnp.float32),
        compiler_params=pltpu.CompilerParams(
            dimension_semantics=("parallel",)),               # megacore split
    )(x_emb, kp["pos"], kp["head_mask"], kp["wqkv2d"], kp["bqkv2d"],
      kp["wo_t"], kp["bo"], kp["ln1_g"], kp["ln1_b"], kp["w1_t"], kp["b1"],
      kp["w2_t"], kp["b2"], kp["ln2_g"], kp["ln2_b"], kp["wc2d"], kp["bc_pad"])

    return logits[:B, :num_classes]


# ---------------------------------------------------------------------------
# Parameter construction (PyTorch-style init, rearranged into kernel layouts)
# ---------------------------------------------------------------------------

def make_position_embedding(pad_size, embedding_size):
    pe = np.zeros((pad_size, embedding_size), dtype=np.float64)
    for pos in range(pad_size):
        for i in range(embedding_size):
            pe[pos, i] = pos / (10000.0 ** (i // 2 * 2.0 / embedding_size))
    pe[:, 0::2] = np.sin(pe[:, 0::2])
    pe[:, 1::2] = np.cos(pe[:, 1::2])
    return jnp.asarray(pe, dtype=jnp.float32)


def make_head_mask(pad_size, num_head):
    # row j = c*S + s; the raw .view() pseudo-head of element (s, c) is
    # (s*H + c) // S.  Additive mask: 0 within a head, -1e30 across heads.
    S, H = pad_size, num_head
    j = np.arange(H * S)
    grp = ((j % S) * H + j // S) // S
    mask = np.where(grp[:, None] == grp[None, :], 0.0, NEG_INF)
    return jnp.asarray(mask, dtype=jnp.float32)


def init_linear(key, out_f, in_f):
    kw, kb = jax.random.split(key)
    bound = 1.0 / np.sqrt(in_f)
    w = jax.random.uniform(kw, (out_f, in_f), jnp.float32, -bound, bound)
    b = jax.random.uniform(kb, (out_f,), jnp.float32, -bound, bound)
    return w, b


def init_params(key, vocab, dim_model, num_head, hidden, pad_size, num_classes):
    keys = jax.random.split(key, 8)
    embedding = jax.random.normal(keys[0], (vocab, dim_model), jnp.float32)
    # one encoder layer's weights; both layers reuse them (deepcopy semantics)
    wq, bq = init_linear(keys[1], dim_model, dim_model)
    wk, bk = init_linear(keys[2], dim_model, dim_model)
    wv, bv = init_linear(keys[3], dim_model, dim_model)
    wo, bo = init_linear(keys[4], dim_model, dim_model)
    w1, b1 = init_linear(keys[5], hidden, dim_model)
    w2, b2 = init_linear(keys[6], dim_model, hidden)
    wc, bc = init_linear(keys[7], num_classes, pad_size * dim_model)

    wc2d = jnp.zeros((pad_size * dim_model, LOGIT_PAD), jnp.float32)
    wc2d = wc2d.at[:, :num_classes].set(wc.T)
    bc_pad = jnp.zeros((1, LOGIT_PAD), jnp.float32).at[0, :num_classes].set(bc)

    kernel_params = {
        "pos": make_position_embedding(pad_size, dim_model),
        "head_mask": make_head_mask(pad_size, num_head),
        "wqkv2d": jnp.concatenate([wq.T, wk.T, wv.T], axis=1),   # [D, 3D]
        "bqkv2d": jnp.concatenate([bq, bk, bv]).reshape(1, 3 * dim_model),
        "wo_t": wo.T,
        "bo": bo.reshape(1, dim_model),
        "ln1_g": jnp.ones((1, dim_model), jnp.float32),
        "ln1_b": jnp.zeros((1, dim_model), jnp.float32),
        "w1_t": w1.T,
        "b1": b1.reshape(1, hidden),
        "w2_t": w2.T,
        "b2": b2.reshape(1, dim_model),
        "ln2_g": jnp.ones((1, dim_model), jnp.float32),
        "ln2_b": jnp.zeros((1, dim_model), jnp.float32),
        "wc2d": wc2d,                                            # [S*D, 128]
        "bc_pad": bc_pad,                                        # [1, 128]
    }
    return {"embedding": embedding, "kernel": kernel_params}


# ---------------------------------------------------------------------------
# Pure-numpy reference (literal transcription of the PyTorch forward, f64)
# ---------------------------------------------------------------------------

def reference_forward(token_ids, embedding, kp, *, num_head, num_encoder,
                      num_classes):
    f = lambda a: np.asarray(a, np.float64)
    H = num_head
    x = f(embedding)[np.asarray(token_ids)] + f(kp["pos"])    # [B, S, D]
    B, S, D = x.shape
    Dh = D // H
    wqkv, bqkv = f(kp["wqkv2d"]), f(kp["bqkv2d"])[0]
    wo_t, bo = f(kp["wo_t"]), f(kp["bo"])[0]
    w1_t, b1 = f(kp["w1_t"]), f(kp["b1"])[0]
    w2_t, b2 = f(kp["w2_t"]), f(kp["b2"])[0]
    g1, be1 = f(kp["ln1_g"])[0], f(kp["ln1_b"])[0]
    g2, be2 = f(kp["ln2_g"])[0], f(kp["ln2_b"])[0]
    wc, bc = f(kp["wc2d"]), f(kp["bc_pad"])[0]

    def ln(y, g, b):
        m = y.mean(-1, keepdims=True)
        v = ((y - m) ** 2).mean(-1, keepdims=True)
        return (y - m) / np.sqrt(v + 1e-5) * g + b

    scale = Dh ** -0.5
    for _ in range(num_encoder):
        Q = x @ wqkv[:, :D] + bqkv[:D]
        K = x @ wqkv[:, D:2 * D] + bqkv[D:2 * D]
        V = x @ wqkv[:, 2 * D:] + bqkv[2 * D:]
        Qh = Q.reshape(B * H, -1, Dh)          # raw .view() split (PyTorch)
        Kh = K.reshape(B * H, -1, Dh)
        Vh = V.reshape(B * H, -1, Dh)
        att = (Qh @ Kh.transpose(0, 2, 1)) * scale
        att = np.exp(att - att.max(-1, keepdims=True))
        att = att / att.sum(-1, keepdims=True)
        ctx = (att @ Vh).reshape(B, -1, H * Dh)  # raw .view() merge
        out = ctx @ wo_t + bo
        x = ln(out + x, g1, be1)
        h = np.maximum(x @ w1_t + b1, 0.0)
        x = ln(h @ w2_t + b2, g2, be2)
    return (x.reshape(B, -1) @ wc + bc)[:, :num_classes]


# ---------------------------------------------------------------------------
# Main
# ---------------------------------------------------------------------------

if __name__ == "__main__":
    B, S, D = 16, 8, 32           # batch, pad_size, dim_model/embedding_size
    NUM_HEAD = 4                  # D % NUM_HEAD == 0
    HIDDEN = 64
    NUM_ENCODER = 2
    NUM_CLASSES = 4
    VOCAB = 50
    BLOCK_B = 8                   # grid = (2,): both v7x TensorCores get work

    key = jax.random.PRNGKey(0)
    k_params, k_tok = jax.random.split(key)
    params = init_params(k_params, VOCAB, D, NUM_HEAD, HIDDEN, S, NUM_CLASSES)
    token_ids = jax.random.randint(k_tok, (B, S), 0, VOCAB, dtype=jnp.int32)

    logits = transformer_forward(token_ids, params["embedding"],
                                 params["kernel"], num_head=NUM_HEAD,
                                 num_encoder=NUM_ENCODER,
                                 num_classes=NUM_CLASSES, block_b=BLOCK_B)
    logits = jax.block_until_ready(logits)
    assert logits.shape == (B, NUM_CLASSES)

    ref = reference_forward(token_ids, params["embedding"], params["kernel"],
                            num_head=NUM_HEAD, num_encoder=NUM_ENCODER,
                            num_classes=NUM_CLASSES)
    err = float(np.max(np.abs(np.asarray(logits, np.float64) - ref)))
    # loose tolerance: kernel is f32 with an approximate softmax reciprocal
    assert err < 5e-2, f"max abs error vs reference: {err}"
    print("KERNEL_OK")
</pallas_src>

<mosaic_0001>
module attributes {stable_mosaic.version = 11 : i64} {
  func.func @_fused_forward_kernel(%arg0: i32, %arg1: memref<8x8x32xf32, #tpu.memory_space<vmem>>, %arg2: memref<8x32xf32, #tpu.memory_space<vmem>>, %arg3: memref<32x32xf32, #tpu.memory_space<vmem>>, %arg4: memref<32x96xf32, #tpu.memory_space<vmem>>, %arg5: memref<1x96xf32, #tpu.memory_space<vmem>>, %arg6: memref<32x32xf32, #tpu.memory_space<vmem>>, %arg7: memref<1x32xf32, #tpu.memory_space<vmem>>, %arg8: memref<1x32xf32, #tpu.memory_space<vmem>>, %arg9: memref<1x32xf32, #tpu.memory_space<vmem>>, %arg10: memref<32x64xf32, #tpu.memory_space<vmem>>, %arg11: memref<1x64xf32, #tpu.memory_space<vmem>>, %arg12: memref<64x32xf32, #tpu.memory_space<vmem>>, %arg13: memref<1x32xf32, #tpu.memory_space<vmem>>, %arg14: memref<1x32xf32, #tpu.memory_space<vmem>>, %arg15: memref<1x32xf32, #tpu.memory_space<vmem>>, %arg16: memref<256x128xf32, #tpu.memory_space<vmem>>, %arg17: memref<1x128xf32, #tpu.memory_space<vmem>>, %arg18: memref<8x128xf32, #tpu.memory_space<vmem>>) attributes {dimension_semantics = [#tpu.dimension_semantics<parallel>], iteration_bounds = array<i64: 2>, scalar_prefetch = 0 : i64, scratch_operands = 0 : i64, tpu.core_type = #tpu.core_type<tc>, window_params = [{transform_indices = @transform_0, window_bounds = array<i64: 8, 8, 32>}, {pipeline_mode = #tpu.pipeline_mode<synchronous>, transform_indices = @transform_1, window_bounds = array<i64: 8, 32>}, {pipeline_mode = #tpu.pipeline_mode<synchronous>, transform_indices = @transform_2, window_bounds = array<i64: 32, 32>}, {pipeline_mode = #tpu.pipeline_mode<synchronous>, transform_indices = @transform_3, window_bounds = array<i64: 32, 96>}, {pipeline_mode = #tpu.pipeline_mode<synchronous>, transform_indices = @transform_4, window_bounds = array<i64: 1, 96>}, {pipeline_mode = #tpu.pipeline_mode<synchronous>, transform_indices = @transform_5, window_bounds = array<i64: 32, 32>}, {pipeline_mode = #tpu.pipeline_mode<synchronous>, transform_indices = @transform_6, window_bounds = array<i64: 1, 32>}, {pipeline_mode = #tpu.pipeline_mode<synchronous>, transform_indices = @transform_7, window_bounds = array<i64: 1, 32>}, {pipeline_mode = #tpu.pipeline_mode<synchronous>, transform_indices = @transform_8, window_bounds = array<i64: 1, 32>}, {pipeline_mode = #tpu.pipeline_mode<synchronous>, transform_indices = @transform_9, window_bounds = array<i64: 32, 64>}, {pipeline_mode = #tpu.pipeline_mode<synchronous>, transform_indices = @transform_10, window_bounds = array<i64: 1, 64>}, {pipeline_mode = #tpu.pipeline_mode<synchronous>, transform_indices = @transform_11, window_bounds = array<i64: 64, 32>}, {pipeline_mode = #tpu.pipeline_mode<synchronous>, transform_indices = @transform_12, window_bounds = array<i64: 1, 32>}, {pipeline_mode = #tpu.pipeline_mode<synchronous>, transform_indices = @transform_13, window_bounds = array<i64: 1, 32>}, {pipeline_mode = #tpu.pipeline_mode<synchronous>, transform_indices = @transform_14, window_bounds = array<i64: 1, 32>}, {pipeline_mode = #tpu.pipeline_mode<synchronous>, transform_indices = @transform_15, window_bounds = array<i64: 256, 128>}, {pipeline_mode = #tpu.pipeline_mode<synchronous>, transform_indices = @transform_16, window_bounds = array<i64: 1, 128>}, {transform_indices = @transform_17, window_bounds = array<i64: 8, 128>}]} {
    %c0 = arith.constant 0 : index
    %c0_0 = arith.constant 0 : index
    %c0_1 = arith.constant 0 : index
    %0 = vector.load %arg1[%c0, %c0_0, %c0_1] : memref<8x8x32xf32, #tpu.memory_space<vmem>>, vector<8x8x32xf32>
    %c0_2 = arith.constant 0 : index
    %c0_3 = arith.constant 0 : index
    %1 = vector.load %arg2[%c0_2, %c0_3] : memref<8x32xf32, #tpu.memory_space<vmem>>, vector<8x32xf32>
    %2 = vector.shape_cast %1 : vector<8x32xf32> to vector<1x8x32xf32>
    %3 = vector.broadcast %2 : vector<1x8x32xf32> to vector<8x8x32xf32>
    %4 = arith.addf %0, %3 : vector<8x8x32xf32>
    %5 = vector.shape_cast %4 : vector<8x8x32xf32> to vector<64x32xf32>
    %c0_4 = arith.constant 0 : index
    %c0_5 = arith.constant 0 : index
    %6 = vector.load %arg3[%c0_4, %c0_5] : memref<32x32xf32, #tpu.memory_space<vmem>>, vector<32x32xf32>
    %c0_6 = arith.constant 0 : index
    %c0_7 = arith.constant 0 : index
    %7 = vector.load %arg4[%c0_6, %c0_7] : memref<32x96xf32, #tpu.memory_space<vmem>>, vector<32x96xf32>
    %c0_8 = arith.constant 0 : index
    %c0_9 = arith.constant 0 : index
    %8 = vector.load %arg5[%c0_8, %c0_9] : memref<1x96xf32, #tpu.memory_space<vmem>>, vector<1x96xf32>
    %c0_10 = arith.constant 0 : index
    %c0_11 = arith.constant 0 : index
    %9 = vector.load %arg6[%c0_10, %c0_11] : memref<32x32xf32, #tpu.memory_space<vmem>>, vector<32x32xf32>
    %c0_12 = arith.constant 0 : index
    %c0_13 = arith.constant 0 : index
    %10 = vector.load %arg7[%c0_12, %c0_13] : memref<1x32xf32, #tpu.memory_space<vmem>>, vector<1x32xf32>
    %c0_14 = arith.constant 0 : index
    %c0_15 = arith.constant 0 : index
    %11 = vector.load %arg10[%c0_14, %c0_15] : memref<32x64xf32, #tpu.memory_space<vmem>>, vector<32x64xf32>
    %c0_16 = arith.constant 0 : index
    %c0_17 = arith.constant 0 : index
    %12 = vector.load %arg11[%c0_16, %c0_17] : memref<1x64xf32, #tpu.memory_space<vmem>>, vector<1x64xf32>
    %c0_18 = arith.constant 0 : index
    %c0_19 = arith.constant 0 : index
    %13 = vector.load %arg12[%c0_18, %c0_19] : memref<64x32xf32, #tpu.memory_space<vmem>>, vector<64x32xf32>
    %c0_20 = arith.constant 0 : index
    %c0_21 = arith.constant 0 : index
    %14 = vector.load %arg13[%c0_20, %c0_21] : memref<1x32xf32, #tpu.memory_space<vmem>>, vector<1x32xf32>
    %cst = arith.constant dense<0.000000e+00> : vector<64x96xf32>
    %15 = tpu.matmul %5, %7, %cst {dimension_numbers = #tpu.dot_dimension_numbers<[1], [0], [0], [1], [0, 0, 1, 1], [], []>} : vector<64x32xf32>, vector<32x96xf32>, vector<64x96xf32> -> vector<64x96xf32>
    %16 = vector.broadcast %8 : vector<1x96xf32> to vector<64x96xf32>
    %17 = arith.addf %15, %16 : vector<64x96xf32>
    %18 = vector.shape_cast %17 : vector<64x96xf32> to vector<8x8x96xf32>
    %19 = vector.extract_strided_slice %18 {offsets = [0, 0, 0], sizes = [8, 8, 8], strides = [1, 1, 1]} : vector<8x8x96xf32> to vector<8x8x8xf32>
    %20 = vector.extract_strided_slice %18 {offsets = [0, 0, 8], sizes = [8, 8, 8], strides = [1, 1, 1]} : vector<8x8x96xf32> to vector<8x8x8xf32>
    %21 = vector.extract_strided_slice %18 {offsets = [0, 0, 16], sizes = [8, 8, 8], strides = [1, 1, 1]} : vector<8x8x96xf32> to vector<8x8x8xf32>
    %22 = vector.extract_strided_slice %18 {offsets = [0, 0, 24], sizes = [8, 8, 8], strides = [1, 1, 1]} : vector<8x8x96xf32> to vector<8x8x8xf32>
    %23 = tpu.concatenate %19, %20, %21, %22 in 1 : vector<8x8x8xf32>, vector<8x8x8xf32>, vector<8x8x8xf32>, vector<8x8x8xf32> -> vector<8x32x8xf32>
    %24 = vector.extract_strided_slice %18 {offsets = [0, 0, 32], sizes = [8, 8, 8], strides = [1, 1, 1]} : vector<8x8x96xf32> to vector<8x8x8xf32>
    %25 = vector.extract_strided_slice %18 {offsets = [0, 0, 40], sizes = [8, 8, 8], strides = [1, 1, 1]} : vector<8x8x96xf32> to vector<8x8x8xf32>
    %26 = vector.extract_strided_slice %18 {offsets = [0, 0, 48], sizes = [8, 8, 8], strides = [1, 1, 1]} : vector<8x8x96xf32> to vector<8x8x8xf32>
    %27 = vector.extract_strided_slice %18 {offsets = [0, 0, 56], sizes = [8, 8, 8], strides = [1, 1, 1]} : vector<8x8x96xf32> to vector<8x8x8xf32>
    %28 = tpu.concatenate %24, %25, %26, %27 in 1 : vector<8x8x8xf32>, vector<8x8x8xf32>, vector<8x8x8xf32>, vector<8x8x8xf32> -> vector<8x32x8xf32>
    %29 = vector.extract_strided_slice %18 {offsets = [0, 0, 64], sizes = [8, 8, 8], strides = [1, 1, 1]} : vector<8x8x96xf32> to vector<8x8x8xf32>
    %30 = vector.extract_strided_slice %18 {offsets = [0, 0, 72], sizes = [8, 8, 8], strides = [1, 1, 1]} : vector<8x8x96xf32> to vector<8x8x8xf32>
    %31 = vector.extract_strided_slice %18 {offsets = [0, 0, 80], sizes = [8, 8, 8], strides = [1, 1, 1]} : vector<8x8x96xf32> to vector<8x8x8xf32>
    %32 = vector.extract_strided_slice %18 {offsets = [0, 0, 88], sizes = [8, 8, 8], strides = [1, 1, 1]} : vector<8x8x96xf32> to vector<8x8x8xf32>
    %33 = tpu.concatenate %29, %30, %31, %32 in 1 : vector<8x8x8xf32>, vector<8x8x8xf32>, vector<8x8x8xf32>, vector<8x8x8xf32> -> vector<8x32x8xf32>
    "tpu.trace_start"() <{level = 10 : i32, message = "bik,bjk->bij"}> : () -> ()
    %cst_22 = arith.constant dense<0.000000e+00> : vector<8x32x32xf32>
    %34 = tpu.matmul %23, %28, %cst_22 {dimension_numbers = #tpu.dot_dimension_numbers<[2], [2], [1], [1], [0, 0, 0, 1, 1, 1], [0], [0]>} : vector<8x32x8xf32>, vector<8x32x8xf32>, vector<8x32x32xf32> -> vector<8x32x32xf32>
    "tpu.trace_stop"() : () -> ()
    %cst_23 = arith.constant 0.353553385 : f32
    %35 = vector.broadcast %cst_23 : f32 to vector<8x32x32xf32>
    %36 = arith.mulf %34, %35 : vector<8x32x32xf32>
    %37 = vector.shape_cast %6 : vector<32x32xf32> to vector<1x32x32xf32>
    %38 = vector.broadcast %37 : vector<1x32x32xf32> to vector<8x32x32xf32>
    %39 = arith.addf %36, %38 : vector<8x32x32xf32>
    %cst_24 = arith.constant dense<0xFF800000> : vector<8x32xf32>
    %40 = vector.multi_reduction <maximumf>, %39, %cst_24 [2] : vector<8x32x32xf32> to vector<8x32xf32>
    %41 = vector.shape_cast %40 : vector<8x32xf32> to vector<8x32x1xf32>
    %42 = vector.broadcast %41 : vector<8x32x1xf32> to vector<8x32x32xf32>
    %43 = arith.subf %39, %42 : vector<8x32x32xf32>
    %44 = math.exp %43 : vector<8x32x32xf32>
    %cst_25 = arith.constant dense<0.000000e+00> : vector<8x32xf32>
    %45 = vector.multi_reduction <add>, %44, %cst_25 [2] : vector<8x32x32xf32> to vector<8x32xf32>
    %46 = vector.shape_cast %45 : vector<8x32xf32> to vector<8x32x1xf32>
    %47 = tpu.reciprocal %46 {approx = true} : vector<8x32x1xf32> -> vector<8x32x1xf32>
    %48 = vector.broadcast %47 : vector<8x32x1xf32> to vector<8x32x32xf32>
    %49 = arith.mulf %44, %48 : vector<8x32x32xf32>
    "tpu.trace_start"() <{level = 10 : i32, message = "bij,bjk->bik"}> : () -> ()
    %cst_26 = arith.constant dense<0.000000e+00> : vector<8x32x8xf32>
    %50 = tpu.matmul %49, %33, %cst_26 {dimension_numbers = #tpu.dot_dimension_numbers<[2], [1], [1], [2], [0, 0, 0, 1, 1, 2], [0], [0]>} : vector<8x32x32xf32>, vector<8x32x8xf32>, vector<8x32x8xf32> -> vector<8x32x8xf32>
    "tpu.trace_stop"() : () -> ()
    %51 = vector.extract_strided_slice %50 {offsets = [0, 0, 0], sizes = [8, 8, 8], strides = [1, 1, 1]} : vector<8x32x8xf32> to vector<8x8x8xf32>
    %52 = vector.extract_strided_slice %50 {offsets = [0, 8, 0], sizes = [8, 8, 8], strides = [1, 1, 1]} : vector<8x32x8xf32> to vector<8x8x8xf32>
    %53 = vector.extract_strided_slice %50 {offsets = [0, 16, 0], sizes = [8, 8, 8], strides = [1, 1, 1]} : vector<8x32x8xf32> to vector<8x8x8xf32>
    %54 = vector.extract_strided_slice %50 {offsets = [0, 24, 0], sizes = [8, 8, 8], strides = [1, 1, 1]} : vector<8x32x8xf32> to vector<8x8x8xf32>
    %55 = tpu.concatenate %51, %52, %53, %54 in 2 : vector<8x8x8xf32>, vector<8x8x8xf32>, vector<8x8x8xf32>, vector<8x8x8xf32> -> vector<8x8x32xf32>
    %56 = vector.shape_cast %55 : vector<8x8x32xf32> to vector<64x32xf32>
    %cst_27 = arith.constant dense<0.000000e+00> : vector<64x32xf32>
    %57 = tpu.matmul %56, %9, %cst_27 {dimension_numbers = #tpu.dot_dimension_numbers<[1], [0], [0], [1], [0, 0, 1, 1], [], []>} : vector<64x32xf32>, vector<32x32xf32>, vector<64x32xf32> -> vector<64x32xf32>
    %58 = vector.broadcast %10 : vector<1x32xf32> to vector<64x32xf32>
    %59 = arith.addf %57, %58 : vector<64x32xf32>
    %60 = arith.addf %59, %5 : vector<64x32xf32>
    %c0_28 = arith.constant 0 : index
    %c0_29 = arith.constant 0 : index
    %61 = vector.load %arg8[%c0_28, %c0_29] : memref<1x32xf32, #tpu.memory_space<vmem>>, vector<1x32xf32>
    %c0_30 = arith.constant 0 : index
    %c0_31 = arith.constant 0 : index
    %62 = vector.load %arg9[%c0_30, %c0_31] : memref<1x32xf32, #tpu.memory_space<vmem>>, vector<1x32xf32>
    %cst_32 = arith.constant dense<0.000000e+00> : vector<64xf32>
    %63 = vector.multi_reduction <add>, %60, %cst_32 [1] : vector<64x32xf32> to vector<64xf32>
    %64 = vector.shape_cast %63 : vector<64xf32> to vector<64x1xf32>
    %cst_33 = arith.constant 3.200000e+01 : f32
    %65 = vector.broadcast %cst_33 : f32 to vector<64x1xf32>
    %66 = arith.divf %64, %65 : vector<64x1xf32>
    %67 = vector.broadcast %66 : vector<64x1xf32> to vector<64x32xf32>
    %68 = arith.subf %60, %67 : vector<64x32xf32>
    %69 = arith.mulf %68, %68 : vector<64x32xf32>
    %cst_34 = arith.constant dense<0.000000e+00> : vector<64xf32>
    %70 = vector.multi_reduction <add>, %69, %cst_34 [1] : vector<64x32xf32> to vector<64xf32>
    %71 = vector.shape_cast %70 : vector<64xf32> to vector<64x1xf32>
    %cst_35 = arith.constant 3.200000e+01 : f32
    %72 = vector.broadcast %cst_35 : f32 to vector<64x1xf32>
    %73 = arith.divf %71, %72 : vector<64x1xf32>
    %74 = vector.broadcast %66 : vector<64x1xf32> to vector<64x32xf32>
    %75 = arith.subf %60, %74 : vector<64x32xf32>
    %cst_36 = arith.constant 9.99999974E-6 : f32
    %76 = vector.broadcast %cst_36 : f32 to vector<64x1xf32>
    %77 = arith.addf %73, %76 : vector<64x1xf32>
    %78 = math.rsqrt %77 : vector<64x1xf32>
    %79 = vector.broadcast %78 : vector<64x1xf32> to vector<64x32xf32>
    %80 = arith.mulf %75, %79 : vector<64x32xf32>
    %81 = vector.broadcast %61 : vector<1x32xf32> to vector<64x32xf32>
    %82 = arith.mulf %80, %81 : vector<64x32xf32>
    %83 = vector.broadcast %62 : vector<1x32xf32> to vector<64x32xf32>
    %84 = arith.addf %82, %83 : vector<64x32xf32>
    %cst_37 = arith.constant dense<0.000000e+00> : vector<64x64xf32>
    %85 = tpu.matmul %84, %11, %cst_37 {dimension_numbers = #tpu.dot_dimension_numbers<[1], [0], [0], [1], [0, 0, 1, 1], [], []>} : vector<64x32xf32>, vector<32x64xf32>, vector<64x64xf32> -> vector<64x64xf32>
    %86 = vector.broadcast %12 : vector<1x64xf32> to vector<64x64xf32>
    %87 = arith.addf %85, %86 : vector<64x64xf32>
    %cst_38 = arith.constant 0.000000e+00 : f32
    %88 = vector.broadcast %cst_38 : f32 to vector<64x64xf32>
    %89 = arith.maximumf %87, %88 : vector<64x64xf32>
    %cst_39 = arith.constant dense<0.000000e+00> : vector<64x32xf32>
    %90 = tpu.matmul %89, %13, %cst_39 {dimension_numbers = #tpu.dot_dimension_numbers<[1], [0], [0], [1], [0, 0, 1, 1], [], []>} : vector<64x64xf32>, vector<64x32xf32>, vector<64x32xf32> -> vector<64x32xf32>
    %91 = vector.broadcast %14 : vector<1x32xf32> to vector<64x32xf32>
    %92 = arith.addf %90, %91 : vector<64x32xf32>
    %c0_40 = arith.constant 0 : index
    %c0_41 = arith.constant 0 : index
    %93 = vector.load %arg14[%c0_40, %c0_41] : memref<1x32xf32, #tpu.memory_space<vmem>>, vector<1x32xf32>
    %c0_42 = arith.constant 0 : index
    %c0_43 = arith.constant 0 : index
    %94 = vector.load %arg15[%c0_42, %c0_43] : memref<1x32xf32, #tpu.memory_space<vmem>>, vector<1x32xf32>
    %cst_44 = arith.constant dense<0.000000e+00> : vector<64xf32>
    %95 = vector.multi_reduction <add>, %92, %cst_44 [1] : vector<64x32xf32> to vector<64xf32>
    %96 = vector.shape_cast %95 : vector<64xf32> to vector<64x1xf32>
    %cst_45 = arith.constant 3.200000e+01 : f32
    %97 = vector.broadcast %cst_45 : f32 to vector<64x1xf32>
    %98 = arith.divf %96, %97 : vector<64x1xf32>
    %99 = vector.broadcast %98 : vector<64x1xf32> to vector<64x32xf32>
    %100 = arith.subf %92, %99 : vector<64x32xf32>
    %101 = arith.mulf %100, %100 : vector<64x32xf32>
    %cst_46 = arith.constant dense<0.000000e+00> : vector<64xf32>
    %102 = vector.multi_reduction <add>, %101, %cst_46 [1] : vector<64x32xf32> to vector<64xf32>
    %103 = vector.shape_cast %102 : vector<64xf32> to vector<64x1xf32>
    %cst_47 = arith.constant 3.200000e+01 : f32
    %104 = vector.broadcast %cst_47 : f32 to vector<64x1xf32>
    %105 = arith.divf %103, %104 : vector<64x1xf32>
    %106 = vector.broadcast %98 : vector<64x1xf32> to vector<64x32xf32>
    %107 = arith.subf %92, %106 : vector<64x32xf32>
    %cst_48 = arith.constant 9.99999974E-6 : f32
    %108 = vector.broadcast %cst_48 : f32 to vector<64x1xf32>
    %109 = arith.addf %105, %108 : vector<64x1xf32>
    %110 = math.rsqrt %109 : vector<64x1xf32>
    %111 = vector.broadcast %110 : vector<64x1xf32> to vector<64x32xf32>
    %112 = arith.mulf %107, %111 : vector<64x32xf32>
    %113 = vector.broadcast %93 : vector<1x32xf32> to vector<64x32xf32>
    %114 = arith.mulf %112, %113 : vector<64x32xf32>
    %115 = vector.broadcast %94 : vector<1x32xf32> to vector<64x32xf32>
    %116 = arith.addf %114, %115 : vector<64x32xf32>
    %cst_49 = arith.constant dense<0.000000e+00> : vector<64x96xf32>
    %117 = tpu.matmul %116, %7, %cst_49 {dimension_numbers = #tpu.dot_dimension_numbers<[1], [0], [0], [1], [0, 0, 1, 1], [], []>} : vector<64x32xf32>, vector<32x96xf32>, vector<64x96xf32> -> vector<64x96xf32>
    %118 = vector.broadcast %8 : vector<1x96xf32> to vector<64x96xf32>
    %119 = arith.addf %117, %118 : vector<64x96xf32>
    %120 = vector.shape_cast %119 : vector<64x96xf32> to vector<8x8x96xf32>
    %121 = vector.extract_strided_slice %120 {offsets = [0, 0, 0], sizes = [8, 8, 8], strides = [1, 1, 1]} : vector<8x8x96xf32> to vector<8x8x8xf32>
    %122 = vector.extract_strided_slice %120 {offsets = [0, 0, 8], sizes = [8, 8, 8], strides = [1, 1, 1]} : vector<8x8x96xf32> to vector<8x8x8xf32>
    %123 = vector.extract_strided_slice %120 {offsets = [0, 0, 16], sizes = [8, 8, 8], strides = [1, 1, 1]} : vector<8x8x96xf32> to vector<8x8x8xf32>
    %124 = vector.extract_strided_slice %120 {offsets = [0, 0, 24], sizes = [8, 8, 8], strides = [1, 1, 1]} : vector<8x8x96xf32> to vector<8x8x8xf32>
    %125 = tpu.concatenate %121, %122, %123, %124 in 1 : vector<8x8x8xf32>, vector<8x8x8xf32>, vector<8x8x8xf32>, vector<8x8x8xf32> -> vector<8x32x8xf32>
    %126 = vector.extract_strided_slice %120 {offsets = [0, 0, 32], sizes = [8, 8, 8], strides = [1, 1, 1]} : vector<8x8x96xf32> to vector<8x8x8xf32>
    %127 = vector.extract_strided_slice %120 {offsets = [0, 0, 40], sizes = [8, 8, 8], strides = [1, 1, 1]} : vector<8x8x96xf32> to vector<8x8x8xf32>
    %128 = vector.extract_strided_slice %120 {offsets = [0, 0, 48], sizes = [8, 8, 8], strides = [1, 1, 1]} : vector<8x8x96xf32> to vector<8x8x8xf32>
    %129 = vector.extract_strided_slice %120 {offsets = [0, 0, 56], sizes = [8, 8, 8], strides = [1, 1, 1]} : vector<8x8x96xf32> to vector<8x8x8xf32>
    %130 = tpu.concatenate %126, %127, %128, %129 in 1 : vector<8x8x8xf32>, vector<8x8x8xf32>, vector<8x8x8xf32>, vector<8x8x8xf32> -> vector<8x32x8xf32>
    %131 = vector.extract_strided_slice %120 {offsets = [0, 0, 64], sizes = [8, 8, 8], strides = [1, 1, 1]} : vector<8x8x96xf32> to vector<8x8x8xf32>
    %132 = vector.extract_strided_slice %120 {offsets = [0, 0, 72], sizes = [8, 8, 8], strides = [1, 1, 1]} : vector<8x8x96xf32> to vector<8x8x8xf32>
    %133 = vector.extract_strided_slice %120 {offsets = [0, 0, 80], sizes = [8, 8, 8], strides = [1, 1, 1]} : vector<8x8x96xf32> to vector<8x8x8xf32>
    %134 = vector.extract_strided_slice %120 {offsets = [0, 0, 88], sizes = [8, 8, 8], strides = [1, 1, 1]} : vector<8x8x96xf32> to vector<8x8x8xf32>
    %135 = tpu.concatenate %131, %132, %133, %134 in 1 : vector<8x8x8xf32>, vector<8x8x8xf32>, vector<8x8x8xf32>, vector<8x8x8xf32> -> vector<8x32x8xf32>
    "tpu.trace_start"() <{level = 10 : i32, message = "bik,bjk->bij"}> : () -> ()
    %cst_50 = arith.constant dense<0.000000e+00> : vector<8x32x32xf32>
    %136 = tpu.matmul %125, %130, %cst_50 {dimension_numbers = #tpu.dot_dimension_numbers<[2], [2], [1], [1], [0, 0, 0, 1, 1, 1], [0], [0]>} : vector<8x32x8xf32>, vector<8x32x8xf32>, vector<8x32x32xf32> -> vector<8x32x32xf32>
    "tpu.trace_stop"() : () -> ()
    %cst_51 = arith.constant 0.353553385 : f32
    %137 = vector.broadcast %cst_51 : f32 to vector<8x32x32xf32>
    %138 = arith.mulf %136, %137 : vector<8x32x32xf32>
    %139 = vector.shape_cast %6 : vector<32x32xf32> to vector<1x32x32xf32>
    %140 = vector.broadcast %139 : vector<1x32x32xf32> to vector<8x32x32xf32>
    %141 = arith.addf %138, %140 : vector<8x32x32xf32>
    %cst_52 = arith.constant dense<0xFF800000> : vector<8x32xf32>
    %142 = vector.multi_reduction <maximumf>, %141, %cst_52 [2] : vector<8x32x32xf32> to vector<8x32xf32>
    %143 = vector.shape_cast %142 : vector<8x32xf32> to vector<8x32x1xf32>
    %144 = vector.broadcast %143 : vector<8x32x1xf32> to vector<8x32x32xf32>
    %145 = arith.subf %141, %144 : vector<8x32x32xf32>
    %146 = math.exp %145 : vector<8x32x32xf32>
    %cst_53 = arith.constant dense<0.000000e+00> : vector<8x32xf32>
    %147 = vector.multi_reduction <add>, %146, %cst_53 [2] : vector<8x32x32xf32> to vector<8x32xf32>
    %148 = vector.shape_cast %147 : vector<8x32xf32> to vector<8x32x1xf32>
    %149 = tpu.reciprocal %148 {approx = true} : vector<8x32x1xf32> -> vector<8x32x1xf32>
    %150 = vector.broadcast %149 : vector<8x32x1xf32> to vector<8x32x32xf32>
    %151 = arith.mulf %146, %150 : vector<8x32x32xf32>
    "tpu.trace_start"() <{level = 10 : i32, message = "bij,bjk->bik"}> : () -> ()
    %cst_54 = arith.constant dense<0.000000e+00> : vector<8x32x8xf32>
    %152 = tpu.matmul %151, %135, %cst_54 {dimension_numbers = #tpu.dot_dimension_numbers<[2], [1], [1], [2], [0, 0, 0, 1, 1, 2], [0], [0]>} : vector<8x32x32xf32>, vector<8x32x8xf32>, vector<8x32x8xf32> -> vector<8x32x8xf32>
    "tpu.trace_stop"() : () -> ()
    %153 = vector.extract_strided_slice %152 {offsets = [0, 0, 0], sizes = [8, 8, 8], strides = [1, 1, 1]} : vector<8x32x8xf32> to vector<8x8x8xf32>
    %154 = vector.extract_strided_slice %152 {offsets = [0, 8, 0], sizes = [8, 8, 8], strides = [1, 1, 1]} : vector<8x32x8xf32> to vector<8x8x8xf32>
    %155 = vector.extract_strided_slice %152 {offsets = [0, 16, 0], sizes = [8, 8, 8], strides = [1, 1, 1]} : vector<8x32x8xf32> to vector<8x8x8xf32>
    %156 = vector.extract_strided_slice %152 {offsets = [0, 24, 0], sizes = [8, 8, 8], strides = [1, 1, 1]} : vector<8x32x8xf32> to vector<8x8x8xf32>
    %157 = tpu.concatenate %153, %154, %155, %156 in 2 : vector<8x8x8xf32>, vector<8x8x8xf32>, vector<8x8x8xf32>, vector<8x8x8xf32> -> vector<8x8x32xf32>
    %158 = vector.shape_cast %157 : vector<8x8x32xf32> to vector<64x32xf32>
    %cst_55 = arith.constant dense<0.000000e+00> : vector<64x32xf32>
    %159 = tpu.matmul %158, %9, %cst_55 {dimension_numbers = #tpu.dot_dimension_numbers<[1], [0], [0], [1], [0, 0, 1, 1], [], []>} : vector<64x32xf32>, vector<32x32xf32>, vector<64x32xf32> -> vector<64x32xf32>
    %160 = vector.broadcast %10 : vector<1x32xf32> to vector<64x32xf32>
    %161 = arith.addf %159, %160 : vector<64x32xf32>
    %162 = arith.addf %161, %116 : vector<64x32xf32>
    %c0_56 = arith.constant 0 : index
    %c0_57 = arith.constant 0 : index
    %163 = vector.load %arg8[%c0_56, %c0_57] : memref<1x32xf32, #tpu.memory_space<vmem>>, vector<1x32xf32>
    %c0_58 = arith.constant 0 : index
    %c0_59 = arith.constant 0 : index
    %164 = vector.load %arg9[%c0_58, %c0_59] : memref<1x32xf32, #tpu.memory_space<vmem>>, vector<1x32xf32>
    %cst_60 = arith.constant dense<0.000000e+00> : vector<64xf32>
    %165 = vector.multi_reduction <add>, %162, %cst_60 [1] : vector<64x32xf32> to vector<64xf32>
    %166 = vector.shape_cast %165 : vector<64xf32> to vector<64x1xf32>
    %cst_61 = arith.constant 3.200000e+01 : f32
    %167 = vector.broadcast %cst_61 : f32 to vector<64x1xf32>
    %168 = arith.divf %166, %167 : vector<64x1xf32>
    %169 = vector.broadcast %168 : vector<64x1xf32> to vector<64x32xf32>
    %170 = arith.subf %162, %169 : vector<64x32xf32>
    %171 = arith.mulf %170, %170 : vector<64x32xf32>
    %cst_62 = arith.constant dense<0.000000e+00> : vector<64xf32>
    %172 = vector.multi_reduction <add>, %171, %cst_62 [1] : vector<64x32xf32> to vector<64xf32>
    %173 = vector.shape_cast %172 : vector<64xf32> to vector<64x1xf32>
    %cst_63 = arith.constant 3.200000e+01 : f32
    %174 = vector.broadcast %cst_63 : f32 to vector<64x1xf32>
    %175 = arith.divf %173, %174 : vector<64x1xf32>
    %176 = vector.broadcast %168 : vector<64x1xf32> to vector<64x32xf32>
    %177 = arith.subf %162, %176 : vector<64x32xf32>
    %cst_64 = arith.constant 9.99999974E-6 : f32
    %178 = vector.broadcast %cst_64 : f32 to vector<64x1xf32>
    %179 = arith.addf %175, %178 : vector<64x1xf32>
    %180 = math.rsqrt %179 : vector<64x1xf32>
    %181 = vector.broadcast %180 : vector<64x1xf32> to vector<64x32xf32>
    %182 = arith.mulf %177, %181 : vector<64x32xf32>
    %183 = vector.broadcast %163 : vector<1x32xf32> to vector<64x32xf32>
    %184 = arith.mulf %182, %183 : vector<64x32xf32>
    %185 = vector.broadcast %164 : vector<1x32xf32> to vector<64x32xf32>
    %186 = arith.addf %184, %185 : vector<64x32xf32>
    %cst_65 = arith.constant dense<0.000000e+00> : vector<64x64xf32>
    %187 = tpu.matmul %186, %11, %cst_65 {dimension_numbers = #tpu.dot_dimension_numbers<[1], [0], [0], [1], [0, 0, 1, 1], [], []>} : vector<64x32xf32>, vector<32x64xf32>, vector<64x64xf32> -> vector<64x64xf32>
    %188 = vector.broadcast %12 : vector<1x64xf32> to vector<64x64xf32>
    %189 = arith.addf %187, %188 : vector<64x64xf32>
    %cst_66 = arith.constant 0.000000e+00 : f32
    %190 = vector.broadcast %cst_66 : f32 to vector<64x64xf32>
    %191 = arith.maximumf %189, %190 : vector<64x64xf32>
    %cst_67 = arith.constant dense<0.000000e+00> : vector<64x32xf32>
    %192 = tpu.matmul %191, %13, %cst_67 {dimension_numbers = #tpu.dot_dimension_numbers<[1], [0], [0], [1], [0, 0, 1, 1], [], []>} : vector<64x64xf32>, vector<64x32xf32>, vector<64x32xf32> -> vector<64x32xf32>
    %193 = vector.broadcast %14 : vector<1x32xf32> to vector<64x32xf32>
    %194 = arith.addf %192, %193 : vector<64x32xf32>
    %c0_68 = arith.constant 0 : index
    %c0_69 = arith.constant 0 : index
    %195 = vector.load %arg14[%c0_68, %c0_69] : memref<1x32xf32, #tpu.memory_space<vmem>>, vector<1x32xf32>
    %c0_70 = arith.constant 0 : index
    %c0_71 = arith.constant 0 : index
    %196 = vector.load %arg15[%c0_70, %c0_71] : memref<1x32xf32, #tpu.memory_space<vmem>>, vector<1x32xf32>
    %cst_72 = arith.constant dense<0.000000e+00> : vector<64xf32>
    %197 = vector.multi_reduction <add>, %194, %cst_72 [1] : vector<64x32xf32> to vector<64xf32>
    %198 = vector.shape_cast %197 : vector<64xf32> to vector<64x1xf32>
    %cst_73 = arith.constant 3.200000e+01 : f32
    %199 = vector.broadcast %cst_73 : f32 to vector<64x1xf32>
    %200 = arith.divf %198, %199 : vector<64x1xf32>
    %201 = vector.broadcast %200 : vector<64x1xf32> to vector<64x32xf32>
    %202 = arith.subf %194, %201 : vector<64x32xf32>
    %203 = arith.mulf %202, %202 : vector<64x32xf32>
    %cst_74 = arith.constant dense<0.000000e+00> : vector<64xf32>
    %204 = vector.multi_reduction <add>, %203, %cst_74 [1] : vector<64x32xf32> to vector<64xf32>
    %205 = vector.shape_cast %204 : vector<64xf32> to vector<64x1xf32>
    %cst_75 = arith.constant 3.200000e+01 : f32
    %206 = vector.broadcast %cst_75 : f32 to vector<64x1xf32>
    %207 = arith.divf %205, %206 : vector<64x1xf32>
    %208 = vector.broadcast %200 : vector<64x1xf32> to vector<64x32xf32>
    %209 = arith.subf %194, %208 : vector<64x32xf32>
    %cst_76 = arith.constant 9.99999974E-6 : f32
    %210 = vector.broadcast %cst_76 : f32 to vector<64x1xf32>
    %211 = arith.addf %207, %210 : vector<64x1xf32>
    %212 = math.rsqrt %211 : vector<64x1xf32>
    %213 = vector.broadcast %212 : vector<64x1xf32> to vector<64x32xf32>
    %214 = arith.mulf %209, %213 : vector<64x32xf32>
    %215 = vector.broadcast %195 : vector<1x32xf32> to vector<64x32xf32>
    %216 = arith.mulf %214, %215 : vector<64x32xf32>
    %217 = vector.broadcast %196 : vector<1x32xf32> to vector<64x32xf32>
    %218 = arith.addf %216, %217 : vector<64x32xf32>
    %219 = vector.shape_cast %218 : vector<64x32xf32> to vector<8x8x32xf32>
    %220 = vector.extract_strided_slice %219 {offsets = [0, 0, 0], sizes = [8, 1, 32], strides = [1, 1, 1]} : vector<8x8x32xf32> to vector<8x1x32xf32>
    %221 = vector.shape_cast %220 : vector<8x1x32xf32> to vector<8x32xf32>
    %222 = vector.extract_strided_slice %219 {offsets = [0, 1, 0], sizes = [8, 1, 32], strides = [1, 1, 1]} : vector<8x8x32xf32> to vector<8x1x32xf32>
    %223 = vector.shape_cast %222 : vector<8x1x32xf32> to vector<8x32xf32>
    %224 = vector.extract_strided_slice %219 {offsets = [0, 2, 0], sizes = [8, 1, 32], strides = [1, 1, 1]} : vector<8x8x32xf32> to vector<8x1x32xf32>
    %225 = vector.shape_cast %224 : vector<8x1x32xf32> to vector<8x32xf32>
    %226 = vector.extract_strided_slice %219 {offsets = [0, 3, 0], sizes = [8, 1, 32], strides = [1, 1, 1]} : vector<8x8x32xf32> to vector<8x1x32xf32>
    %227 = vector.shape_cast %226 : vector<8x1x32xf32> to vector<8x32xf32>
    %228 = vector.extract_strided_slice %219 {offsets = [0, 4, 0], sizes = [8, 1, 32], strides = [1, 1, 1]} : vector<8x8x32xf32> to vector<8x1x32xf32>
    %229 = vector.shape_cast %228 : vector<8x1x32xf32> to vector<8x32xf32>
    %230 = vector.extract_strided_slice %219 {offsets = [0, 5, 0], sizes = [8, 1, 32], strides = [1, 1, 1]} : vector<8x8x32xf32> to vector<8x1x32xf32>
    %231 = vector.shape_cast %230 : vector<8x1x32xf32> to vector<8x32xf32>
    %232 = vector.extract_strided_slice %219 {offsets = [0, 6, 0], sizes = [8, 1, 32], strides = [1, 1, 1]} : vector<8x8x32xf32> to vector<8x1x32xf32>
    %233 = vector.shape_cast %232 : vector<8x1x32xf32> to vector<8x32xf32>
    %234 = vector.extract_strided_slice %219 {offsets = [0, 7, 0], sizes = [8, 1, 32], strides = [1, 1, 1]} : vector<8x8x32xf32> to vector<8x1x32xf32>
    %235 = vector.shape_cast %234 : vector<8x1x32xf32> to vector<8x32xf32>
    %236 = tpu.concatenate %221, %223, %225, %227, %229, %231, %233, %235 in 1 : vector<8x32xf32>, vector<8x32xf32>, vector<8x32xf32>, vector<8x32xf32>, vector<8x32xf32>, vector<8x32xf32>, vector<8x32xf32>, vector<8x32xf32> -> vector<8x256xf32>
    %c0_77 = arith.constant 0 : index
    %c0_78 = arith.constant 0 : index
    %237 = vector.load %arg16[%c0_77, %c0_78] : memref<256x128xf32, #tpu.memory_space<vmem>>, vector<256x128xf32>
    %cst_79 = arith.constant dense<0.000000e+00> : vector<8x128xf32>
    %238 = tpu.matmul %236, %237, %cst_79 {dimension_numbers = #tpu.dot_dimension_numbers<[1], [0], [0], [1], [0, 0, 1, 1], [], []>} : vector<8x256xf32>, vector<256x128xf32>, vector<8x128xf32> -> vector<8x128xf32>
    %c0_80 = arith.constant 0 : index
    %c0_81 = arith.constant 0 : index
    %239 = vector.load %arg17[%c0_80, %c0_81] : memref<1x128xf32, #tpu.memory_space<vmem>>, vector<1x128xf32>
    %240 = vector.broadcast %239 : vector<1x128xf32> to vector<8x128xf32>
    %241 = arith.addf %238, %240 : vector<8x128xf32>
    %c0_82 = arith.constant 0 : index
    %c0_83 = arith.constant 0 : index
    %242 = vector.load %arg18[%c0_82, %c0_83] : memref<8x128xf32, #tpu.memory_space<vmem>>, vector<8x128xf32>
    tpu.vector_store %arg18[%c0_82, %c0_83], %241 {strides = array<i32>} : memref<8x128xf32, #tpu.memory_space<vmem>>, vector<8x128xf32>,
    return
  }
  func.func @transform_0(%arg0: i32) -> (i32, i32, i32) {
    %c0_i32 = arith.constant 0 : i32
    %c0_i32_0 = arith.constant 0 : i32
    %c0_i32_1 = arith.constant 0 : i32
    return %arg0, %c0_i32, %c0_i32_0 : i32, i32, i32
  }
  func.func @transform_1(%arg0: i32) -> (i32, i32) {
    %c0_i32 = arith.constant 0 : i32
    %c0_i32_0 = arith.constant 0 : i32
    %c0_i32_1 = arith.constant 0 : i32
    return %c0_i32, %c0_i32_0 : i32, i32
  }
  func.func @transform_2(%arg0: i32) -> (i32, i32) {
    %c0_i32 = arith.constant 0 : i32
    %c0_i32_0 = arith.constant 0 : i32
    %c0_i32_1 = arith.constant 0 : i32
    return %c0_i32, %c0_i32_0 : i32, i32
  }
  func.func @transform_3(%arg0: i32) -> (i32, i32) {
    %c0_i32 = arith.constant 0 : i32
    %c0_i32_0 = arith.constant 0 : i32
    %c0_i32_1 = arith.constant 0 : i32
    return %c0_i32, %c0_i32_0 : i32, i32
  }
  func.func @transform_4(%arg0: i32) -> (i32, i32) {
    %c0_i32 = arith.constant 0 : i32
    %c0_i32_0 = arith.constant 0 : i32
    %c0_i32_1 = arith.constant 0 : i32
    return %c0_i32, %c0_i32_0 : i32, i32
  }
  func.func @transform_5(%arg0: i32) -> (i32, i32) {
    %c0_i32 = arith.constant 0 : i32
    %c0_i32_0 = arith.constant 0 : i32
    %c0_i32_1 = arith.constant 0 : i32
    return %c0_i32, %c0_i32_0 : i32, i32
  }
  func.func @transform_6(%arg0: i32) -> (i32, i32) {
    %c0_i32 = arith.constant 0 : i32
    %c0_i32_0 = arith.constant 0 : i32
    %c0_i32_1 = arith.constant 0 : i32
    return %c0_i32, %c0_i32_0 : i32, i32
  }
  func.func @transform_7(%arg0: i32) -> (i32, i32) {
    %c0_i32 = arith.constant 0 : i32
    %c0_i32_0 = arith.constant 0 : i32
    %c0_i32_1 = arith.constant 0 : i32
    return %c0_i32, %c0_i32_0 : i32, i32
  }
  func.func @transform_8(%arg0: i32) -> (i32, i32) {
    %c0_i32 = arith.constant 0 : i32
    %c0_i32_0 = arith.constant 0 : i32
    %c0_i32_1 = arith.constant 0 : i32
    return %c0_i32, %c0_i32_0 : i32, i32
  }
  func.func @transform_9(%arg0: i32) -> (i32, i32) {
    %c0_i32 = arith.constant 0 : i32
    %c0_i32_0 = arith.constant 0 : i32
    %c0_i32_1 = arith.constant 0 : i32
    return %c0_i32, %c0_i32_0 : i32, i32
  }
  func.func @transform_10(%arg0: i32) -> (i32, i32) {
    %c0_i32 = arith.constant 0 : i32
    %c0_i32_0 = arith.constant 0 : i32
    %c0_i32_1 = arith.constant 0 : i32
    return %c0_i32, %c0_i32_0 : i32, i32
  }
  func.func @transform_11(%arg0: i32) -> (i32, i32) {
    %c0_i32 = arith.constant 0 : i32
    %c0_i32_0 = arith.constant 0 : i32
    %c0_i32_1 = arith.constant 0 : i32
    return %c0_i32, %c0_i32_0 : i32, i32
  }
  func.func @transform_12(%arg0: i32) -> (i32, i32) {
    %c0_i32 = arith.constant 0 : i32
    %c0_i32_0 = arith.constant 0 : i32
    %c0_i32_1 = arith.constant 0 : i32
    return %c0_i32, %c0_i32_0 : i32, i32
  }
  func.func @transform_13(%arg0: i32) -> (i32, i32) {
    %c0_i32 = arith.constant 0 : i32
    %c0_i32_0 = arith.constant 0 : i32
    %c0_i32_1 = arith.constant 0 : i32
    return %c0_i32, %c0_i32_0 : i32, i32
  }
  func.func @transform_14(%arg0: i32) -> (i32, i32) {
    %c0_i32 = arith.constant 0 : i32
    %c0_i32_0 = arith.constant 0 : i32
    %c0_i32_1 = arith.constant 0 : i32
    return %c0_i32, %c0_i32_0 : i32, i32
  }
  func.func @transform_15(%arg0: i32) -> (i32, i32) {
    %c0_i32 = arith.constant 0 : i32
    %c0_i32_0 = arith.constant 0 : i32
    %c0_i32_1 = arith.constant 0 : i32
    return %c0_i32, %c0_i32_0 : i32, i32
  }
  func.func @transform_16(%arg0: i32) -> (i32, i32) {
    %c0_i32 = arith.constant 0 : i32
    %c0_i32_0 = arith.constant 0 : i32
    %c0_i32_1 = arith.constant 0 : i32
    return %c0_i32, %c0_i32_0 : i32, i32
  }
  func.func @transform_17(%arg0: i32) -> (i32, i32) {
    %c0_i32 = arith.constant 0 : i32
    %c0_i32_0 = arith.constant 0 : i32
    return %arg0, %c0_i32 : i32, i32
  }
}

</mosaic_0001>

<bundles_post_ra>
// kernel: transformer_forward.1
= control target key start
LH: loop header
LB: loop body
LE: loop exit
PB: predicated region body
PF: predicated region fallthrough
CT: control target
= control target key end

     0   :  { %s8998_s24 = smov 0   ;;  %s11634_s0 = inlined_call_operand.vmem [shape: f32[16,8,32], index: 0, kind: input, shape index: {}]   ;;  %s11635_s1 = inlined_call_operand.vmem [shape: f32[8,32], index: 1, kind: input, shape index: {}]   ;;  %s11636_s2 = inlined_call_operand.vmem [shape: f32[32,32], index: 2, kind: input, shape index: {}]   ;;  %s11637_s3 = inlined_call_operand.vmem [shape: f32[32,96], index: 3, kind: input, shape index: {}]   ;;  %s11638_s4 = inlined_call_operand.vmem [shape: f32[1,96], index: 4, kind: input, shape index: {}]   ;;  %s11639_s5 = inlined_call_operand.vmem [shape: f32[32,32], index: 5, kind: input, shape index: {}]   ;;  %s11640_s6 = inlined_call_operand.vmem [shape: f32[1,32], index: 6, kind: input, shape index: {}]   ;;  %s11641_s7 = inlined_call_operand.vmem [shape: f32[1,32], index: 7, kind: input, shape index: {}]   ;;  %s11642_s8 = inlined_call_operand.vmem [shape: f32[1,32], index: 8, kind: input, shape index: {}]   ;;  %s11643_s9 = inlined_call_operand.vmem [shape: f32[32,64], index: 9, kind: input, shape index: {}]   ;;  %s11644_s10 = inlined_call_operand.vmem [shape: f32[1,64], index: 10, kind: input, shape index: {}]   ;;  %s11645_s11 = inlined_call_operand.vmem [shape: f32[64,32], index: 11, kind: input, shape index: {}]   ;;  %s11646_s12 = inlined_call_operand.vmem [shape: f32[1,32], index: 12, kind: input, shape index: {}]   ;;  %s11647_s13 = inlined_call_operand.vmem [shape: f32[1,32], index: 13, kind: input, shape index: {}]   ;;  %s11648_s14 = inlined_call_operand.vmem [shape: f32[1,32], index: 14, kind: input, shape index: {}]   ;;  %s11649_s15 = inlined_call_operand.vmem [shape: f32[256,128], index: 15, kind: input, shape index: {}]   ;;  %s11650_s16 = inlined_call_operand.vmem [shape: f32[1,128], index: 16, kind: input, shape index: {}]   ;;  %s11651_s17 = inlined_call_operand.vmem [shape: f32[16,128], index: 17, kind: output, shape index: {}]  }
   0x1   :  { %11682 = sst [smem:[#allocation14_spill]] %s11634_s0 }
   0x2   :  { %11683 = sst [smem:[#allocation15_spill]] %s11635_s1 }
   0x3 LB: > { %s9004_s25 = sadd.s32 4294967295, %s8897_s24   ;;  %p7217_p0 = scmp.ge.s32.totalorder %s8897_s24, 1  ;;  %s8897_s24 = sphi %s8998_s24, %s27_s24  }
   0x4   : > { %p488_p1 = scmp.lt.s32.totalorder %s8897_s24, 3 }
   0x6   : > { %p489_p2 = pnand %p7217_p0, %p488_p1 }
   0x8   : > { %492 = sbr.rel (%p489_p2) target bundleno = 5420 (0x152c), region = 88 }
   0xd   : > { %v573_v0 = vld [vmem:[%s11637_s3 + $0x18] sm:$0xff]  ;;  %v572_v1 = vld [vmem:[%s11637_s3 + $0x10] sm:$0xff]  ;;  %s7218_s0 = sshll.u32 %s9004_s25, 3  ;;  %v571_v2 = vld [vmem:[%s11637_s3 + $0x8] sm:$0xff]  ;;  %s11684_s23 = sld [smem:[#allocation15_spill]]  ;;  %vm600_vm0 = vcmask 261120  }
   0xe   : > { %7887 = vmatprep.subr.mxu1 %v573_v0  ;;  %p540_p3 = scmp.lt.s32.totalorder %s7218_s0, 15  ;;  %v570_v3 = vld [vmem:[%s11637_s3] sm:$0xff]  ;;  %s11685_s28 = sld [smem:[#allocation14_spill]]  ;;  %vm794_vm1 = vcmask 64512   ;;  %vm3051_vm2 = vcmask 130048   ;;  %vm3060_vm3 = vcmask 195584  }
   0xf   : > { %7888 = vmatpush3.msra.mxu1 %v573_v0  ;;  %v7221_v21 = vld [vmem:[%s11638_s4] ss:$0 sm:$0xff]  ;;  %s8899_s18 = smov 112   ;;  %s8900_s19 = smov 104   ;;  %vm3496_vm4 = vcmask 523264   ;;  %vm6905_vm5 = vcmask 1041409  }
  0x10   : > { %7889 = vmatprep.subr.mxu1 %v572_v1  ;;  %s11738_s0 = smov (!%p540_p3, %s7218_s0), 15  ;;  %s8901_s1 = smov 120   ;;  %vm6908_vm6 = vcmask 1042434   ;;  %vm6911_vm7 = vcmask 1043459   ;;  %vm6914_vm8 = vcmask 1044484   ;;  %vm6917_vm9 = vcmask 1045509  }
  0x11   : > { %7890 = vmatpush3.msra.mxu1 %v572_v1  ;;  %s7219_s20 = sshll.u32 %s11738_s0, 3  ;;  %s8903_s21 = smov 64   ;;  %vm6920_vm10 = vcmask 1046534   ;;  %vm6923_vm11 = vcmask 1047559   ;;  %vm7045_vm12 = vcmask 785408  }
  0x12   : > { %7891 = vmatprep.subr.mxu1 %v571_v2  ;;  %s11668_s26 = smov 8   ;;  %s11666_s27 = smov 24  }
  0x13   : > { %v557_v4 = vld [vmem:[%s11684_s23] sm:$0xff]  ;;  %7892 = vmatpush3.msra.mxu1 %v571_v2  ;;  %s11664_s23 = smov 16   ;;  %s11726_s22 = smov 8  }
  0x14   : > { %s543_s29 = scalar_lea.vmem %s11685_s28, %s7219_s20  ;;  %7893 = vmatprep.subr.mxu1 %v570_v3  ;;  %s8902_s20 = smov 96  }
  0x15   : > { %v549_v5 = vld [vmem:[%s543_s29] sm:$0xff]  ;;  %v550_v6 = vld [vmem:[%s543_s29 + $0x8] sm:$0xff]  ;;  %v551_v7 = vld [vmem:[%s543_s29 + $0x10] sm:$0xff]  ;;  %7894 = vmatpush3.msra.mxu1 %v570_v3  ;;  %s11727_s28 = smov 24   ;;  %p545_p4 = scmp.lt.s32.totalorder %s9004_s25, 1 }
  0x16   : > { %v9027_v8 = vadd.f32 %v557_v4, %v549_v5  ;;  %v9029_v9 = vadd.f32 %v557_v4, %v550_v6  ;;  %v9031_v10 = vadd.f32 %v557_v4, %v551_v7  ;;  %v552_v11 = vld [vmem:[%s543_s29 + $0x18] sm:$0xff]  ;;  %v553_v12 = vld [vmem:[%s543_s29 + $0x20] sm:$0xff]  ;;  %v554_v15 = vld [vmem:[%s543_s29 + $0x28] sm:$0xff] }
  0x17   : > { %v9037_v13 = vadd.f32 %v557_v4, %v552_v11  ;;  %v9041_v14 = vadd.f32 %v557_v4, %v553_v12  ;;  %v555_v16 = vld [vmem:[%s543_s29 + $0x30] sm:$0xff]  ;;  %v9045_v17 = vadd.f32 %v557_v4, %v554_v15  ;;  %v556_v19 = vld [vmem:[%s543_s29 + $0x38] sm:$0xff]  ;;  %s11728_s29 = smov 16   ;;  %s11740_s25 = smov (!%p545_p4, %s9004_s25), 1 }
  0x18   : > { %11686 = vst [vmem:[#allocation2_spill] sm:$0xff] %v9027_v8  ;;  %11687 = vst [vmem:[#allocation3_spill] sm:$0xff] %v9029_v9  ;;  %7895 = vmatprep.mubr.msk.f32.mxu1 %vm600_vm0, %v9027_v8  ;;  %v9049_v18 = vadd.f32 %v557_v4, %v555_v16  ;;  %v9053_v20 = vadd.f32 %v557_v4, %v556_v19 }
  0x19   : > { %11688 = vst [vmem:[#allocation4_spill] sm:$0xff] %v9031_v10  ;;  %7896 = vmatmul.mubr.msk.f32.vlgmr.msra.gmra.mxu1 %vm600_vm0, %v9029_v9  ;;  %11689 = vst [vmem:[#allocation5_spill] sm:$0xff] %v9037_v13 }
  0x1a   : > { %7898 = vmatprep.mubr.msk.f32.mxu1 %vm600_vm0, %v9031_v10  ;;  %11690 = vst [vmem:[#allocation6_spill] sm:$0xff] %v9041_v14  ;;  %11691 = vst [vmem:[#allocation7_spill] sm:$0xff] %v9045_v17 }
  0x1b   : > { %11692 = vst [vmem:[#allocation8_spill] sm:$0xff] %v9049_v18  ;;  %11693 = vst [vmem:[#allocation9_spill] sm:$0xff] %v9053_v20 }
  0x1d   : > { %7899 = vmatmul.mubr.msk.f32.gmra.mxu1 %vm600_vm0, %v9037_v13 }
  0x1e   : > { %7901 = vmatprep.mubr.msk.f32.mxu1 %vm600_vm0, %v9041_v14 }
  0x21   : > { %7902 = vmatmul.mubr.msk.f32.gmra.mxu1 %vm600_vm0, %v9045_v17 }
  0x22   : > { %7904 = vmatprep.mubr.msk.f32.mxu1 %vm600_vm0, %v9049_v18 }
  0x25   : > { %7905 = vmatmul.mubr.msk.f32.gmra.mxu1 %vm600_vm0, %v9053_v20 }
  0xd9   : > { %v7897_v22 = vpop.f32.mrf.mxu1 }
  0xda   : > { %v9062_v23 = vadd.f32 %v7897_v22, %v7221_v21 }
  0xdb   : > { %v691_v24 = vpop.f32.mrf.mxu1 }
  0xdc   : > { %v9064_v25 = vadd.f32 %v7221_v21, %v691_v24  ;;  %7929 = vmatprep.mubr.msk.f32.mxu0 %vm794_vm1, %v9062_v23 }
  0xdd   : > { %v7900_v26 = vpop.f32.mrf.mxu1 }
  0xde   : > { %754 = vrot.lane.b32.xlu1 %v9064_v25, %s8899_s18  ;;  %770 = vrot.lane.b32.xlu0 %v9064_v25, %s8900_s19  ;;  %v9082_v28 = vadd.f32 %v7900_v26, %v7221_v21 }
  0xdf   : > { %7915 = vmatprep.mubr.msk.f32.mxu1 %vm794_vm1, %v9064_v25  ;;  %v701_v27 = vpop.f32.mrf.mxu1 }
  0xe0   : > { %v9084_v29 = vadd.f32 %v7221_v21, %v701_v27 }
  0xe1   : > { %v7903_v30 = vpop.f32.mrf.mxu1 }
  0xe2   : > { %756 = vrot.lane.b32.xlu1 %v9062_v23, %s8899_s18  ;;  %772 = vrot.lane.b32.xlu0 %v9062_v23, %s8900_s19  ;;  %v9098_v32 = vadd.f32 %v7903_v30, %v7221_v21 }
  0xe3   : > { %v711_v31 = vpop.f32.mrf.mxu1 }
  0xe4   : > { %v9100_v33 = vadd.f32 %v7221_v21, %v711_v31 }
  0xe5   : > { %v7906_v34 = vpop.f32.mrf.mxu1 }
  0xe6   : > { %740 = vrot.lane.b32.xlu1 %v9062_v23, %s8901_s1  ;;  %738 = vrot.lane.b32.xlu0 %v9064_v25, %s8901_s1  ;;  %v9112_v36 = vadd.f32 %v7906_v34, %v7221_v21 }
  0xe7   : > { %v721_v35 = vpop.f32.mrf.mxu1 }
  0xe8   : > { %v9116_v37 = vadd.f32 %v7221_v21, %v721_v35 }
  0xea   : > { %776 = vrot.lane.b32.xlu1 %v9082_v28, %s8900_s19  ;;  %774 = vrot.lane.b32.xlu0 %v9084_v29, %s8900_s19 }
  0xee   : > { %760 = vrot.lane.b32.xlu1 %v9082_v28, %s8899_s18  ;;  %758 = vrot.lane.b32.xlu0 %v9084_v29, %s8899_s18 }
  0xf2   : > { %744 = vrot.lane.b32.xlu1 %v9082_v28, %s8901_s1  ;;  %742 = vrot.lane.b32.xlu0 %v9084_v29, %s8901_s1 }
  0xf6   : > { %778 = vrot.lane.b32.xlu0 %v9100_v33, %s8900_s19  ;;  %780 = vrot.lane.b32.xlu1 %v9098_v32, %s8900_s19 }
  0xfa   : > { %762 = vrot.lane.b32.xlu0 %v9100_v33, %s8899_s18  ;;  %764 = vrot.lane.b32.xlu1 %v9098_v32, %s8899_s18 }
  0xfe   : > { %746 = vrot.lane.b32.xlu0 %v9100_v33, %s8901_s1  ;;  %748 = vrot.lane.b32.xlu1 %v9098_v32, %s8901_s1 }
 0x102   : > { %782 = vrot.lane.b32.xlu0 %v9116_v37, %s8900_s19  ;;  %784 = vrot.lane.b32.xlu1 %v9112_v36, %s8900_s19 }
 0x106   : > { %766 = vrot.lane.b32.xlu0 %v9116_v37, %s8899_s18  ;;  %768 = vrot.lane.b32.xlu1 %v9112_v36, %s8899_s18 }
 0x10a   : > { %750 = vrot.lane.b32.xlu0 %v9116_v37, %s8901_s1  ;;  %752 = vrot.lane.b32.xlu1 %v9112_v36, %s8901_s1 }
 0x150   : > { %v9130_v38 = vpop.permute.xlu1 %754  ;;  %v9132_v39 = vpop.permute.xlu0 %770 }
 0x151   : > { %792 = vrot.lane.b32.xlu0 %v9132_v39, %s8902_s20 }
 0x154   : > { %v9136_v40 = vpop.permute.xlu1 %756  ;;  %v9138_v41 = vpop.permute.xlu0 %772 }
 0x155   : > { %790 = vrot.lane.b32.xlu0 %v9130_v38, %s8902_s20  ;;  %902 = vrot.lane.b32.xlu1 %v9138_v41, %s8902_s20 }
 0x158   : > { %v9144_v42 = vpop.permute.xlu0 %738  ;;  %v9150_v43 = vpop.permute.xlu1 %740 }
 0x159   : > { %900 = vrot.lane.b32.xlu1 %v9136_v40, %s8902_s20  ;;  %788 = vrot.lane.b32.xlu0 %v9144_v42, %s8902_s20 }
 0x15c   : > { %v9152_v44 = vpop.permute.xlu0 %774  ;;  %v9158_v45 = vpop.permute.xlu1 %776 }
 0x15d   : > { %898 = vrot.lane.b32.xlu1 %v9150_v43, %s8902_s20  ;;  %786 = vrot.lane.b32.xlu0 %v9064_v25, %s8902_s20 }
 0x160   : > { %v9160_v46 = vpop.permute.xlu0 %758  ;;  %v9166_v47 = vpop.permute.xlu1 %760 }
 0x161   : > { %896 = vrot.lane.b32.xlu1 %v9062_v23, %s8902_s20  ;;  %1011 = vrot.lane.b32.xlu0 %v9152_v44, %s8902_s20 }
 0x164   : > { %v9172_v48 = vpop.permute.xlu0 %742  ;;  %v9178_v49 = vpop.permute.xlu1 %744 }
 0x165   : > { %1120 = vrot.lane.b32.xlu1 %v9158_v45, %s8902_s20  ;;  %1009 = vrot.lane.b32.xlu0 %v9160_v46, %s8902_s20 }
 0x168   : > { %v9180_v50 = vpop.permute.xlu0 %778  ;;  %v9186_v51 = vpop.permute.xlu1 %780 }
 0x169   : > { %1118 = vrot.lane.b32.xlu1 %v9166_v47, %s8902_s20  ;;  %1007 = vrot.lane.b32.xlu0 %v9172_v48, %s8902_s20 }
 0x16c   : > { %v9188_v52 = vpop.permute.xlu0 %762  ;;  %v9194_v53 = vpop.permute.xlu1 %764 }
 0x16d   : > { %1116 = vrot.lane.b32.xlu1 %v9178_v49, %s8902_s20  ;;  %1005 = vrot.lane.b32.xlu0 %v9084_v29, %s8902_s20 }
 0x170   : > { %v9200_v54 = vpop.permute.xlu0 %746  ;;  %v9206_v55 = vpop.permute.xlu1 %748 }
 0x171   : > { %1114 = vrot.lane.b32.xlu1 %v9082_v28, %s8902_s20  ;;  %1229 = vrot.lane.b32.xlu0 %v9180_v50, %s8902_s20 }
 0x174   : > { %v9208_v56 = vpop.permute.xlu0 %782  ;;  %v9214_v57 = vpop.permute.xlu1 %784 }
 0x175   : > { %1338 = vrot.lane.b32.xlu1 %v9186_v51, %s8902_s20  ;;  %1227 = vrot.lane.b32.xlu0 %v9188_v52, %s8902_s20 }
 0x178   : > { %v9216_v58 = vpop.permute.xlu0 %766  ;;  %v9222_v59 = vpop.permute.xlu1 %768 }
 0x179   : > { %1336 = vrot.lane.b32.xlu1 %v9194_v53, %s8902_s20  ;;  %1225 = vrot.lane.b32.xlu0 %v9200_v54, %s8902_s20 }
 0x17c   : > { %v9228_v60 = vpop.permute.xlu0 %750  ;;  %v9234_v61 = vpop.permute.xlu1 %752 }
 0x17d   : > { %1334 = vrot.lane.b32.xlu1 %v9206_v55, %s8902_s20  ;;  %1223 = vrot.lane.b32.xlu0 %v9100_v33, %s8902_s20 }
 0x181   : > { %1332 = vrot.lane.b32.xlu1 %v9098_v32, %s8902_s20  ;;  %1447 = vrot.lane.b32.xlu0 %v9208_v56, %s8902_s20 }
 0x185   : > { %1556 = vrot.lane.b32.xlu1 %v9214_v57, %s8902_s20  ;;  %1445 = vrot.lane.b32.xlu0 %v9216_v58, %s8902_s20 }
 0x189   : > { %1554 = vrot.lane.b32.xlu1 %v9222_v59, %s8902_s20  ;;  %1443 = vrot.lane.b32.xlu0 %v9228_v60, %s8902_s20 }
 0x18d   : > { %1552 = vrot.lane.b32.xlu1 %v9234_v61, %s8902_s20  ;;  %1441 = vrot.lane.b32.xlu0 %v9116_v37, %s8902_s20 }
 0x191   : > { %1550 = vrot.lane.b32.xlu1 %v9112_v36, %s8902_s20  ;;  %2081 = vrot.lane.b32.xlu0 %v9132_v39, %s8903_s21 }
 0x195   : > { %2190 = vrot.lane.b32.xlu1 %v9138_v41, %s8903_s21  ;;  %2079 = vrot.lane.b32.xlu0 %v9130_v38, %s8903_s21 }
 0x199   : > { %2188 = vrot.lane.b32.xlu1 %v9136_v40, %s8903_s21  ;;  %2077 = vrot.lane.b32.xlu0 %v9144_v42, %s8903_s21 }
 0x19d   : > { %2186 = vrot.lane.b32.xlu1 %v9150_v43, %s8903_s21  ;;  %2075 = vrot.lane.b32.xlu0 %v9064_v25, %s8903_s21 }
 0x1a1   : > { %2184 = vrot.lane.b32.xlu1 %v9062_v23, %s8903_s21  ;;  %2299 = vrot.lane.b32.xlu0 %v9152_v44, %s8903_s21 }
 0x1a5   : > { %2408 = vrot.lane.b32.xlu1 %v9158_v45, %s8903_s21  ;;  %2297 = vrot.lane.b32.xlu0 %v9160_v46, %s8903_s21 }
 0x1a9   : > { %2406 = vrot.lane.b32.xlu1 %v9166_v47, %s8903_s21  ;;  %2295 = vrot.lane.b32.xlu0 %v9172_v48, %s8903_s21 }
 0x1ad   : > { %2404 = vrot.lane.b32.xlu1 %v9178_v49, %s8903_s21  ;;  %2293 = vrot.lane.b32.xlu0 %v9084_v29, %s8903_s21 }
 0x1b1   : > { %2402 = vrot.lane.b32.xlu1 %v9082_v28, %s8903_s21  ;;  %2517 = vrot.lane.b32.xlu0 %v9180_v50, %s8903_s21 }
 0x1b5   : > { %2626 = vrot.lane.b32.xlu1 %v9186_v51, %s8903_s21  ;;  %2515 = vrot.lane.b32.xlu0 %v9188_v52, %s8903_s21 }
 0x1b9   : > { %2624 = vrot.lane.b32.xlu1 %v9194_v53, %s8903_s21  ;;  %2513 = vrot.lane.b32.xlu0 %v9200_v54, %s8903_s21 }
 0x1bd   : > { %2622 = vrot.lane.b32.xlu1 %v9206_v55, %s8903_s21  ;;  %2511 = vrot.lane.b32.xlu0 %v9100_v33, %s8903_s21 }
 0x1c1   : > { %2620 = vrot.lane.b32.xlu1 %v9098_v32, %s8903_s21  ;;  %2735 = vrot.lane.b32.xlu0 %v9208_v56, %s8903_s21 }
 0x1c3   : > { %v793_v62 = vpop.permute.xlu0 %792 }
 0x1c4   : > { %7907 = vmatprep.subr.msk.mxu1 %vm794_vm1, %v793_v62 }
 0x1c5   : > { %2844 = vrot.lane.b32.xlu1 %v9214_v57, %s8903_s21  ;;  %2733 = vrot.lane.b32.xlu0 %v9216_v58, %s8903_s21 }
 0x1c6   : > { %7908 = vmatpush3.xpose.msk.msra.mxu1 %vm794_vm1, %v793_v62 }
 0x1c7   : > { %v903_v63 = vpop.permute.xlu1 %902  ;;  %v791_v0 = vpop.permute.xlu0 %790 }
 0x1c8   : > { %7909 = vmatprep.subr.msk.mxu1 %vm794_vm1, %v791_v0  ;;  %7921 = vmatprep.subr.msk.mxu0 %vm794_vm1, %v903_v63 }
 0x1c9   : > { %2842 = vrot.lane.b32.xlu1 %v9222_v59, %s8903_s21  ;;  %7922 = vmatpush3.xpose.msk.msra.mxu0 %vm794_vm1, %v903_v63 }
 0x1ca   : > { %7910 = vmatpush3.xpose.msk.msra.mxu1 %vm794_vm1, %v791_v0 }
 0x1cb   : > { %v901_v1 = vpop.permute.xlu1 %900  ;;  %v789_v2 = vpop.permute.xlu0 %788 }
 0x1cc   : > { %7911 = vmatprep.subr.msk.mxu1 %vm794_vm1, %v789_v2  ;;  %7923 = vmatprep.subr.msk.mxu0 %vm794_vm1, %v901_v1 }
 0x1cd   : > { %7924 = vmatpush3.xpose.msk.msra.mxu0 %vm794_vm1, %v901_v1 }
 0x1ce   : > { %7912 = vmatpush3.xpose.msk.msra.mxu1 %vm794_vm1, %v789_v2  ;;  %v9444_v2 = vld [vmem:[%s11636_s2] sm:$0xff] }
 0x1cf   : > { %v899_v3 = vpop.permute.xlu1 %898  ;;  %v787_v4 = vpop.permute.xlu0 %786 }
 0x1d0   : > { %7913 = vmatprep.subr.msk.mxu1 %vm794_vm1, %v787_v4  ;;  %7925 = vmatprep.subr.msk.mxu0 %vm794_vm1, %v899_v3 }
 0x1d1   : > { %7926 = vmatpush3.xpose.msk.msra.mxu0 %vm794_vm1, %v899_v3 }
 0x1d2   : > { %7914 = vmatpush3.xpose.msk.msra.mxu1 %vm794_vm1, %v787_v4 }
 0x1d3   : > { %v897_v5 = vpop.permute.xlu1 %896  ;;  %v1012_v6 = vpop.permute.xlu0 %1011 }
 0x1d4   : > { %7927 = vmatprep.subr.msk.mxu0 %vm794_vm1, %v897_v5  ;;  %7935 = vmatprep.subr.msk.mxu1 %vm794_vm1, %v1012_v6 }
 0x1d5   : > { %7916 = vmatmul.mubr.msk.f32.vlgmr.msra.gmra.mxu1 %vm794_vm1, %v9144_v42  ;;  %7928 = vmatpush3.xpose.msk.msra.mxu0 %vm794_vm1, %v897_v5 }
 0x1d6   : > { %7918 = vmatprep.mubr.msk.f32.mxu1 %vm794_vm1, %v9130_v38  ;;  %7936 = vmatpush3.xpose.msk.msra.mxu1 %vm794_vm1, %v1012_v6 }
 0x1d7   : > { %v1121_v7 = vpop.permute.xlu1 %1120  ;;  %v1010_v11 = vpop.permute.xlu0 %1009 }
 0x1d8   : > { %7930 = vmatmul.mubr.msk.f32.vlgmr.msra.gmra.mxu0 %vm794_vm1, %v9150_v43  ;;  %7937 = vmatprep.subr.msk.mxu1 %vm794_vm1, %v1010_v11 }
 0x1d9   : > { %7919 = vmatmul.mubr.msk.f32.gmra.mxu1 %vm794_vm1, %v9132_v39  ;;  %7949 = vmatprep.subr.msk.mxu0 %vm794_vm1, %v1121_v7 }
 0x1da   : > { %7932 = vmatprep.mubr.msk.f32.mxu0 %vm794_vm1, %v9136_v40  ;;  %7938 = vmatpush3.xpose.msk.msra.mxu1 %vm794_vm1, %v1010_v11 }
 0x1db   : > { %7943 = vmatprep.mubr.msk.f32.mxu1 %vm794_vm1, %v9084_v29  ;;  %7950 = vmatpush3.xpose.msk.msra.mxu0 %vm794_vm1, %v1121_v7  ;;  %v1119_v12 = vpop.permute.xlu1 %1118  ;;  %v1008_v15 = vpop.permute.xlu0 %1007 }
 0x1dc   : > { %7933 = vmatmul.mubr.msk.f32.gmra.mxu0 %vm794_vm1, %v9138_v41  ;;  %7939 = vmatprep.subr.msk.mxu1 %vm794_vm1, %v1008_v15 }
 0x1dd   : > { %7951 = vmatprep.subr.msk.mxu0 %vm794_vm1, %v1119_v12  ;;  %7957 = vmatprep.mubr.msk.f32.mxu0 %vm794_vm1, %v9082_v28 }
 0x1de   : > { %7940 = vmatpush3.xpose.msk.msra.mxu1 %vm794_vm1, %v1008_v15 }
 0x1df   : > { %7952 = vmatpush3.xpose.msk.msra.mxu0 %vm794_vm1, %v1119_v12  ;;  %v1117_v16 = vpop.permute.xlu1 %1116  ;;  %v1006_v19 = vpop.permute.xlu0 %1005  ;;  %v9454_v12 = vld [vmem:[%s11636_s2 + $0x10] sm:$0xff] }
 0x1e0   : > { %7941 = vmatprep.subr.msk.mxu1 %vm794_vm1, %v1006_v19  ;;  %7953 = vmatprep.subr.msk.mxu0 %vm794_vm1, %v1117_v16 }
 0x1e2   : > { %7942 = vmatpush3.xpose.msk.msra.mxu1 %vm794_vm1, %v1006_v19 }
 0x1e3   : > { %7954 = vmatpush3.xpose.msk.msra.mxu0 %vm794_vm1, %v1117_v16  ;;  %v1115_v21 = vpop.permute.xlu1 %1114  ;;  %v1230_v22 = vpop.permute.xlu0 %1229 }
 0x1e4   : > { %7955 = vmatprep.subr.msk.mxu0 %vm794_vm1, %v1115_v21  ;;  %7963 = vmatprep.subr.msk.mxu1 %vm794_vm1, %v1230_v22 }
 0x1e5   : > { %7944 = vmatmul.mubr.msk.f32.vlgmr.msra.gmra.mxu1 %vm794_vm1, %v9172_v48 }
 0x1e6   : > { %7946 = vmatprep.mubr.msk.f32.mxu1 %vm794_vm1, %v9160_v46  ;;  %7964 = vmatpush3.xpose.msk.msra.mxu1 %vm794_vm1, %v1230_v22 }
 0x1e7   : > { %7956 = vmatpush3.xpose.msk.msra.mxu0 %vm794_vm1, %v1115_v21  ;;  %v1339_v23 = vpop.permute.xlu1 %1338  ;;  %v1228_v24 = vpop.permute.xlu0 %1227 }
 0x1e8   : > { %7965 = vmatprep.subr.msk.mxu1 %vm794_vm1, %v1228_v24  ;;  %7977 = vmatprep.subr.msk.mxu0 %vm794_vm1, %v1339_v23 }
 0x1e9   : > { %7947 = vmatmul.mubr.msk.f32.gmra.mxu1 %vm794_vm1, %v9152_v44 }
 0x1ea   : > { %7958 = vmatmul.mubr.msk.f32.vlgmr.msra.gmra.mxu0 %vm794_vm1, %v9178_v49  ;;  %7966 = vmatpush3.xpose.msk.msra.mxu1 %vm794_vm1, %v1228_v24  ;;  %v9472_v24 = vld [vmem:[%s11636_s2 + $0x18] sm:$0xff] }
 0x1eb   : > { %7960 = vmatprep.mubr.msk.f32.mxu0 %vm794_vm1, %v9166_v47  ;;  %7971 = vmatprep.mubr.msk.f32.mxu1 %vm794_vm1, %v9100_v33  ;;  %v1337_v25 = vpop.permute.xlu1 %1336  ;;  %v1226_v26 = vpop.permute.xlu0 %1225 }
 0x1ec   : > { %7978 = vmatpush3.xpose.msk.msra.mxu0 %vm794_vm1, %v1339_v23  ;;  %7967 = vmatprep.subr.msk.mxu1 %vm794_vm1, %v1226_v26 }
 0x1ed   : > { %7979 = vmatprep.subr.msk.mxu0 %vm794_vm1, %v1337_v25 }
 0x1ee   : > { %7961 = vmatmul.mubr.msk.f32.gmra.mxu0 %vm794_vm1, %v9158_v45  ;;  %7968 = vmatpush3.xpose.msk.msra.mxu1 %vm794_vm1, %v1226_v26 }
 0x1ef   : > { %7985 = vmatprep.mubr.msk.f32.mxu0 %vm794_vm1, %v9098_v32  ;;  %v1335_v27 = vpop.permute.xlu1 %1334  ;;  %v1224_v28 = vpop.permute.xlu0 %1223 }
 0x1f0   : > { %7980 = vmatpush3.xpose.msk.msra.mxu0 %vm794_vm1, %v1337_v25  ;;  %7969 = vmatprep.subr.msk.mxu1 %vm794_vm1, %v1224_v28 }
 0x1f1   : > { %7981 = vmatprep.subr.msk.mxu0 %vm794_vm1, %v1335_v27 }
 0x1f2   : > { %7970 = vmatpush3.xpose.msk.msra.mxu1 %vm794_vm1, %v1224_v28 }
 0x1f3   : > { %v1333_v29 = vpop.permute.xlu1 %1332  ;;  %v1448_v30 = vpop.permute.xlu0 %1447 }
 0x1f4   : > { %7982 = vmatpush3.xpose.msk.msra.mxu0 %vm794_vm1, %v1335_v27  ;;  %7991 = vmatprep.subr.msk.mxu1 %vm794_vm1, %v1448_v30 }
 0x1f5   : > { %7972 = vmatmul.mubr.msk.f32.vlgmr.msra.gmra.mxu1 %vm794_vm1, %v9200_v54  ;;  %7983 = vmatprep.subr.msk.mxu0 %vm794_vm1, %v1333_v29 }
 0x1f6   : > { %7974 = vmatprep.mubr.msk.f32.mxu1 %vm794_vm1, %v9188_v52  ;;  %7992 = vmatpush3.xpose.msk.msra.mxu1 %vm794_vm1, %v1448_v30 }
 0x1f7   : > { %v1557_v31 = vpop.permute.xlu1 %1556  ;;  %v1446_v32 = vpop.permute.xlu0 %1445 }
 0x1f8   : > { %7984 = vmatpush3.xpose.msk.msra.mxu0 %vm794_vm1, %v1333_v29  ;;  %7993 = vmatprep.subr.msk.mxu1 %vm794_vm1, %v1446_v32 }
 0x1f9   : > { %7975 = vmatmul.mubr.msk.f32.gmra.mxu1 %vm794_vm1, %v9180_v50  ;;  %8005 = vmatprep.subr.msk.mxu0 %vm794_vm1, %v1557_v31 }
 0x1fa   : > { %7994 = vmatpush3.xpose.msk.msra.mxu1 %vm794_vm1, %v1446_v32  ;;  %7999 = vmatprep.mubr.msk.f32.mxu1 %vm794_vm1, %v9116_v37 }
 0x1fb   : > { %7986 = vmatmul.mubr.msk.f32.vlgmr.msra.gmra.mxu0 %vm794_vm1, %v9206_v55  ;;  %v1555_v33 = vpop.permute.xlu1 %1554  ;;  %v1444_v34 = vpop.permute.xlu0 %1443 }
 0x1fc   : > { %7988 = vmatprep.mubr.msk.f32.mxu0 %vm794_vm1, %v9194_v53  ;;  %8006 = vmatpush3.xpose.msk.msra.mxu0 %vm794_vm1, %v1557_v31 }
 0x1fd   : > { %7995 = vmatprep.subr.msk.mxu1 %vm794_vm1, %v1444_v34  ;;  %8007 = vmatprep.subr.msk.mxu0 %vm794_vm1, %v1555_v33 }
 0x1fe   : > { %7996 = vmatpush3.xpose.msk.msra.mxu1 %vm794_vm1, %v1444_v34 }
 0x1ff   : > { %7989 = vmatmul.mubr.msk.f32.gmra.mxu0 %vm794_vm1, %v9186_v51  ;;  %v1553_v35 = vpop.permute.xlu1 %1552  ;;  %v1442_v38 = vpop.permute.xlu0 %1441  ;;  %v9431_v51 = vld [vmem:[%s11636_s2 + $0x8] sm:$0xff] }
 0x200   : > { %8008 = vmatpush3.xpose.msk.msra.mxu0 %vm794_vm1, %v1555_v33  ;;  %8013 = vmatprep.mubr.msk.f32.mxu0 %vm794_vm1, %v9112_v36 }
 0x201   : > { %7997 = vmatprep.subr.msk.mxu1 %vm794_vm1, %v1442_v38  ;;  %8009 = vmatprep.subr.msk.mxu0 %vm794_vm1, %v1553_v35 }
 0x202   : > { %7998 = vmatpush3.xpose.msk.msra.mxu1 %vm794_vm1, %v1442_v38 }
 0x203   : > { %v1551_v39 = vpop.permute.xlu1 %1550  ;;  %v2082_v40 = vpop.permute.xlu0 %2081 }
 0x204   : > { %8010 = vmatpush3.xpose.msk.msra.mxu0 %vm794_vm1, %v1553_v35  ;;  %8019 = vmatprep.subr.mxu1 %v2082_v40 }
 0x205   : > { %8000 = vmatmul.mubr.msk.f32.vlgmr.msra.gmra.mxu1 %vm794_vm1, %v9228_v60  ;;  %8011 = vmatprep.subr.msk.mxu0 %vm794_vm1, %v1551_v39 }
 0x206   : > { %8002 = vmatprep.mubr.msk.f32.mxu1 %vm794_vm1, %v9216_v58  ;;  %8020 = vmatpush3.msra.mxu1 %v2082_v40 }
 0x207   : > { %v2191_v41 = vpop.permute.xlu1 %2190  ;;  %v2080_v42 = vpop.permute.xlu0 %2079 }
 0x208   : > { %8012 = vmatpush3.xpose.msk.msra.mxu0 %vm794_vm1, %v1551_v39  ;;  %8021 = vmatprep.subr.mxu1 %v2080_v42 }
 0x209   : > { %8003 = vmatmul.mubr.msk.f32.gmra.mxu1 %vm794_vm1, %v9208_v56  ;;  %8033 = vmatprep.subr.mxu0 %v2191_v41 }
 0x20a   : > { %8022 = vmatpush3.msra.mxu1 %v2080_v42 }
 0x20b   : > { %8014 = vmatmul.mubr.msk.f32.vlgmr.msra.gmra.mxu0 %vm794_vm1, %v9234_v61  ;;  %v2189_v43 = vpop.permute.xlu1 %2188  ;;  %v2078_v44 = vpop.permute.xlu0 %2077 }
 0x20c   : > { %8016 = vmatprep.mubr.msk.f32.mxu0 %vm794_vm1, %v9222_v59  ;;  %8034 = vmatpush3.msra.mxu0 %v2191_v41 }
 0x20d   : > { %8023 = vmatprep.subr.mxu1 %v2078_v44  ;;  %8035 = vmatprep.subr.mxu0 %v2189_v43 }
 0x20e   : > { %8024 = vmatpush3.msra.mxu1 %v2078_v44  ;;  %8036 = vmatpush3.msra.mxu0 %v2189_v43 }
 0x20f   : > { %8017 = vmatmul.mubr.msk.f32.gmra.mxu0 %vm794_vm1, %v9214_v57  ;;  %v2187_v45 = vpop.permute.xlu1 %2186  ;;  %v2076_v46 = vpop.permute.xlu0 %2075 }
 0x210   : > { %8025 = vmatprep.subr.mxu1 %v2076_v46  ;;  %8037 = vmatprep.subr.mxu0 %v2187_v45 }
 0x211   : > { %8026 = vmatpush3.msra.mxu1 %v2076_v46  ;;  %8038 = vmatpush3.msra.mxu0 %v2187_v45 }
 0x213   : > { %v2185_v47 = vpop.permute.xlu1 %2184  ;;  %v9422_v48 = vpop.permute.xlu0 %2299 }
 0x214   : > { %8039 = vmatprep.subr.mxu0 %v2185_v47  ;;  %8047 = vmatprep.subr.mxu1 %v9422_v48 }
 0x215   : > { %8040 = vmatpush3.msra.mxu0 %v2185_v47 }
 0x217   : > { %v9425_v49 = vpop.permute.xlu1 %2408 }
 0x218   : > { %8061 = vmatprep.subr.mxu0 %v9425_v49 }
 0x295   : > { %v7917_v50 = vpop.f32.mrf.mxu1 }
 0x296   : > { %v1660_v52 = vmul.f32 0.35355338, %v7917_v50 }
 0x297   : > { %v877_v53 = vpop.f32.mrf.mxu1 }
 0x298   : > { %v7931_v54 = vpop.f32.mrf.mxu0  ;;  %v9434_v55 = vadd.f32 %v1660_v52, %v9431_v51  ;;  %v1659_v3 = vmul.f32 0.35355338, %v877_v53 }
 0x299   : > { %v7920_v56 = vpop.f32.mrf.mxu1  ;;  %v1664_v57 = vmul.f32 0.35355338, %v7931_v54 }
 0x29a   : > { %v986_v58 = vpop.f32.mrf.mxu0  ;;  %v1726_v59 = vsel %vm600_vm0, %v9434_v55, -inf  ;;  %v9462_v21 = vadd.f32 %v1659_v3, %v9444_v2  ;;  %v1662_v25 = vmul.f32 0.35355338, %v7920_v56 }
 0x29b   : > { %v1663_v62 = vmul.f32 0.35355338, %v986_v58  ;;  %1727 = vmax.xlane.f32.xlu1 %v1726_v59  ;;  %v9439_v63 = vadd.f32 %v1664_v57, %v9431_v51  ;;  %v887_v0 = vpop.f32.mrf.mxu1 }
 0x29c   : > { %v7934_v1 = vpop.f32.mrf.mxu0  ;;  %v1661_v7 = vmul.f32 0.35355338, %v887_v0  ;;  %v1723_v27 = vsel %vm600_vm0, %v9462_v21, -inf  ;;  %v9484_v32 = vadd.f32 %v1662_v25, %v9472_v24 }
 0x29d   : > { %v1738_v4 = vsel %vm600_vm0, %v9439_v63, -inf  ;;  %v9449_v5 = vadd.f32 %v1663_v62, %v9444_v2  ;;  %v1666_v15 = vmul.f32 0.35355338, %v7934_v1 }
 0x29e   : > { %v996_v6 = vpop.f32.mrf.mxu0  ;;  %1739 = vmax.xlane.f32.xlu0 %v1738_v4  ;;  %v9467_v23 = vadd.f32 %v1661_v7, %v9454_v12  ;;  %v1732_v41 = vsel %vm600_vm0, %v9484_v32, -inf }
 0x29f   : > { %v1665_v11 = vmul.f32 0.35355338, %v996_v6  ;;  %v1735_v16 = vsel %vm600_vm0, %v9449_v5, -inf  ;;  %v9477_v28 = vadd.f32 %v1666_v15, %v9472_v24 }
 0x2a0   : > { %v1729_v29 = vsel %vm600_vm0, %v9467_v23, -inf }
 0x2a1   : > { %v9459_v19 = vadd.f32 %v1665_v11, %v9454_v12  ;;  %v1744_v31 = vsel %vm600_vm0, %v9477_v28, -inf }
 0x2a2   : > { %1736 = vmax.xlane.f32.xlu0 %v1735_v16 }
 0x2a3   : > { %v1741_v22 = vsel %vm600_vm0, %v9459_v19, -inf }
 0x2a4   : > { %1742 = vmax.xlane.f32.xlu1 %v1741_v22 }
 0x2a5   : > { %v7945_v26 = vpop.f32.mrf.mxu1 }
 0x2a6   : > { %1724 = vmax.xlane.f32.xlu0 %v1723_v27  ;;  %v1668_v35 = vmul.f32 0.35355338, %v7945_v26 }
 0x2a7   : > { %v1095_v30 = vpop.f32.mrf.mxu1 }
 0x2a8   : > { %1730 = vmax.xlane.f32.xlu1 %v1729_v29  ;;  %v1667_v38 = vmul.f32 0.35355338, %v1095_v30  ;;  %v9498_v50 = vadd.f32 %v1668_v35, %v9431_v51 }
 0x2a9   : > { %v7948_v43 = vpop.f32.mrf.mxu1 }
 0x2aa   : > { %v7959_v33 = vpop.f32.mrf.mxu0  ;;  %1745 = vmax.xlane.f32.xlu0 %v1744_v31  ;;  %v9495_v47 = vadd.f32 %v1667_v38, %v9444_v2  ;;  %v1670_v58 = vmul.f32 0.35355338, %v7948_v43  ;;  %v1750_v59 = vsel %vm600_vm0, %v9498_v50, -inf }
 0x2ab   : > { %v1672_v34 = vmul.f32 0.35355338, %v7959_v33  ;;  %v1105_v57 = vpop.f32.mrf.mxu1 }
 0x2ac   : > { %v1204_v39 = vpop.f32.mrf.mxu0  ;;  %v1669_v62 = vmul.f32 0.35355338, %v1105_v57  ;;  %v1747_v1 = vsel %vm600_vm0, %v9495_v47, -inf  ;;  %v9515_v6 = vadd.f32 %v1670_v58, %v9472_v24 }
 0x2ad   : > { %v1671_v40 = vmul.f32 0.35355338, %v1204_v39  ;;  %v9489_v42 = vadd.f32 %v1672_v34, %v9431_v51 }
 0x2ae   : > { %v7962_v44 = vpop.f32.mrf.mxu0  ;;  %1733 = vmax.xlane.f32.xlu0 %v1732_v41  ;;  %v9522_v15 = vadd.f32 %v1669_v62, %v9454_v12  ;;  %v1756_v30 = vsel %vm600_vm0, %v9515_v6, -inf }
 0x2af   : > { %v9492_v45 = vadd.f32 %v1671_v40, %v9444_v2  ;;  %v1674_v52 = vmul.f32 0.35355338, %v7962_v44  ;;  %v1762_v56 = vsel %vm600_vm0, %v9489_v42, -inf }
 0x2b0   : > { %v1214_v46 = vpop.f32.mrf.mxu0  ;;  %v1753_v29 = vsel %vm600_vm0, %v9522_v15, -inf }
 0x2b1   : > { %v1673_v53 = vmul.f32 0.35355338, %v1214_v46  ;;  %v1759_v54 = vsel %vm600_vm0, %v9492_v45, -inf  ;;  %v9507_v0 = vadd.f32 %v1674_v52, %v9472_v24 }
 0x2b2   : > { %1760 = vmax.xlane.f32.xlu1 %v1759_v54  ;;  %1763 = vmax.xlane.f32.xlu0 %v1762_v56 }
 0x2b3   : > { %v9512_v3 = vadd.f32 %v1673_v53, %v9454_v12  ;;  %v1768_v11 = vsel %vm600_vm0, %v9507_v0, -inf }
 0x2b5   : > { %v7973_v4 = vpop.f32.mrf.mxu1  ;;  %v1765_v7 = vsel %vm600_vm0, %v9512_v3, -inf }
 0x2b6   : > { %1748 = vmax.xlane.f32.xlu1 %v1747_v1  ;;  %1751 = vmax.xlane.f32.xlu0 %v1750_v59  ;;  %v1676_v26 = vmul.f32 0.35355338, %v7973_v4 }
 0x2b7   : > { %v1313_v16 = vpop.f32.mrf.mxu1 }
 0x2b8   : > { %v1675_v31 = vmul.f32 0.35355338, %v1313_v16  ;;  %v9535_v40 = vadd.f32 %v1676_v26, %v9431_v51 }
 0x2b9   : > { %v7976_v35 = vpop.f32.mrf.mxu1 }
 0x2ba   : > { %1766 = vmax.xlane.f32.xlu1 %v1765_v7  ;;  %1769 = vmax.xlane.f32.xlu0 %v1768_v11  ;;  %v9540_v46 = vadd.f32 %v1675_v31, %v9444_v2  ;;  %v1678_v56 = vmul.f32 0.35355338, %v7976_v35  ;;  %v1774_v58 = vsel %vm600_vm0, %v9535_v40, -inf }
 0x2bb   : > { %v7987_v22 = vpop.f32.mrf.mxu0  ;;  %v1323_v54 = vpop.f32.mrf.mxu1 }
 0x2bc   : > { %v1680_v25 = vmul.f32 0.35355338, %v7987_v22  ;;  %v1677_v59 = vmul.f32 0.35355338, %v1323_v54  ;;  %v1771_v1 = vsel %vm600_vm0, %v9540_v46, -inf  ;;  %v9555_v7 = vadd.f32 %v1678_v56, %v9472_v24 }
 0x2bd   : > { %v1422_v27 = vpop.f32.mrf.mxu0 }
 0x2be   : > { %v9529_v33 = vadd.f32 %v1680_v25, %v9431_v51  ;;  %v1679_v34 = vmul.f32 0.35355338, %v1422_v27  ;;  %1754 = vmax.xlane.f32.xlu1 %v1753_v29  ;;  %1757 = vmax.xlane.f32.xlu0 %v1756_v30  ;;  %v9560_v16 = vadd.f32 %v1677_v59, %v9454_v12  ;;  %v1780_v31 = vsel %vm600_vm0, %v9555_v7, -inf }
 0x2bf   : > { %v7990_v38 = vpop.f32.mrf.mxu0 }
 0x2c0   : > { %v9532_v39 = vadd.f32 %v1679_v34, %v9444_v2  ;;  %v1682_v41 = vmul.f32 0.35355338, %v7990_v38  ;;  %v1786_v44 = vsel %vm600_vm0, %v9529_v33, -inf }
 0x2c1   : > { %v1432_v43 = vpop.f32.mrf.mxu0 }
 0x2c2   : > { %v1681_v52 = vmul.f32 0.35355338, %v1432_v43  ;;  %v1783_v53 = vsel %vm600_vm0, %v9532_v39, -inf  ;;  %1787 = vmax.xlane.f32.xlu0 %v1786_v44  ;;  %v9545_v57 = vadd.f32 %v1682_v41, %v9472_v24  ;;  %v1777_v41 = vsel %vm600_vm0, %v9560_v16, -inf }
 0x2c3   : > { %1784 = vmax.xlane.f32.xlu1 %v1783_v53 }
 0x2c4   : > { %v9550_v62 = vadd.f32 %v1681_v52, %v9454_v12  ;;  %v1792_v11 = vsel %vm600_vm0, %v9545_v57, -inf }
 0x2c5   : > { %v8001_v4 = vpop.f32.mrf.mxu1 }
 0x2c6   : > { %1775 = vmax.xlane.f32.xlu0 %v1774_v58  ;;  %v1789_v22 = vsel %vm600_vm0, %v9550_v62, -inf  ;;  %v1684_v29 = vmul.f32 0.35355338, %v8001_v4 }
 0x2c7   : > { %1772 = vmax.xlane.f32.xlu1 %v1771_v1  ;;  %v1531_v25 = vpop.f32.mrf.mxu1 }
 0x2c8   : > { %v1683_v34 = vmul.f32 0.35355338, %v1531_v25  ;;  %v9575_v53 = vadd.f32 %v1684_v29, %v9431_v51 }
 0x2c9   : > { %v8004_v43 = vpop.f32.mrf.mxu1 }
 0x2ca   : > { %1793 = vmax.xlane.f32.xlu0 %v1792_v11  ;;  %v9580_v59 = vadd.f32 %v1683_v34, %v9444_v2 }
 0x2cb   : > { %v8015_v26 = vpop.f32.mrf.mxu0  ;;  %1790 = vmax.xlane.f32.xlu1 %v1789_v22  ;;  %v1541_v11 = vpop.f32.mrf.mxu1  ;;  %v1686_v22 = vmul.f32 0.35355338, %v8004_v43 }
 0x2cc   : > { %v1688_v27 = vmul.f32 0.35355338, %v8015_v26  ;;  %v1685_v26 = vmul.f32 0.35355338, %v1541_v11 }
 0x2cd   : > { %v1640_v30 = vpop.f32.mrf.mxu0  ;;  %v9595_v29 = vadd.f32 %v1686_v22, %v9472_v24 }
 0x2ce   : > { %v9567_v35 = vadd.f32 %v1688_v27, %v9431_v51  ;;  %v1687_v38 = vmul.f32 0.35355338, %v1640_v30  ;;  %1781 = vmax.xlane.f32.xlu0 %v1780_v31  ;;  %v1798_v51 = vsel %vm600_vm0, %v9575_v53, -inf  ;;  %v9600_v31 = vadd.f32 %v1685_v26, %v9454_v12 }
 0x2cf   : > { %v8018_v44 = vpop.f32.mrf.mxu0  ;;  %1778 = vmax.xlane.f32.xlu1 %v1777_v41 }
 0x2d0   : > { %v9572_v52 = vadd.f32 %v1687_v38, %v9444_v2  ;;  %v1690_v54 = vmul.f32 0.35355338, %v8018_v44  ;;  %v1810_v58 = vsel %vm600_vm0, %v9567_v35, -inf  ;;  %v1795_v2 = vsel %vm600_vm0, %v9580_v59, -inf }
 0x2d1   : > { %v1650_v56 = vpop.f32.mrf.mxu0  ;;  %v1804_v38 = vsel %vm600_vm0, %v9595_v29, -inf  ;;  %v1801_v41 = vsel %vm600_vm0, %v9600_v31, -inf }
 0x2d2   : > { %v1689_v1 = vmul.f32 0.35355338, %v1650_v56  ;;  %v1807_v4 = vsel %vm600_vm0, %v9572_v52, -inf  ;;  %1811 = vmax.xlane.f32.xlu0 %v1810_v58  ;;  %v9585_v25 = vadd.f32 %v1690_v54, %v9472_v24  ;;  %v9608_v24 = vpop.permute.xlu1 %2406 }
 0x2d3   : > { %1808 = vmax.xlane.f32.xlu1 %v1807_v4 }
 0x2d4   : > { %v9590_v27 = vadd.f32 %v1689_v1, %v9454_v12  ;;  %v1816_v30 = vsel %vm600_vm0, %v9585_v25, -inf  ;;  %v9612_v12 = vpop.permute.xlu0 %2297 }
 0x2d6   : > { %1799 = vmax.xlane.f32.xlu0 %v1798_v51  ;;  %v1813_v34 = vsel %vm600_vm0, %v9590_v27, -inf  ;;  %v9616_v43 = vpop.permute.xlu1 %2404 }
 0x2d7   : > { %1796 = vmax.xlane.f32.xlu1 %v1795_v2 }
 0x2d8   : > { %v9618_v44 = vpop.permute.xlu0 %2295 }
 0x2da   : > { %1817 = vmax.xlane.f32.xlu0 %v1816_v30  ;;  %v9620_v54 = vpop.permute.xlu1 %2402 }
 0x2db   : > { %1814 = vmax.xlane.f32.xlu1 %v1813_v34 }
 0x2dc   : > { %v9622_v56 = vpop.permute.xlu0 %2293 }
 0x2de   : > { %1805 = vmax.xlane.f32.xlu0 %v1804_v38  ;;  %v9624_v58 = vpop.permute.xlu1 %2626 }
 0x2df   : > { %1802 = vmax.xlane.f32.xlu1 %v1801_v41 }
 0x2e0   : > { %v9626_v1 = vpop.permute.xlu0 %2517 }
 0x2e2   : > { %v9628_v4 = vpop.permute.xlu1 %2624 }
 0x2e6   : > { %v9632_v11 = vpop.permute.xlu1 %2622 }
 0x2f0   : > { %2840 = vrot.lane.b32.xlu1 %v9234_v61, %s8903_s21  ;;  %v9630_v61 = vpop.permute.xlu0 %2515 }
 0x2f4   : > { %2731 = vrot.lane.b32.xlu0 %v9228_v60, %s8903_s21  ;;  %v9634_v22 = vpop.permute.xlu0 %2513  ;;  %v9636_v60 = vpop.permute.xlu1 %2620 }
 0x2f8   : > { %v9638_v51 = vpop.permute.xlu0 %2511  ;;  %v9640_v26 = vpop.permute.xlu1 %2844 }
 0x2f9   : > { %11694 = vst [vmem:[#allocation10_spill] sm:$0xff] %v9638_v51 }
 0x2fc   : > { %v9642_v2 = vpop.permute.xlu0 %2735  ;;  %v9644_v30 = vpop.permute.xlu1 %2842 }
 0x2fd   : > { %11695 = vst [vmem:[#allocation11_spill] sm:$0xff] %v9642_v2  ;;  %11696 = vst [vmem:[#allocation12_spill] sm:$0xff] %v9644_v30 }
 0x300   : > { %v9646_v34 = vpop.permute.xlu0 %2733 }
 0x301   : > { %11697 = vst [vmem:[#allocation13_spill] sm:$0xff] %v9646_v34 }
 0x324   : > { %v1728_v38 = vpop.xlane.xlu1 %1727 }
 0x325   : > { %v1820_v41 = vsub.f32 %v9434_v55, %v1728_v38 }
 0x327   : > { %v1740_v18 = vpop.xlane.xlu0 %1739  ;;  %v1853_v14 = vmul.f32 1.442695, %v1820_v41 }
 0x328   : > { %v1824_v20 = vsub.f32 %v9439_v63, %v1740_v18 }
 0x32a   : > { %v1861_v17 = vmul.f32 1.442695, %v1824_v20 }
 0x32b   : > { %v1737_v13 = vpop.xlane.xlu0 %1736 }
 0x32c   : > { %8543 = vpow2.f32 %v1861_v17  ;;  %v1823_v10 = vsub.f32 %v9449_v5, %v1737_v13 }
 0x32d   : > { %v1743_v8 = vpop.xlane.xlu1 %1742  ;;  %8545 = vpow2.f32 %v1853_v14 }
 0x32e   : > { %v1859_v9 = vmul.f32 1.442695, %v1823_v10  ;;  %v1825_v2 = vsub.f32 %v9459_v19, %v1743_v8 }
 0x32f   : > { %v1725_v30 = vpop.xlane.xlu0 %1724 }
 0x330   : > { %8547 = vpow2.f32 %v1859_v9  ;;  %v1819_v34 = vsub.f32 %v9462_v21, %v1725_v30  ;;  %v1863_v55 = vmul.f32 1.442695, %v1825_v2 }
 0x331   : > { %v1731_v51 = vpop.xlane.xlu1 %1730 }
 0x332   : > { %v1851_v38 = vmul.f32 1.442695, %v1819_v34  ;;  %v1821_v18 = vsub.f32 %v9467_v23, %v1731_v51 }
 0x333   : > { %v1746_v63 = vpop.xlane.xlu0 %1745 }
 0x334   : > { %8549 = vpow2.f32 %v1851_v38  ;;  %v1826_v17 = vsub.f32 %v9477_v28, %v1746_v63  ;;  %v1855_v13 = vmul.f32 1.442695, %v1821_v18 }
 0x335   : > { %8551 = vpow2.f32 %v1863_v55 }
 0x336   : > { %v1865_v20 = vmul.f32 1.442695, %v1826_v17 }
 0x337   : > { %v1734_v14 = vpop.xlane.xlu0 %1733 }
 0x338   : > { %8553 = vpow2.f32 %v1865_v20  ;;  %v1822_v8 = vsub.f32 %v9484_v32, %v1734_v14 }
 0x339   : > { %v9656_v10 = vpop.eup %8543  ;;  %8555 = vpow2.f32 %v1855_v13 }
 0x33a   : > { %v1857_v9 = vmul.f32 1.442695, %v1822_v8  ;;  %v1930_v5 = vsel %vm600_vm0, %v9656_v10, 0.0  ;;  %v9660_v19 = vpop.eup %8545 }
 0x33b   : > { %v1761_v21 = vpop.xlane.xlu1 %1760  ;;  %v1764_v23 = vpop.xlane.xlu0 %1763  ;;  %1931 = vadd.xlane.f32.xlu0 %v1930_v5  ;;  %v1918_v34 = vsel %vm600_vm0, %v9660_v19, 0.0 }
 0x33c   : > { %8557 = vpow2.f32 %v1857_v9  ;;  %v1831_v28 = vsub.f32 %v9492_v45, %v1761_v21  ;;  %v1832_v51 = vsub.f32 %v9489_v42, %v1764_v23 }
 0x33d   : > { %v9664_v2 = vpop.eup %8547 }
 0x33e   : > { %v1875_v32 = vmul.f32 1.442695, %v1831_v28  ;;  %v1877_v30 = vmul.f32 1.442695, %v1832_v51  ;;  %v1927_v41 = vsel %vm600_vm0, %v9664_v2, 0.0 }
 0x33f   : > { %v1749_v55 = vpop.xlane.xlu1 %1748  ;;  %v1752_v38 = vpop.xlane.xlu0 %1751  ;;  %1919 = vadd.xlane.f32.xlu0 %v1918_v34  ;;  %1928 = vadd.xlane.f32.xlu1 %v1927_v41 }
 0x340   : > { %8559 = vpow2.f32 %v1875_v32  ;;  %v1827_v18 = vsub.f32 %v9495_v47, %v1749_v55  ;;  %v1828_v45 = vsub.f32 %v9498_v50, %v1752_v38 }
 0x341   : > { %v9672_v42 = vpop.eup %8549  ;;  %8561 = vpow2.f32 %v1877_v30 }
 0x342   : > { %v1867_v63 = vmul.f32 1.442695, %v1827_v18  ;;  %v1869_v17 = vmul.f32 1.442695, %v1828_v45  ;;  %v1915_v13 = vsel %vm600_vm0, %v9672_v42, 0.0  ;;  %v9676_v20 = vpop.eup %8551 }
 0x343   : > { %v1767_v14 = vpop.xlane.xlu1 %1766  ;;  %v1770_v8 = vpop.xlane.xlu0 %1769  ;;  %1916 = vadd.xlane.f32.xlu1 %v1915_v13  ;;  %v1933_v23 = vsel %vm600_vm0, %v9676_v20, 0.0 }
 0x344   : > { %8563 = vpow2.f32 %v1867_v63  ;;  %v1833_v9 = vsub.f32 %v9512_v3, %v1767_v14  ;;  %v1834_v47 = vsub.f32 %v9507_v0, %v1770_v8 }
 0x345   : > { %v9680_v5 = vpop.eup %8553  ;;  %8565 = vpow2.f32 %v1869_v17 }
 0x346   : > { %v1881_v50 = vmul.f32 1.442695, %v1834_v47  ;;  %v1936_v21 = vsel %vm600_vm0, %v9680_v5, 0.0  ;;  %v9686_v28 = vpop.eup %8555  ;;  %v1879_v51 = vmul.f32 1.442695, %v1833_v9 }
 0x347   : > { %v1755_v32 = vpop.xlane.xlu1 %1754  ;;  %v1758_v30 = vpop.xlane.xlu0 %1757  ;;  %1937 = vadd.xlane.f32.xlu0 %v1936_v21  ;;  %1934 = vadd.xlane.f32.xlu1 %v1933_v23  ;;  %v1921_v38 = vsel %vm600_vm0, %v9686_v28, 0.0 }
 0x348   : > { %v1829_v3 = vsub.f32 %v9522_v15, %v1755_v32  ;;  %v1830_v0 = vsub.f32 %v9515_v6, %v1758_v30  ;;  %8567 = vpow2.f32 %v1881_v50 }
 0x349   : > { %v9690_v34 = vpop.eup %8557  ;;  %8569 = vpow2.f32 %v1879_v51 }
 0x34a   : > { %v1873_v41 = vmul.f32 1.442695, %v1830_v0  ;;  %v1924_v55 = vsel %vm600_vm0, %v9690_v34, 0.0  ;;  %v1871_v18 = vmul.f32 1.442695, %v1829_v3 }
 0x34b   : > { %v1788_v45 = vpop.xlane.xlu0 %1787  ;;  %1925 = vadd.xlane.f32.xlu0 %v1924_v55  ;;  %1922 = vadd.xlane.f32.xlu1 %v1921_v38 }
 0x34c   : > { %v1785_v63 = vpop.xlane.xlu1 %1784  ;;  %v1840_v15 = vsub.f32 %v9529_v33, %v1788_v45  ;;  %8571 = vpow2.f32 %v1873_v41 }
 0x34d   : > { %v9697_v17 = vpop.eup %8559  ;;  %v1839_v6 = vsub.f32 %v9532_v39, %v1785_v63  ;;  %8573 = vpow2.f32 %v1871_v18 }
 0x34e   : > { %v9700_v13 = vpop.eup %8561  ;;  %v1893_v14 = vmul.f32 1.442695, %v1840_v15  ;;  %v1951_v8 = vsel %vm600_vm0, %v9697_v17, 0.0 }
 0x34f   : > { %v1891_v9 = vmul.f32 1.442695, %v1839_v6  ;;  %v1776_v47 = vpop.xlane.xlu0 %1775  ;;  %v1954_v50 = vsel %vm600_vm0, %v9700_v13, 0.0  ;;  %1952 = vadd.xlane.f32.xlu1 %v1951_v8 }
 0x350   : > { %8575 = vpow2.f32 %v1893_v14  ;;  %v1773_v33 = vpop.xlane.xlu1 %1772  ;;  %v1836_v21 = vsub.f32 %v9535_v40, %v1776_v47  ;;  %1955 = vadd.xlane.f32.xlu0 %v1954_v50 }
 0x351   : > { %v9707_v23 = vpop.eup %8563  ;;  %v1835_v39 = vsub.f32 %v9540_v46, %v1773_v33  ;;  %8577 = vpow2.f32 %v1891_v9 }
 0x352   : > { %v9710_v51 = vpop.eup %8565  ;;  %v1885_v32 = vmul.f32 1.442695, %v1836_v21  ;;  %v1939_v30 = vsel %vm600_vm0, %v9707_v23, 0.0 }
 0x353   : > { %v1883_v3 = vmul.f32 1.442695, %v1835_v39  ;;  %v1794_v0 = vpop.xlane.xlu0 %1793  ;;  %v1942_v41 = vsel %vm600_vm0, %v9710_v51, 0.0  ;;  %1940 = vadd.xlane.f32.xlu1 %v1939_v30 }
 0x354   : > { %8579 = vpow2.f32 %v1885_v32  ;;  %v1791_v40 = vpop.xlane.xlu1 %1790  ;;  %v1842_v55 = vsub.f32 %v9545_v57, %v1794_v0  ;;  %1943 = vadd.xlane.f32.xlu0 %v1942_v41 }
 0x355   : > { %v1841_v46 = vsub.f32 %v9550_v62, %v1791_v40  ;;  %v9718_v38 = vpop.eup %8567  ;;  %8581 = vpow2.f32 %v1883_v3 }
 0x356   : > { %v1897_v18 = vmul.f32 1.442695, %v1842_v55  ;;  %v1960_v15 = vsel %vm600_vm0, %v9718_v38, 0.0  ;;  %v9722_v6 = vpop.eup %8569 }
 0x357   : > { %v1895_v45 = vmul.f32 1.442695, %v1841_v46  ;;  %v1782_v63 = vpop.xlane.xlu0 %1781  ;;  %1961 = vadd.xlane.f32.xlu1 %v1960_v15  ;;  %v1957_v21 = vsel %vm600_vm0, %v9722_v6, 0.0 }
 0x358   : > { %8583 = vpow2.f32 %v1897_v18  ;;  %v1779_v14 = vpop.xlane.xlu1 %1778  ;;  %v1838_v8 = vsub.f32 %v9555_v7, %v1782_v63 }
 0x359   : > { %v1837_v57 = vsub.f32 %v9560_v16, %v1779_v14  ;;  %v9726_v9 = vpop.eup %8571  ;;  %8585 = vpow2.f32 %v1895_v45 }
 0x35a   : > { %v1889_v62 = vmul.f32 1.442695, %v1838_v8  ;;  %v1948_v33 = vsel %vm600_vm0, %v9726_v9, 0.0  ;;  %v9732_v39 = vpop.eup %8573 }
 0x35b   : > { %v1887_v47 = vmul.f32 1.442695, %v1837_v57  ;;  %v1812_v50 = vpop.xlane.xlu0 %1811  ;;  %1949 = vadd.xlane.f32.xlu0 %v1948_v33  ;;  %1958 = vadd.xlane.f32.xlu1 %v1957_v21  ;;  %v1945_v55 = vsel %vm600_vm0, %v9732_v39, 0.0 }
 0x35c   : > { %8587 = vpow2.f32 %v1889_v62  ;;  %v1809_v32 = vpop.xlane.xlu1 %1808  ;;  %v1848_v7 = vsub.f32 %v9567_v35, %v1812_v50 }
 0x35d   : > { %v9735_v16 = vpop.eup %8575  ;;  %v1847_v30 = vsub.f32 %v9572_v52, %v1809_v32  ;;  %8589 = vpow2.f32 %v1887_v47 }
 0x35e   : > { %v1909_v3 = vmul.f32 1.442695, %v1848_v7  ;;  %v1978_v0 = vsel %vm600_vm0, %v9735_v16, 0.0  ;;  %v9742_v46 = vpop.eup %8577 }
 0x35f   : > { %v1907_v41 = vmul.f32 1.442695, %v1847_v30  ;;  %v1800_v40 = vpop.xlane.xlu0 %1799  ;;  %1979 = vadd.xlane.f32.xlu0 %v1978_v0  ;;  %1946 = vadd.xlane.f32.xlu1 %v1945_v55  ;;  %v1975_v57 = vsel %vm600_vm0, %v9742_v46, 0.0 }
 0x360   : > { %8591 = vpow2.f32 %v1909_v3  ;;  %v1797_v35 = vpop.xlane.xlu1 %1796  ;;  %v1844_v18 = vsub.f32 %v9575_v53, %v1800_v40 }
 0x361   : > { %v9745_v45 = vpop.eup %8579  ;;  %v1843_v52 = vsub.f32 %v9580_v59, %v1797_v35  ;;  %8593 = vpow2.f32 %v1907_v41 }
 0x362   : > { %v1901_v63 = vmul.f32 1.442695, %v1844_v18  ;;  %v1966_v15 = vsel %vm600_vm0, %v9745_v45, 0.0  ;;  %v9752_v62 = vpop.eup %8581 }
 0x363   : > { %v1899_v14 = vmul.f32 1.442695, %v1843_v52  ;;  %v1818_v8 = vpop.xlane.xlu0 %1817  ;;  %1976 = vadd.xlane.f32.xlu0 %v1975_v57  ;;  %1967 = vadd.xlane.f32.xlu1 %v1966_v15  ;;  %v1963_v7 = vsel %vm600_vm0, %v9752_v62, 0.0 }
 0x364   : > { %8595 = vpow2.f32 %v1901_v63  ;;  %v1815_v53 = vpop.xlane.xlu1 %1814  ;;  %v1850_v47 = vsub.f32 %v9585_v25, %v1818_v8 }
 0x365   : > { %v9755_v50 = vpop.eup %8583  ;;  %v1849_v59 = vsub.f32 %v9590_v27, %v1815_v53  ;;  %8597 = vpow2.f32 %v1899_v14 }
 0x366   : > { %v1913_v33 = vmul.f32 1.442695, %v1850_v47  ;;  %v1984_v21 = vsel %vm600_vm0, %v9755_v50, 0.0  ;;  %v9762_v3 = vpop.eup %8585 }
 0x367   : > { %v1911_v32 = vmul.f32 1.442695, %v1849_v59  ;;  %v1806_v30 = vpop.xlane.xlu0 %1805  ;;  %1964 = vadd.xlane.f32.xlu0 %v1963_v7  ;;  %1985 = vadd.xlane.f32.xlu1 %v1984_v21  ;;  %v1981_v18 = vsel %vm600_vm0, %v9762_v3, 0.0 }
 0x368   : > { %8599 = vpow2.f32 %v1913_v33  ;;  %v1803_v25 = vpop.xlane.xlu1 %1802  ;;  %v1846_v0 = vsub.f32 %v9595_v29, %v1806_v30 }
 0x369   : > { %v9765_v41 = vpop.eup %8587  ;;  %v1845_v27 = vsub.f32 %v9600_v31, %v1803_v25  ;;  %8601 = vpow2.f32 %v1911_v32 }
 0x36a   : > { %v1905_v40 = vmul.f32 1.442695, %v1846_v0  ;;  %v1972_v55 = vsel %vm600_vm0, %v9765_v41, 0.0  ;;  %v9772_v52 = vpop.eup %8589 }
 0x36b   : > { %v1903_v35 = vmul.f32 1.442695, %v1845_v27  ;;  %1973 = vadd.xlane.f32.xlu0 %v1972_v55  ;;  %1982 = vadd.xlane.f32.xlu1 %v1981_v18  ;;  %v1969_v31 = vsel %vm600_vm0, %v9772_v52, 0.0  ;;  %v9812_v27 = vpop.permute.xlu0 %2731 }
 0x36c   : > { %8603 = vpow2.f32 %v1905_v40  ;;  %v9814_v40 = vpop.permute.xlu1 %2840 }
 0x36d   : > { %v9774_v29 = vpop.eup %8591  ;;  %8605 = vpow2.f32 %v1903_v35 }
 0x36e   : > { %v2002_v63 = vsel %vm600_vm0, %v9774_v29, 0.0  ;;  %v9780_v15 = vpop.eup %8593 }
 0x36f   : > { %2003 = vadd.xlane.f32.xlu0 %v2002_v63  ;;  %1970 = vadd.xlane.f32.xlu1 %v1969_v31  ;;  %v1999_v57 = vsel %vm600_vm0, %v9780_v15, 0.0 }
 0x371   : > { %v9782_v14 = vpop.eup %8595 }
 0x372   : > { %v1990_v8 = vsel %vm600_vm0, %v9782_v14, 0.0  ;;  %v9788_v53 = vpop.eup %8597 }
 0x373   : > { %2000 = vadd.xlane.f32.xlu0 %v1999_v57  ;;  %1991 = vadd.xlane.f32.xlu1 %v1990_v8  ;;  %v1987_v33 = vsel %vm600_vm0, %v9788_v53, 0.0 }
 0x375   : > { %v9790_v47 = vpop.eup %8599 }
 0x376   : > { %v2008_v59 = vsel %vm600_vm0, %v9790_v47, 0.0  ;;  %v9796_v21 = vpop.eup %8601 }
 0x377   : > { %1988 = vadd.xlane.f32.xlu0 %v1987_v33  ;;  %2009 = vadd.xlane.f32.xlu1 %v2008_v59  ;;  %v2005_v30 = vsel %vm600_vm0, %v9796_v21, 0.0 }
 0x379   : > { %v9798_v32 = vpop.eup %8603 }
 0x37a   : > { %v1996_v7 = vsel %vm600_vm0, %v9798_v32, 0.0  ;;  %v9804_v25 = vpop.eup %8605 }
 0x37b   : > { %1997 = vadd.xlane.f32.xlu0 %v1996_v7  ;;  %2006 = vadd.xlane.f32.xlu1 %v2005_v30  ;;  %v1993_v0 = vsel %vm600_vm0, %v9804_v25, 0.0 }
 0x37f   : > { %1994 = vadd.xlane.f32.xlu1 %v1993_v0 }
 0x390   : > { %2838 = vrot.lane.b32.xlu1 %v9112_v36, %s8903_s21 }
 0x391   : > { %2729 = vrot.lane.b32.xlu0 %v9116_v37, %s8903_s21 }
 0x3c4   : > { %v1932_v55 = vpop.xlane.xlu0 %1931 }
 0x3c5   : > { %8607 = vrcp.f32 %v1932_v55 }
 0x3c8   : > { %v1929_v35 = vpop.xlane.xlu1 %1928  ;;  %v1920_v18 = vpop.xlane.xlu0 %1919 }
 0x3c9   : > { %8609 = vrcp.f32 %v1929_v35 }
 0x3ca   : > { %8611 = vrcp.f32 %v1920_v18 }
 0x3cc   : > { %v1917_v63 = vpop.xlane.xlu1 %1916 }
 0x3cd   : > { %8613 = vrcp.f32 %v1917_v63 }
 0x3d0   : > { %v1938_v31 = vpop.xlane.xlu0 %1937  ;;  %v1935_v8 = vpop.xlane.xlu1 %1934 }
 0x3d1   : > { %8615 = vrcp.f32 %v1938_v31 }
 0x3d2   : > { %8617 = vrcp.f32 %v1935_v8  ;;  %v8608_v37 = vpop.eup %8607 }
 0x3d3   : > { %v2048_v0 = vmul.f32 %v8608_v37, %v9656_v10 }
 0x3d4   : > { %v1926_v36 = vpop.xlane.xlu0 %1925  ;;  %v1923_v57 = vpop.xlane.xlu1 %1922 }
 0x3d5   : > { %8619 = vrcp.f32 %v1926_v36 }
 0x3d6   : > { %8621 = vrcp.f32 %v1923_v57  ;;  %v8610_v59 = vpop.eup %8609 }
 0x3d7   : > { %v2047_v7 = vmul.f32 %v8610_v59, %v9664_v2  ;;  %v8612_v30 = vpop.eup %8611 }
 0x3d8   : > { %v1953_v33 = vpop.xlane.xlu1 %1952  ;;  %v2044_v63 = vmul.f32 %v8612_v30, %v9660_v19 }
 0x3d9   : > { %v1956_v55 = vpop.xlane.xlu0 %1955  ;;  %8623 = vrcp.f32 %v1953_v33  ;;  %8041 = vmatprep.mubr.msk.f32.mxu0 %vm600_vm0, %v2047_v7 }
 0x3da   : > { %v8614_v35 = vpop.eup %8613  ;;  %8625 = vrcp.f32 %v1956_v55  ;;  %8042 = vmatmul.mubr.msk.f32.vlgmr.msra.gmra.mxu0 %vm600_vm0, %v2048_v0 }
 0x3db   : > { %v2043_v18 = vmul.f32 %v8614_v35, %v9672_v42  ;;  %8062 = vmatpush3.msra.mxu0 %v9425_v49 }
 0x3dc   : > { %v1941_v31 = vpop.xlane.xlu1 %1940  ;;  %8063 = vmatprep.subr.mxu0 %v9608_v24 }
 0x3dd   : > { %v1944_v2 = vpop.xlane.xlu0 %1943  ;;  %8627 = vrcp.f32 %v1941_v31  ;;  %8027 = vmatprep.mubr.msk.f32.mxu1 %vm600_vm0, %v2043_v18  ;;  %8064 = vmatpush3.msra.mxu0 %v9608_v24 }
 0x3de   : > { %v8616_v10 = vpop.eup %8615  ;;  %8629 = vrcp.f32 %v1944_v2  ;;  %8028 = vmatmul.mubr.msk.f32.vlgmr.msra.gmra.mxu1 %vm600_vm0, %v2044_v63  ;;  %8065 = vmatprep.subr.mxu0 %v9616_v43 }
 0x3df   : > { %v8618_v8 = vpop.eup %8617  ;;  %8048 = vmatpush3.msra.mxu1 %v9422_v48  ;;  %8066 = vmatpush3.msra.mxu0 %v9616_v43  ;;  %v2050_v19 = vmul.f32 %v8616_v10, %v9680_v5 }
 0x3e0   : > { %8049 = vmatprep.subr.mxu1 %v9612_v12  ;;  %v2049_v49 = vmul.f32 %v8618_v8, %v9676_v20  ;;  %8067 = vmatprep.subr.mxu0 %v9620_v54  ;;  %v1962_v24 = vpop.xlane.xlu1 %1961 }
 0x3e1   : > { %8050 = vmatpush3.msra.mxu1 %v9612_v12  ;;  %8068 = vmatpush3.msra.mxu0 %v9620_v54  ;;  %8631 = vrcp.f32 %v1962_v24 }
 0x3e2   : > { %v8620_v42 = vpop.eup %8619  ;;  %8044 = vmatprep.mubr.msk.f32.mxu0 %vm600_vm0, %v2049_v49  ;;  %8051 = vmatprep.subr.mxu1 %v9618_v44 }
 0x3e3   : > { %v8622_v36 = vpop.eup %8621  ;;  %8089 = vmatprep.subr.mxu0 %v9624_v58  ;;  %v2046_v48 = vmul.f32 %v8620_v42, %v9690_v34  ;;  %8045 = vmatmul.mubr.msk.f32.gmra.mxu0 %vm600_vm0, %v2050_v19 }
 0x3e4   : > { %8052 = vmatpush3.msra.mxu1 %v9618_v44  ;;  %v2045_v43 = vmul.f32 %v8622_v36, %v9686_v28  ;;  %v1950_v12 = vpop.xlane.xlu0 %1949  ;;  %v1959_v20 = vpop.xlane.xlu1 %1958 }
 0x3e5   : > { %8053 = vmatprep.subr.mxu1 %v9622_v56  ;;  %8633 = vrcp.f32 %v1959_v20 }
 0x3e6   : > { %v8624_v54 = vpop.eup %8623  ;;  %8054 = vmatpush3.msra.mxu1 %v9622_v56  ;;  %8030 = vmatprep.mubr.msk.f32.mxu1 %vm600_vm0, %v2045_v43  ;;  %8635 = vrcp.f32 %v1950_v12 }
 0x3e7   : > { %v8626_v5 = vpop.eup %8625  ;;  %8075 = vmatprep.subr.mxu1 %v9626_v1  ;;  %8031 = vmatmul.mubr.msk.f32.gmra.mxu1 %vm600_vm0, %v2046_v48  ;;  %v2055_v44 = vmul.f32 %v8624_v54, %v9697_v17 }
 0x3e8   : > { %v2056_v28 = vmul.f32 %v8626_v5, %v9700_v13  ;;  %v1980_v34 = vpop.xlane.xlu0 %1979  ;;  %v1947_v57 = vpop.xlane.xlu1 %1946 }
 0x3e9   : > { %8069 = vmatprep.mubr.msk.f32.mxu0 %vm600_vm0, %v2055_v44  ;;  %8637 = vrcp.f32 %v1947_v57 }
 0x3ea   : > { %v8628_v37 = vpop.eup %8627  ;;  %8070 = vmatmul.mubr.msk.f32.vlgmr.msra.gmra.mxu0 %vm600_vm0, %v2056_v28  ;;  %8639 = vrcp.f32 %v1980_v34 }
 0x3eb   : > { %v8630_v56 = vpop.eup %8629  ;;  %8090 = vmatpush3.msra.mxu0 %v9624_v58  ;;  %v2051_v59 = vmul.f32 %v8628_v37, %v9707_v23 }
 0x3ec   : > { %v2052_v33 = vmul.f32 %v8630_v56, %v9710_v51  ;;  %8091 = vmatprep.subr.mxu0 %v9628_v4  ;;  %v1977_v17 = vpop.xlane.xlu0 %1976  ;;  %v1968_v13 = vpop.xlane.xlu1 %1967 }
 0x3ed   : > { %8092 = vmatpush3.msra.mxu0 %v9628_v4  ;;  %8055 = vmatprep.mubr.msk.f32.mxu1 %vm600_vm0, %v2051_v59  ;;  %8641 = vrcp.f32 %v1977_v17 }
 0x3ee   : > { %8093 = vmatprep.subr.mxu0 %v9632_v11  ;;  %8056 = vmatmul.mubr.msk.f32.vlgmr.msra.gmra.mxu1 %vm600_vm0, %v2052_v33  ;;  %8643 = vrcp.f32 %v1968_v13  ;;  %v8632_v23 = vpop.eup %8631 }
 0x3ef   : > { %8076 = vmatpush3.msra.mxu1 %v9626_v1  ;;  %8094 = vmatpush3.msra.mxu0 %v9632_v11  ;;  %v11698_v11 = vld [vmem:[#allocation10_spill] sm:$0xff]  ;;  %v2058_v30 = vmul.f32 %v8632_v23, %v9718_v38 }
 0x3f0   : > { %8077 = vmatprep.subr.mxu1 %v9630_v61  ;;  %8095 = vmatprep.subr.mxu0 %v9636_v60  ;;  %v1965_v58 = vpop.xlane.xlu0 %1964  ;;  %v1986_v4 = vpop.xlane.xlu1 %1985 }
 0x3f1   : > { %8078 = vmatpush3.msra.mxu1 %v9630_v61  ;;  %8096 = vmatpush3.msra.mxu0 %v9636_v60  ;;  %8645 = vrcp.f32 %v1965_v58  ;;  %v11699_v60 = vld [vmem:[#allocation11_spill] sm:$0xff] }
 0x3f2   : > { %8079 = vmatprep.subr.mxu1 %v9634_v22  ;;  %8117 = vmatprep.subr.mxu0 %v9640_v26  ;;  %v8634_v1 = vpop.eup %8633  ;;  %8647 = vrcp.f32 %v1986_v4  ;;  %v575_v4 = vld [vmem:[%s11639_s5] sm:$0xff] }
 0x3f3   : > { %8080 = vmatpush3.msra.mxu1 %v9634_v22  ;;  %v2057_v61 = vmul.f32 %v8634_v1, %v9722_v6  ;;  %v8636_v0 = vpop.eup %8635 }
 0x3f4   : > { %8081 = vmatprep.subr.mxu1 %v11698_v11  ;;  %v1974_v51 = vpop.xlane.xlu0 %1973  ;;  %v1983_v7 = vpop.xlane.xlu1 %1982  ;;  %v2054_v6 = vmul.f32 %v8636_v0, %v9726_v9 }
 0x3f5   : > { %8082 = vmatpush3.msra.mxu1 %v11698_v11  ;;  %8649 = vrcp.f32 %v1983_v7  ;;  %8072 = vmatprep.mubr.msk.f32.mxu0 %vm600_vm0, %v2057_v61 }
 0x3f6   : > { %8103 = vmatprep.subr.mxu1 %v11699_v60  ;;  %v8638_v55 = vpop.eup %8637  ;;  %8073 = vmatmul.mubr.msk.f32.gmra.mxu0 %vm600_vm0, %v2058_v30  ;;  %8651 = vrcp.f32 %v1974_v51 }
 0x3f7   : > { %v2053_v18 = vmul.f32 %v8638_v55, %v9732_v39  ;;  %v8640_v63 = vpop.eup %8639 }
 0x3f8   : > { %v2004_v22 = vpop.xlane.xlu0 %2003  ;;  %v1971_v35 = vpop.xlane.xlu1 %1970  ;;  %v2064_v2 = vmul.f32 %v8640_v63, %v9735_v16 }
 0x3f9   : > { %8653 = vrcp.f32 %v1971_v35  ;;  %8058 = vmatprep.mubr.msk.f32.mxu1 %vm600_vm0, %v2053_v18 }
 0x3fa   : > { %v8642_v31 = vpop.eup %8641  ;;  %8059 = vmatmul.mubr.msk.f32.gmra.mxu1 %vm600_vm0, %v2054_v6  ;;  %8655 = vrcp.f32 %v2004_v22 }
 0x3fb   : > { %v2063_v38 = vmul.f32 %v8642_v31, %v9742_v46  ;;  %v8644_v49 = vpop.eup %8643  ;;  %v11700_v46 = vld [vmem:[#allocation12_spill] sm:$0xff] }
 0x3fc   : > { %v2001_v10 = vpop.xlane.xlu0 %2000  ;;  %v1992_v8 = vpop.xlane.xlu1 %1991  ;;  %v2060_v19 = vmul.f32 %v8644_v49, %v9745_v45  ;;  %v11701_v45 = vld [vmem:[#allocation13_spill] sm:$0xff] }
 0x3fd   : > { %8657 = vrcp.f32 %v2001_v10  ;;  %8097 = vmatprep.mubr.msk.f32.mxu0 %vm600_vm0, %v2063_v38 }
 0x3fe   : > { %v8646_v39 = vpop.eup %8645  ;;  %8098 = vmatmul.mubr.msk.f32.vlgmr.msra.gmra.mxu0 %vm600_vm0, %v2064_v2  ;;  %8659 = vrcp.f32 %v1992_v8 }
 0x3ff   : > { %8118 = vmatpush3.msra.mxu0 %v9640_v26  ;;  %v2059_v9 = vmul.f32 %v8646_v39, %v9752_v62  ;;  %v8648_v42 = vpop.eup %8647 }
 0x400   : > { %8119 = vmatprep.subr.mxu0 %v11700_v46  ;;  %v1989_v16 = vpop.xlane.xlu0 %1988  ;;  %v2010_v24 = vpop.xlane.xlu1 %2009  ;;  %v2066_v43 = vmul.f32 %v8648_v42, %v9755_v50 }
 0x401   : > { %8661 = vrcp.f32 %v1989_v16  ;;  %8120 = vmatpush3.msra.mxu0 %v11700_v46  ;;  %8083 = vmatprep.mubr.msk.f32.mxu1 %vm600_vm0, %v2059_v9 }
 0x402   : > { %8121 = vmatprep.subr.mxu0 %v9814_v40  ;;  %8084 = vmatmul.mubr.msk.f32.vlgmr.msra.gmra.mxu1 %vm600_vm0, %v2060_v19  ;;  %v8650_v26 = vpop.eup %8649  ;;  %8663 = vrcp.f32 %v2010_v24 }
 0x403   : > { %8104 = vmatpush3.msra.mxu1 %v11699_v60  ;;  %8122 = vmatpush3.msra.mxu0 %v9814_v40  ;;  %v2065_v48 = vmul.f32 %v8650_v26, %v9762_v3  ;;  %v8652_v12 = vpop.eup %8651 }
 0x404   : > { %8105 = vmatprep.subr.mxu1 %v11701_v45  ;;  %v1998_v62 = vpop.xlane.xlu0 %1997  ;;  %v2007_v36 = vpop.xlane.xlu1 %2006  ;;  %v2062_v50 = vmul.f32 %v8652_v12, %v9765_v41 }
 0x405   : > { %8106 = vmatpush3.msra.mxu1 %v11701_v45  ;;  %8665 = vrcp.f32 %v2007_v36  ;;  %8100 = vmatprep.mubr.msk.f32.mxu0 %vm600_vm0, %v2065_v48 }
 0x406   : > { %8107 = vmatprep.subr.mxu1 %v9812_v27  ;;  %v8654_v20 = vpop.eup %8653  ;;  %8101 = vmatmul.mubr.msk.f32.gmra.mxu0 %vm600_vm0, %v2066_v43  ;;  %8667 = vrcp.f32 %v1998_v62 }
 0x407   : > { %8108 = vmatpush3.msra.mxu1 %v9812_v27  ;;  %v2061_v3 = vmul.f32 %v8654_v20, %v9772_v52  ;;  %v8656_v5 = vpop.eup %8655 }
 0x408   : > { %v2730_v40 = vpop.permute.xlu0 %2729  ;;  %v1995_v54 = vpop.xlane.xlu1 %1994  ;;  %v2072_v57 = vmul.f32 %v8656_v5, %v9774_v29 }
 0x409   : > { %8669 = vrcp.f32 %v1995_v54  ;;  %8109 = vmatprep.subr.mxu1 %v2730_v40  ;;  %8086 = vmatprep.mubr.msk.f32.mxu1 %vm600_vm0, %v2061_v3 }
 0x40a   : > { %v8658_v44 = vpop.eup %8657  ;;  %8110 = vmatpush3.msra.mxu1 %v2730_v40 }
 0x40b   : > { %8087 = vmatmul.mubr.msk.f32.gmra.mxu1 %vm600_vm0, %v2062_v50  ;;  %v2071_v28 = vmul.f32 %v8658_v44, %v9780_v15  ;;  %v8660_v27 = vpop.eup %8659 }
 0x40c   : > { %v2839_v34 = vpop.permute.xlu1 %2838  ;;  %v2068_v37 = vmul.f32 %v8660_v27, %v9782_v14 }
 0x40d   : > { %8123 = vmatprep.subr.mxu0 %v2839_v34  ;;  %8125 = vmatprep.mubr.msk.f32.mxu0 %vm600_vm0, %v2071_v28 }
 0x40e   : > { %v8662_v52 = vpop.eup %8661  ;;  %8124 = vmatpush3.msra.mxu0 %v2839_v34 }
 0x40f   : > { %8126 = vmatmul.mubr.msk.f32.vlgmr.msra.gmra.mxu0 %vm600_vm0, %v2072_v57  ;;  %v2067_v41 = vmul.f32 %v8662_v52, %v9788_v53  ;;  %v8664_v56 = vpop.eup %8663 }
 0x410   : > { %v2074_v33 = vmul.f32 %v8664_v56, %v9790_v47 }
 0x411   : > { %8111 = vmatprep.mubr.msk.f32.mxu1 %vm600_vm0, %v2067_v41 }
 0x412   : > { %8112 = vmatmul.mubr.msk.f32.vlgmr.msra.gmra.mxu1 %vm600_vm0, %v2068_v37  ;;  %v8666_v15 = vpop.eup %8665 }
 0x413   : > { %v2073_v59 = vmul.f32 %v8666_v15, %v9796_v21  ;;  %v8668_v29 = vpop.eup %8667  ;;  %v578_v21 = vld [vmem:[%s11639_s5 + $0x18] sm:$0xff] }
 0x414   : > { %v2070_v14 = vmul.f32 %v8668_v29, %v9798_v32  ;;  %8131 = vmatprep.subr.mxu1 %v578_v21  ;;  %v576_v32 = vld [vmem:[%s11639_s5 + $0x8] sm:$0xff] }
 0x415   : > { %8128 = vmatprep.mubr.msk.f32.mxu0 %vm600_vm0, %v2073_v59  ;;  %8132 = vmatpush3.msra.mxu1 %v578_v21 }
 0x416   : > { %v8670_v17 = vpop.eup %8669  ;;  %8129 = vmatmul.mubr.msk.f32.gmra.mxu0 %vm600_vm0, %v2074_v33 }
 0x417   : > { %v2069_v53 = vmul.f32 %v8670_v17, %v9804_v25  ;;  %v577_v25 = vld [vmem:[%s11639_s5 + $0x10] sm:$0xff] }
 0x418   : > { %8133 = vmatprep.subr.mxu1 %v577_v25 }
 0x419   : > { %8114 = vmatprep.mubr.msk.f32.mxu1 %vm600_vm0, %v2069_v53  ;;  %8134 = vmatpush3.msra.mxu1 %v577_v25 }
 0x41a   : > { %8115 = vmatmul.mubr.msk.f32.gmra.mxu1 %vm600_vm0, %v2070_v14  ;;  %8135 = vmatprep.subr.mxu1 %v576_v32 }
 0x41b   : > { %8136 = vmatpush3.msra.mxu1 %v576_v32 }
 0x41c   : > { %8137 = vmatprep.subr.mxu1 %v575_v4 }
 0x41d   : > { %8138 = vmatpush3.msra.mxu1 %v575_v4 }
 0x49a   : > { %v8043_v13 = vpop.f32.mrf.mxu0 }
 0x49b   : > { %2957 = vrot.lane.b32.xlu1 %v8043_v13, %s11668_s26 }
 0x49c   : > { %v9933_v58 = vpop.f32.mrf.mxu0 }
 0x49e   : > { %v8029_v47 = vpop.f32.mrf.mxu1 }
 0x49f   : > { %2955 = vrot.lane.b32.xlu0 %v8029_v47, %s11668_s26 }
 0x4a0   : > { %v2165_v1 = vpop.f32.mrf.mxu1 }
 0x4a3   : > { %v8046_v23 = vpop.f32.mrf.mxu0 }
 0x4a5   : > { %v2284_v11 = vpop.f32.mrf.mxu0 }
 0x4a6   : > { %2989 = vrot.lane.b32.xlu1 %v2284_v11, %s11664_s23 }
 0x4a7   : > { %v8032_v51 = vpop.f32.mrf.mxu1 }
 0x4a9   : > { %v2175_v7 = vpop.f32.mrf.mxu1 }
 0x4aa   : > { %2987 = vrot.lane.b32.xlu0 %v2175_v7, %s11664_s23  ;;  %3021 = vrot.lane.b32.xlu1 %v8046_v23, %s11666_s27  ;;  %v8071_v61 = vpop.f32.mrf.mxu0 }
 0x4ac   : > { %v2492_v30 = vpop.f32.mrf.mxu0 }
 0x4ae   : > { %3019 = vrot.lane.b32.xlu0 %v8032_v51, %s11666_s27  ;;  %2961 = vrot.lane.b32.xlu1 %v8071_v61, %s11668_s26  ;;  %v8057_v60 = vpop.f32.mrf.mxu1 }
 0x4b0   : > { %v2383_v55 = vpop.f32.mrf.mxu1 }
 0x4b2   : > { %2959 = vrot.lane.b32.xlu0 %v8057_v60, %s11668_s26 }
 0x4b6   : > { %v8074_v0 = vpop.f32.mrf.mxu0 }
 0x4b8   : > { %v2502_v22 = vpop.f32.mrf.mxu0 }
 0x4b9   : > { %2993 = vrot.lane.b32.xlu1 %v2502_v22, %s11664_s23 }
 0x4ba   : > { %v8060_v35 = vpop.f32.mrf.mxu1 }
 0x4bc   : > { %v2393_v18 = vpop.f32.mrf.mxu1 }
 0x4bd   : > { %3025 = vrot.lane.b32.xlu1 %v8074_v0, %s11666_s27  ;;  %2991 = vrot.lane.b32.xlu0 %v2393_v18, %s11664_s23 }
 0x4be   : > { %v8099_v63 = vpop.f32.mrf.mxu0 }
 0x4c0   : > { %v9949_v6 = vpop.f32.mrf.mxu0 }
 0x4c1   : > { %2965 = vrot.lane.b32.xlu1 %v8099_v63, %s11668_s26  ;;  %3023 = vrot.lane.b32.xlu0 %v8060_v35, %s11666_s27  ;;  %v7326_v63 = vld [vmem:[%s11640_s6] ss:$0 sm:$0xff] }
 0x4c2   : > { %v8085_v31 = vpop.f32.mrf.mxu1 }
 0x4c4   : > { %v2601_v2 = vpop.f32.mrf.mxu1 }
 0x4c5   : > { %2963 = vrot.lane.b32.xlu0 %v8085_v31, %s11668_s26 }
 0x4c6   : > { %v8102_v38 = vpop.f32.mrf.mxu0 }
 0x4c8   : > { %v2720_v10 = vpop.f32.mrf.mxu0 }
 0x4c9   : > { %2997 = vrot.lane.b32.xlu1 %v2720_v10, %s11664_s23 }
 0x4cb   : > { %v8088_v8 = vpop.f32.mrf.mxu1 }
 0x4cd   : > { %v2611_v49 = vpop.f32.mrf.mxu1  ;;  %3029 = vrot.lane.b32.xlu1 %v8102_v38, %s11666_s27 }
 0x4ce   : > { %2995 = vrot.lane.b32.xlu0 %v2611_v49, %s11664_s23  ;;  %v11703_v49 = vld [vmem:[#allocation2_spill] sm:$0xff] }
 0x4cf   : > { %v8127_v39 = vpop.f32.mrf.mxu0 }
 0x4d1   : > { %2969 = vrot.lane.b32.xlu1 %v8127_v39, %s11668_s26  ;;  %v2928_v19 = vpop.f32.mrf.mxu0 }
 0x4d2   : > { %3027 = vrot.lane.b32.xlu0 %v8088_v8, %s11666_s27  ;;  %v8113_v9 = vpop.f32.mrf.mxu1 }
 0x4d4   : > { %v2819_v16 = vpop.f32.mrf.mxu1 }
 0x4d6   : > { %2967 = vrot.lane.b32.xlu0 %v8113_v9, %s11668_s26  ;;  %v8130_v46 = vpop.f32.mrf.mxu0 }
 0x4d8   : > { %v2938_v24 = vpop.f32.mrf.mxu0 }
 0x4d9   : > { %3001 = vrot.lane.b32.xlu1 %v2938_v24, %s11664_s23 }
 0x4da   : > { %v8116_v42 = vpop.f32.mrf.mxu1 }
 0x4dc   : > { %v2829_v26 = vpop.f32.mrf.mxu1 }
 0x4dd   : > { %2999 = vrot.lane.b32.xlu0 %v2829_v26, %s11664_s23  ;;  %3033 = vrot.lane.b32.xlu1 %v8130_v46, %s11666_s27  ;;  %v11704_v26 = vld [vmem:[#allocation4_spill] sm:$0xff] }
 0x4e1   : > { %3031 = vrot.lane.b32.xlu0 %v8116_v42, %s11666_s27 }
 0x50d   : > { %v2958_v45 = vpop.permute.xlu1 %2957 }
 0x50e   : > { %v3044_v20 = vsel %vm794_vm1, %v9933_v58, %v2958_v45 }
 0x511   : > { %v2956_v62 = vpop.permute.xlu0 %2955 }
 0x512   : > { %v3043_v43 = vsel %vm794_vm1, %v2165_v1, %v2956_v62  ;;  %v11705_v62 = vld [vmem:[#allocation5_spill] sm:$0xff] }
 0x518   : > { %v2990_v36 = vpop.permute.xlu1 %2989 }
 0x519   : > { %v3053_v3 = vsel %vm3051_vm2, %v3044_v20, %v2990_v36 }
 0x51c   : > { %v2988_v48 = vpop.permute.xlu0 %2987  ;;  %v3022_v12 = vpop.permute.xlu1 %3021 }
 0x51d   : > { %v3052_v40 = vsel %vm3051_vm2, %v3043_v43, %v2988_v48  ;;  %v3062_v50 = vsel %vm3060_vm3, %v3053_v3, %v3022_v12 }
 0x520   : > { %v3020_v54 = vpop.permute.xlu0 %3019  ;;  %v2962_v44 = vpop.permute.xlu1 %2961 }
 0x521   : > { %v3061_v5 = vsel %vm3060_vm3, %v3052_v40, %v3020_v54  ;;  %v3046_v41 = vsel %vm794_vm1, %v2492_v30, %v2962_v44  ;;  %v11706_v54 = vld [vmem:[#allocation7_spill] sm:$0xff] }
 0x522   : > { %8139 = vmatprep.mubr.msk.f32.mxu1 %vm600_vm0, %v3061_v5 }
 0x523   : > { %8140 = vmatmul.mubr.msk.f32.vlgmr.msra.gmra.mxu1 %vm600_vm0, %v3062_v50  ;;  %v11707_v50 = vld [vmem:[#allocation6_spill] sm:$0xff] }
 0x524   : > { %v2960_v28 = vpop.permute.xlu0 %2959 }
 0x525   : > { %v3045_v52 = vsel %vm794_vm1, %v2383_v55, %v2960_v28 }
 0x52b   : > { %v2994_v34 = vpop.permute.xlu1 %2993 }
 0x52c   : > { %v3055_v15 = vsel %vm3051_vm2, %v3046_v41, %v2994_v34  ;;  %v11708_v41 = vld [vmem:[#allocation9_spill] sm:$0xff] }
 0x52f   : > { %v2992_v27 = vpop.permute.xlu0 %2991  ;;  %v3026_v57 = vpop.permute.xlu1 %3025 }
 0x530   : > { %v3054_v37 = vsel %vm3051_vm2, %v3045_v52, %v2992_v27  ;;  %v3064_v29 = vsel %vm3060_vm3, %v3055_v15, %v3026_v57  ;;  %v11709_v15 = vld [vmem:[#allocation8_spill] sm:$0xff] }
 0x533   : > { %v3024_v56 = vpop.permute.xlu0 %3023  ;;  %v2966_v33 = vpop.permute.xlu1 %2965 }
 0x534   : > { %v3063_v59 = vsel %vm3060_vm3, %v3054_v37, %v3024_v56  ;;  %v3048_v47 = vsel %vm794_vm1, %v9949_v6, %v2966_v33 }
 0x535   : > { %8142 = vmatprep.mubr.msk.f32.mxu1 %vm600_vm0, %v3063_v59 }
 0x536   : > { %8143 = vmatmul.mubr.msk.f32.gmra.mxu1 %vm600_vm0, %v3064_v29 }
 0x537   : > { %v2964_v17 = vpop.permute.xlu0 %2963 }
 0x538   : > { %v3047_v13 = vsel %vm794_vm1, %v2601_v2, %v2964_v17  ;;  %v11702_v2 = vld [vmem:[#allocation3_spill] sm:$0xff] }
 0x53b   : > { %v2998_v53 = vpop.permute.xlu1 %2997 }
 0x53c   : > { %v3057_v58 = vsel %vm3051_vm2, %v3048_v47, %v2998_v53 }
 0x53f   : > { %v3030_v21 = vpop.permute.xlu1 %3029 }
 0x540   : > { %v2996_v14 = vpop.permute.xlu0 %2995  ;;  %v3066_v23 = vsel %vm3060_vm3, %v3057_v58, %v3030_v21 }
 0x541   : > { %v3056_v25 = vsel %vm3051_vm2, %v3047_v13, %v2996_v14 }
 0x543   : > { %v2970_v1 = vpop.permute.xlu1 %2969 }
 0x544   : > { %v3028_v32 = vpop.permute.xlu0 %3027  ;;  %v3050_v30 = vsel %vm794_vm1, %v2928_v19, %v2970_v1 }
 0x545   : > { %v3065_v4 = vsel %vm3060_vm3, %v3056_v25, %v3028_v32 }
 0x546   : > { %8145 = vmatprep.mubr.msk.f32.mxu1 %vm600_vm0, %v3065_v4 }
 0x547   : > { %8146 = vmatmul.mubr.msk.f32.gmra.mxu1 %vm600_vm0, %v3066_v23 }
 0x548   : > { %v2968_v11 = vpop.permute.xlu0 %2967 }
 0x549   : > { %v3049_v61 = vsel %vm794_vm1, %v2819_v16, %v2968_v11 }
 0x54b   : > { %v3002_v51 = vpop.permute.xlu1 %3001 }
 0x54c   : > { %v3059_v22 = vsel %vm3051_vm2, %v3050_v30, %v3002_v51 }
 0x54f   : > { %v3000_v7 = vpop.permute.xlu0 %2999  ;;  %v3034_v60 = vpop.permute.xlu1 %3033 }
 0x550   : > { %v3058_v0 = vsel %vm3051_vm2, %v3049_v61, %v3000_v7  ;;  %v3068_v18 = vsel %vm3060_vm3, %v3059_v22, %v3034_v60 }
 0x553   : > { %v3032_v55 = vpop.permute.xlu0 %3031 }
 0x554   : > { %v3067_v35 = vsel %vm3060_vm3, %v3058_v0, %v3032_v55 }
 0x555   : > { %8148 = vmatprep.mubr.msk.f32.mxu1 %vm600_vm0, %v3067_v35 }
 0x556   : > { %8149 = vmatmul.mubr.msk.f32.gmra.mxu1 %vm600_vm0, %v3068_v18  ;;  %v583_v18 = vld [vmem:[%s11643_s9 + $0x18] sm:$0xff] }
 0x557   : > { %8151 = vmatprep.subr.mxu0 %v583_v18 }
 0x558   : > { %8152 = vmatpush3.msra.mxu0 %v583_v18 }
 0x5e3   : > { %v8141_v6 = vpop.f32.mrf.mxu1 }
 0x5e4   : > { %v3171_v31 = vadd.f32 %v8141_v6, %v7326_v63 }
 0x5e5   : > { %v3165_v38 = vpop.f32.mrf.mxu1 }
 0x5e6   : > { %v3205_v10 = vadd.f32 %v3171_v31, %v11702_v2  ;;  %v3166_v8 = vadd.f32 %v7326_v63, %v3165_v38 }
 0x5e8   : > { %v3204_v39 = vadd.f32 %v3166_v8, %v11703_v49  ;;  %v3217_v9 = vsel %vm600_vm0, %v3205_v10, 0.0  ;;  %v581_v8 = vld [vmem:[%s11643_s9 + $0x8] sm:$0xff] }
 0x5e9   : > { %3218 = vadd.xlane.f32.xlu1 %v3217_v9  ;;  %v580_v9 = vld [vmem:[%s11643_s9] sm:$0xff] }
 0x5ea   : > { %v3214_v19 = vsel %vm600_vm0, %v3204_v39, 0.0 }
 0x5eb   : > { %3215 = vadd.xlane.f32.xlu0 %v3214_v19 }
 0x5f6   : > { %v8144_v46 = vpop.f32.mrf.mxu1 }
 0x5f7   : > { %v3181_v24 = vadd.f32 %v8144_v46, %v7326_v63  ;;  %v8863_v46 = vld [vmem:[%s11637_s3 + $0x18] sm:$0xff] }
 0x5f8   : > { %v3175_v16 = vpop.f32.mrf.mxu1 }
 0x5f9   : > { %v3176_v42 = vadd.f32 %v7326_v63, %v3175_v16  ;;  %v3207_v36 = vadd.f32 %v3181_v24, %v11705_v62 }
 0x5fb   : > { %v3206_v45 = vadd.f32 %v3176_v42, %v11704_v26  ;;  %v3223_v43 = vsel %vm600_vm0, %v3207_v36, 0.0 }
 0x5fd   : > { %v3220_v48 = vsel %vm600_vm0, %v3206_v45, 0.0 }
 0x5fe   : > { %3221 = vadd.xlane.f32.xlu0 %v3220_v48 }
 0x602   : > { %3224 = vadd.xlane.f32.xlu0 %v3223_v43 }
 0x607   : > { %v8147_v12 = vpop.f32.mrf.mxu1 }
 0x608   : > { %v3191_v20 = vadd.f32 %v8147_v12, %v7326_v63 }
 0x609   : > { %v3185_v40 = vpop.f32.mrf.mxu1 }
 0x60a   : > { %v3209_v3 = vadd.f32 %v3191_v20, %v11706_v54  ;;  %v3186_v5 = vadd.f32 %v7326_v63, %v3185_v40  ;;  %v592_v20 = vld [vmem:[%s11645_s11 + $0x38] sm:$0xff]  ;;  %v591_v40 = vld [vmem:[%s11645_s11 + $0x30] sm:$0xff]  ;;  %v590_v54 = vld [vmem:[%s11645_s11 + $0x28] sm:$0xff] }
 0x60b   : > { %8171 = vmatprep.subr.mxu1 %v592_v20 }
 0x60c   : > { %v3208_v44 = vadd.f32 %v3186_v5, %v11707_v50  ;;  %v3229_v28 = vsel %vm600_vm0, %v3209_v3, 0.0  ;;  %8172 = vmatpush3.msra.mxu1 %v592_v20 }
 0x60d   : > { %3230 = vadd.xlane.f32.xlu0 %v3229_v28  ;;  %8173 = vmatprep.subr.mxu1 %v591_v40 }
 0x60e   : > { %v3226_v34 = vsel %vm600_vm0, %v3208_v44, 0.0  ;;  %8174 = vmatpush3.msra.mxu1 %v591_v40 }
 0x60f   : > { %3227 = vadd.xlane.f32.xlu1 %v3226_v34  ;;  %8175 = vmatprep.subr.mxu1 %v590_v54 }
 0x610   : > { %8176 = vmatpush3.msra.mxu1 %v590_v54 }
 0x616   : > { %v8150_v27 = vpop.f32.mrf.mxu1 }
 0x617   : > { %v3201_v57 = vadd.f32 %v8150_v27, %v7326_v63 }
 0x618   : > { %v3195_v52 = vpop.f32.mrf.mxu1 }
 0x619   : > { %v3211_v37 = vadd.f32 %v3201_v57, %v11708_v41  ;;  %v3196_v56 = vadd.f32 %v7326_v63, %v3195_v52  ;;  %v582_v63 = vld [vmem:[%s11643_s9 + $0x10] sm:$0xff]  ;;  %v10085_v52 = vld [vmem:[%s11641_s7] ss:$0 sm:$0xff] }
 0x61a   : > { %8153 = vmatprep.subr.mxu0 %v582_v63 }
 0x61b   : > { %v3210_v59 = vadd.f32 %v3196_v56, %v11709_v15  ;;  %v3235_v29 = vsel %vm600_vm0, %v3211_v37, 0.0  ;;  %8154 = vmatpush3.msra.mxu0 %v582_v63 }
 0x61c   : > { %3236 = vadd.xlane.f32.xlu0 %v3235_v29  ;;  %8155 = vmatprep.subr.mxu0 %v581_v8  ;;  %v10093_v29 = vld [vmem:[%s11642_s8] ss:$0 sm:$0xff] }
 0x61d   : > { %v3232_v33 = vsel %vm600_vm0, %v3210_v59, 0.0  ;;  %8156 = vmatpush3.msra.mxu0 %v581_v8 }
 0x61e   : > { %3233 = vadd.xlane.f32.xlu1 %v3232_v33  ;;  %8157 = vmatprep.subr.mxu0 %v580_v9 }
 0x61f   : > { %8158 = vmatpush3.msra.mxu0 %v580_v9 }
 0x620   : > { %8199 = vmatprep.subr.mxu0 %v8863_v46 }
 0x672   : > { %v3219_v17 = vpop.xlane.xlu1 %3218 }
 0x673   : > { %v3240_v53 = vmul.f32 0.03125, %v3219_v17 }
 0x674   : > { %v3216_v14 = vpop.xlane.xlu0 %3215 }
 0x675   : > { %v10015_v21 = vsub.f32 %v3205_v10, %v3240_v53  ;;  %v3239_v13 = vmul.f32 0.03125, %v3216_v14 }
 0x677   : > { %v10017_v47 = vsub.f32 %v3204_v39, %v3239_v13  ;;  %v3256_v25 = vmul.f32 %v10015_v21, %v10015_v21 }
 0x679   : > { %v3266_v32 = vsel %vm600_vm0, %v3256_v25, 0.0  ;;  %v3255_v58 = vmul.f32 %v10017_v47, %v10017_v47 }
 0x67a   : > { %3267 = vadd.xlane.f32.xlu0 %v3266_v32  ;;  %v8864_v32 = vld [vmem:[%s11637_s3 + $0x10] sm:$0xff] }
 0x67b   : > { %v3263_v4 = vsel %vm600_vm0, %v3255_v58, 0.0  ;;  %v8865_v58 = vld [vmem:[%s11637_s3 + $0x8] sm:$0xff] }
 0x67c   : > { %3264 = vadd.xlane.f32.xlu1 %v3263_v4  ;;  %v8866_v4 = vld [vmem:[%s11637_s3] sm:$0xff] }
 0x687   : > { %v3222_v23 = vpop.xlane.xlu0 %3221 }
 0x688   : > { %v3241_v1 = vmul.f32 0.03125, %v3222_v23 }
 0x68a   : > { %v10025_v11 = vsub.f32 %v3206_v45, %v3241_v1 }
 0x68b   : > { %v3225_v51 = vpop.xlane.xlu0 %3224 }
 0x68c   : > { %v3242_v7 = vmul.f32 0.03125, %v3225_v51  ;;  %v3257_v61 = vmul.f32 %v10025_v11, %v10025_v11 }
 0x68e   : > { %v10029_v60 = vsub.f32 %v3207_v36, %v3242_v7  ;;  %v3269_v30 = vsel %vm600_vm0, %v3257_v61, 0.0 }
 0x68f   : > { %3270 = vadd.xlane.f32.xlu1 %v3269_v30 }
 0x690   : > { %v3258_v0 = vmul.f32 %v10029_v60, %v10029_v60 }
 0x692   : > { %v3272_v55 = vsel %vm600_vm0, %v3258_v0, 0.0 }
 0x693   : > { %3273 = vadd.xlane.f32.xlu0 %v3272_v55 }
 0x696   : > { %v3231_v22 = vpop.xlane.xlu0 %3230 }
 0x697   : > { %v3244_v35 = vmul.f32 0.03125, %v3231_v22 }
 0x698   : > { %v3228_v6 = vpop.xlane.xlu1 %3227 }
 0x699   : > { %v10041_v31 = vsub.f32 %v3209_v3, %v3244_v35  ;;  %v3243_v38 = vmul.f32 0.03125, %v3228_v6  ;;  %v589_v3 = vld [vmem:[%s11645_s11 + $0x20] sm:$0xff] }
 0x69a   : > { %8177 = vmatprep.subr.mxu1 %v589_v3 }
 0x69b   : > { %v10043_v2 = vsub.f32 %v3208_v44, %v3243_v38  ;;  %v3260_v10 = vmul.f32 %v10041_v31, %v10041_v31  ;;  %8178 = vmatpush3.msra.mxu1 %v589_v3  ;;  %v588_v3 = vld [vmem:[%s11645_s11 + $0x18] sm:$0xff] }
 0x69c   : > { %8179 = vmatprep.subr.mxu1 %v588_v3 }
 0x69d   : > { %v3278_v49 = vsel %vm600_vm0, %v3260_v10, 0.0  ;;  %v3259_v39 = vmul.f32 %v10043_v2, %v10043_v2  ;;  %8180 = vmatpush3.msra.mxu1 %v588_v3 }
 0x69e   : > { %3279 = vadd.xlane.f32.xlu0 %v3278_v49 }
 0x69f   : > { %v3275_v19 = vsel %vm600_vm0, %v3259_v39, 0.0 }
 0x6a0   : > { %3276 = vadd.xlane.f32.xlu1 %v3275_v19 }
 0x6a5   : > { %v3237_v16 = vpop.xlane.xlu0 %3236 }
 0x6a6   : > { %v3246_v24 = vmul.f32 0.03125, %v3237_v16 }
 0x6a7   : > { %v3234_v42 = vpop.xlane.xlu1 %3233 }
 0x6a8   : > { %v10060_v26 = vsub.f32 %v3211_v37, %v3246_v24  ;;  %v3245_v45 = vmul.f32 0.03125, %v3234_v42 }
 0x6aa   : > { %v10062_v62 = vsub.f32 %v3210_v59, %v3245_v45  ;;  %v3262_v36 = vmul.f32 %v10060_v26, %v10060_v26 }
 0x6ac   : > { %v3284_v48 = vsel %vm600_vm0, %v3262_v36, 0.0  ;;  %v3261_v43 = vmul.f32 %v10062_v62, %v10062_v62 }
 0x6ad   : > { %3285 = vadd.xlane.f32.xlu0 %v3284_v48 }
 0x6ae   : > { %v3281_v12 = vsel %vm600_vm0, %v3261_v43, 0.0 }
 0x6af   : > { %3282 = vadd.xlane.f32.xlu1 %v3281_v12 }
 0x703   : > { %v3268_v5 = vpop.xlane.xlu0 %3267 }
 0x704   : > { %v3288_v50 = vmul.f32 0.03125, %v3268_v5  ;;  %v585_v5 = vld [vmem:[%s11645_s11] sm:$0xff] }
 0x705   : > { %v3265_v44 = vpop.xlane.xlu1 %3264 }
 0x706   : > { %v3296_v28 = vadd.f32 1e-05, %v3288_v50  ;;  %v3287_v34 = vmul.f32 0.03125, %v3265_v44  ;;  %v7337_v50 = vld [vmem:[%s11644_s10] ss:$0 sm:$0xff] }
 0x708   : > { %8671 = vrsqrt.f32 %v3296_v28  ;;  %v3295_v27 = vadd.f32 1e-05, %v3287_v34 }
 0x70a   : > { %8673 = vrsqrt.f32 %v3295_v27 }
 0x715   : > { %v8672_v57 = vpop.eup %8671 }
 0x716   : > { %v3312_v41 = vmul.f32 %v8672_v57, %v10015_v21 }
 0x717   : > { %v8674_v37 = vpop.eup %8673 }
 0x718   : > { %v3311_v56 = vmul.f32 %v8674_v37, %v10017_v47  ;;  %v3326_v15 = vmul.f32 %v10085_v52, %v3312_v41  ;;  %v3271_v59 = vpop.xlane.xlu1 %3270 }
 0x719   : > { %v3289_v17 = vmul.f32 0.03125, %v3271_v59 }
 0x71a   : > { %v3325_v33 = vmul.f32 %v10085_v52, %v3311_v56  ;;  %v3340_v13 = vadd.f32 %v10093_v29, %v3326_v15 }
 0x71b   : > { %v3297_v14 = vadd.f32 1e-05, %v3289_v17 }
 0x71c   : > { %v3339_v53 = vadd.f32 %v10093_v29, %v3325_v33  ;;  %v3274_v21 = vpop.xlane.xlu0 %3273 }
 0x71d   : > { %8675 = vrsqrt.f32 %v3297_v14  ;;  %v3290_v47 = vmul.f32 0.03125, %v3274_v21 }
 0x71e   : > { %8159 = vmatprep.mubr.msk.f32.mxu0 %vm600_vm0, %v3339_v53 }
 0x71f   : > { %8160 = vmatmul.mubr.msk.f32.vlgmr.msra.gmra.mxu0 %vm600_vm0, %v3340_v13  ;;  %v3298_v25 = vadd.f32 1e-05, %v3290_v47 }
 0x720   : > { %8200 = vmatpush3.msra.mxu0 %v8863_v46 }
 0x721   : > { %8201 = vmatprep.subr.mxu0 %v8864_v32  ;;  %8677 = vrsqrt.f32 %v3298_v25 }
 0x722   : > { %8202 = vmatpush3.msra.mxu0 %v8864_v32 }
 0x723   : > { %8203 = vmatprep.subr.mxu0 %v8865_v58 }
 0x724   : > { %8204 = vmatpush3.msra.mxu0 %v8865_v58 }
 0x725   : > { %8205 = vmatprep.subr.mxu0 %v8866_v4 }
 0x726   : > { %8206 = vmatpush3.msra.mxu0 %v8866_v4 }
 0x727   : > { %v3280_v23 = vpop.xlane.xlu0 %3279 }
 0x728   : > { %v3292_v1 = vmul.f32 0.03125, %v3280_v23 }
 0x729   : > { %v3277_v51 = vpop.xlane.xlu1 %3276 }
 0x72a   : > { %v3300_v7 = vadd.f32 1e-05, %v3292_v1  ;;  %v3291_v61 = vmul.f32 0.03125, %v3277_v51  ;;  %v8676_v30 = vpop.eup %8675  ;;  %v7346_v1 = vld [vmem:[%s11646_s12] ss:$0 sm:$0xff] }
 0x72b   : > { %v3313_v55 = vmul.f32 %v8676_v30, %v10025_v11 }
 0x72c   : > { %8679 = vrsqrt.f32 %v3300_v7  ;;  %v3299_v0 = vadd.f32 1e-05, %v3291_v61 }
 0x72d   : > { %v3327_v22 = vmul.f32 %v10085_v52, %v3313_v55 }
 0x72e   : > { %8681 = vrsqrt.f32 %v3299_v0  ;;  %v8678_v35 = vpop.eup %8677 }
 0x72f   : > { %v3341_v18 = vadd.f32 %v10093_v29, %v3327_v22  ;;  %v3314_v63 = vmul.f32 %v8678_v35, %v10029_v60 }
 0x731   : > { %8162 = vmatprep.mubr.msk.f32.mxu0 %vm600_vm0, %v3341_v18  ;;  %v3328_v6 = vmul.f32 %v10085_v52, %v3314_v63 }
 0x733   : > { %v3342_v38 = vadd.f32 %v10093_v29, %v3328_v6 }
 0x735   : > { %8163 = vmatmul.mubr.msk.f32.gmra.mxu0 %vm600_vm0, %v3342_v38 }
 0x736   : > { %v3286_v10 = vpop.xlane.xlu0 %3285 }
 0x737   : > { %v3294_v8 = vmul.f32 0.03125, %v3286_v10 }
 0x738   : > { %v3283_v49 = vpop.xlane.xlu1 %3282 }
 0x739   : > { %v8680_v11 = vpop.eup %8679  ;;  %v3302_v39 = vadd.f32 1e-05, %v3294_v8  ;;  %v3293_v9 = vmul.f32 0.03125, %v3283_v49 }
 0x73a   : > { %v3316_v19 = vmul.f32 %v8680_v11, %v10041_v31 }
 0x73b   : > { %v8682_v46 = vpop.eup %8681  ;;  %8683 = vrsqrt.f32 %v3302_v39  ;;  %v3301_v16 = vadd.f32 1e-05, %v3293_v9 }
 0x73c   : > { %v3315_v60 = vmul.f32 %v8682_v46, %v10043_v2  ;;  %v3330_v24 = vmul.f32 %v10085_v52, %v3316_v19 }
 0x73d   : > { %8685 = vrsqrt.f32 %v3301_v16 }
 0x73e   : > { %v3329_v42 = vmul.f32 %v10085_v52, %v3315_v60  ;;  %v3344_v36 = vadd.f32 %v10093_v29, %v3330_v24 }
 0x740   : > { %v3343_v45 = vadd.f32 %v10093_v29, %v3329_v42 }
 0x742   : > { %8165 = vmatprep.mubr.msk.f32.mxu0 %vm600_vm0, %v3343_v45 }
 0x743   : > { %8166 = vmatmul.mubr.msk.f32.gmra.mxu0 %vm600_vm0, %v3344_v36 }
 0x748   : > { %v8684_v48 = vpop.eup %8683 }
 0x749   : > { %v3318_v31 = vmul.f32 %v8684_v48, %v10060_v26  ;;  %v587_v26 = vld [vmem:[%s11645_s11 + $0x10] sm:$0xff] }
 0x74a   : > { %v8686_v43 = vpop.eup %8685  ;;  %8181 = vmatprep.subr.mxu1 %v587_v26 }
 0x74b   : > { %v3317_v12 = vmul.f32 %v8686_v43, %v10062_v62  ;;  %v3332_v2 = vmul.f32 %v10085_v52, %v3318_v31  ;;  %8182 = vmatpush3.msra.mxu1 %v587_v26  ;;  %v586_v62 = vld [vmem:[%s11645_s11 + $0x8] sm:$0xff] }
 0x74c   : > { %8183 = vmatprep.subr.mxu1 %v586_v62 }
 0x74d   : > { %v3331_v20 = vmul.f32 %v10085_v52, %v3317_v12  ;;  %v3346_v54 = vadd.f32 %v10093_v29, %v3332_v2  ;;  %8184 = vmatpush3.msra.mxu1 %v586_v62 }
 0x74e   : > { %8185 = vmatprep.subr.mxu1 %v585_v5 }
 0x74f   : > { %v3345_v40 = vadd.f32 %v10093_v29, %v3331_v20  ;;  %8186 = vmatpush3.msra.mxu1 %v585_v5 }
 0x751   : > { %8168 = vmatprep.mubr.msk.f32.mxu0 %vm600_vm0, %v3345_v40 }
 0x752   : > { %8169 = vmatmul.mubr.msk.f32.gmra.mxu0 %vm600_vm0, %v3346_v54 }
 0x7df   : > { %v8161_v44 = vpop.f32.mrf.mxu0 }
 0x7e0   : > { %v3449_v28 = vadd.f32 %v8161_v44, %v7337_v50 }
 0x7e1   : > { %v3443_v34 = vpop.f32.mrf.mxu0 }
 0x7e2   : > { %v3444_v27 = vadd.f32 %v7337_v50, %v3443_v34  ;;  %v3483_v52 = vmax.f32 %v3449_v28, 0.0 }
 0x7e4   : > { %v3482_v57 = vmax.f32 %v3444_v27, 0.0 }
 0x7e6   : > { %8187 = vmatprep.mubr.msk.f32.mxu1 %vm3496_vm4, %v3482_v57 }
 0x7e7   : > { %8188 = vmatmul.mubr.msk.f32.vlgmr.msra.gmra.mxu1 %vm3496_vm4, %v3483_v52 }
 0x7f5   : > { %v8164_v41 = vpop.f32.mrf.mxu0 }
 0x7f6   : > { %v3459_v37 = vadd.f32 %v8164_v41, %v7337_v50 }
 0x7f7   : > { %v3453_v56 = vpop.f32.mrf.mxu0 }
 0x7f8   : > { %v3454_v15 = vadd.f32 %v7337_v50, %v3453_v56  ;;  %v3485_v29 = vmax.f32 %v3459_v37, 0.0 }
 0x7fa   : > { %v3484_v59 = vmax.f32 %v3454_v15, 0.0 }
 0x7fc   : > { %8190 = vmatprep.mubr.msk.f32.mxu1 %vm3496_vm4, %v3484_v59 }
 0x7fd   : > { %8191 = vmatmul.mubr.msk.f32.gmra.mxu1 %vm3496_vm4, %v3485_v29 }
 0x803   : > { %v8167_v33 = vpop.f32.mrf.mxu0 }
 0x804   : > { %v3469_v17 = vadd.f32 %v8167_v33, %v7337_v50 }
 0x805   : > { %v3463_v53 = vpop.f32.mrf.mxu0 }
 0x806   : > { %v3464_v14 = vadd.f32 %v7337_v50, %v3463_v53  ;;  %v3487_v21 = vmax.f32 %v3469_v17, 0.0 }
 0x808   : > { %v3486_v13 = vmax.f32 %v3464_v14, 0.0 }
 0x80a   : > { %8193 = vmatprep.mubr.msk.f32.mxu1 %vm3496_vm4, %v3486_v13 }
 0x80b   : > { %8194 = vmatmul.mubr.msk.f32.gmra.mxu1 %vm3496_vm4, %v3487_v21 }
 0x812   : > { %v8170_v47 = vpop.f32.mrf.mxu0 }
 0x813   : > { %v3479_v25 = vadd.f32 %v8170_v47, %v7337_v50 }
 0x814   : > { %v3473_v32 = vpop.f32.mrf.mxu0 }
 0x815   : > { %v3474_v58 = vadd.f32 %v7337_v50, %v3473_v32  ;;  %v3489_v23 = vmax.f32 %v3479_v25, 0.0 }
 0x817   : > { %v3488_v4 = vmax.f32 %v3474_v58, 0.0 }
 0x819   : > { %8196 = vmatprep.mubr.msk.f32.mxu1 %vm3496_vm4, %v3488_v4 }
 0x81a   : > { %8197 = vmatmul.mubr.msk.f32.gmra.mxu1 %vm3496_vm4, %v3489_v23 }
 0x8a7   : > { %v8189_v51 = vpop.f32.mrf.mxu1 }
 0x8a8   : > { %v3593_v7 = vadd.f32 %v8189_v51, %v7346_v1 }
 0x8a9   : > { %v3587_v61 = vpop.f32.mrf.mxu1 }
 0x8aa   : > { %v3588_v30 = vadd.f32 %v7346_v1, %v3587_v61  ;;  %v3631_v0 = vsel %vm600_vm0, %v3593_v7, 0.0 }
 0x8ab   : > { %3632 = vadd.xlane.f32.xlu0 %v3631_v0 }
 0x8ac   : > { %v3628_v55 = vsel %vm600_vm0, %v3588_v30, 0.0 }
 0x8ad   : > { %3629 = vadd.xlane.f32.xlu1 %v3628_v55 }
 0x8bd   : > { %v8192_v22 = vpop.f32.mrf.mxu1 }
 0x8be   : > { %v3603_v35 = vadd.f32 %v8192_v22, %v7346_v1 }
 0x8bf   : > { %v3597_v18 = vpop.f32.mrf.mxu1 }
 0x8c0   : > { %v3598_v63 = vadd.f32 %v7346_v1, %v3597_v18  ;;  %v3637_v6 = vsel %vm600_vm0, %v3603_v35, 0.0 }
 0x8c1   : > { %3638 = vadd.xlane.f32.xlu0 %v3637_v6 }
 0x8c2   : > { %v3634_v38 = vsel %vm600_vm0, %v3598_v63, 0.0 }
 0x8c3   : > { %3635 = vadd.xlane.f32.xlu1 %v3634_v38 }
 0x8cb   : > { %v8195_v10 = vpop.f32.mrf.mxu1 }
 0x8cc   : > { %v3613_v8 = vadd.f32 %v8195_v10, %v7346_v1  ;;  %v7356_v10 = vld [vmem:[%s11648_s14] ss:$0 sm:$0xff] }
 0x8cd   : > { %v3607_v49 = vpop.f32.mrf.mxu1 }
 0x8ce   : > { %v3608_v11 = vadd.f32 %v7346_v1, %v3607_v49  ;;  %v3643_v39 = vsel %vm600_vm0, %v3613_v8, 0.0 }
 0x8cf   : > { %3644 = vadd.xlane.f32.xlu0 %v3643_v39 }
 0x8d0   : > { %v3640_v9 = vsel %vm600_vm0, %v3608_v11, 0.0 }
 0x8d1   : > { %3641 = vadd.xlane.f32.xlu1 %v3640_v9 }
 0x8da   : > { %v8198_v19 = vpop.f32.mrf.mxu1 }
 0x8db   : > { %v3623_v46 = vadd.f32 %v8198_v19, %v7346_v1 }
 0x8dc   : > { %v3617_v16 = vpop.f32.mrf.mxu1 }
 0x8dd   : > { %v3618_v60 = vadd.f32 %v7346_v1, %v3617_v16  ;;  %v3649_v24 = vsel %vm600_vm0, %v3623_v46, 0.0 }
 0x8de   : > { %3650 = vadd.xlane.f32.xlu0 %v3649_v24 }
 0x8df   : > { %v3646_v42 = vsel %vm600_vm0, %v3618_v60, 0.0 }
 0x8e0   : > { %3647 = vadd.xlane.f32.xlu1 %v3646_v42 }
 0x934   : > { %v3633_v45 = vpop.xlane.xlu0 %3632 }
 0x935   : > { %v3653_v36 = vmul.f32 0.03125, %v3633_v45 }
 0x936   : > { %v3630_v48 = vpop.xlane.xlu1 %3629 }
 0x937   : > { %v3661_v31 = vsub.f32 %v3593_v7, %v3653_v36  ;;  %v3652_v43 = vmul.f32 0.03125, %v3630_v48 }
 0x939   : > { %v3660_v12 = vsub.f32 %v3588_v30, %v3652_v43  ;;  %v3669_v2 = vmul.f32 %v3661_v31, %v3661_v31 }
 0x93b   : > { %v3679_v20 = vsel %vm600_vm0, %v3669_v2, 0.0  ;;  %v3668_v40 = vmul.f32 %v3660_v12, %v3660_v12 }
 0x93c   : > { %3680 = vadd.xlane.f32.xlu0 %v3679_v20 }
 0x93d   : > { %v3676_v54 = vsel %vm600_vm0, %v3668_v40, 0.0 }
 0x93e   : > { %3677 = vadd.xlane.f32.xlu1 %v3676_v54 }
 0x94a   : > { %v3639_v3 = vpop.xlane.xlu0 %3638 }
 0x94b   : > { %v3655_v26 = vmul.f32 0.03125, %v3639_v3 }
 0x94c   : > { %v3636_v62 = vpop.xlane.xlu1 %3635 }
 0x94d   : > { %v10169_v5 = vsub.f32 %v3603_v35, %v3655_v26  ;;  %v3654_v50 = vmul.f32 0.03125, %v3636_v62  ;;  %v7355_v35 = vld [vmem:[%s11647_s13] ss:$0 sm:$0xff] }
 0x94f   : > { %v10171_v44 = vsub.f32 %v3598_v63, %v3654_v50  ;;  %v3671_v28 = vmul.f32 %v10169_v5, %v10169_v5 }
 0x951   : > { %v3685_v34 = vsel %vm600_vm0, %v3671_v28, 0.0  ;;  %v3670_v27 = vmul.f32 %v10171_v44, %v10171_v44 }
 0x952   : > { %3686 = vadd.xlane.f32.xlu0 %v3685_v34 }
 0x953   : > { %v3682_v57 = vsel %vm600_vm0, %v3670_v27, 0.0 }
 0x954   : > { %3683 = vadd.xlane.f32.xlu1 %v3682_v57 }
 0x958   : > { %v3645_v52 = vpop.xlane.xlu0 %3644 }
 0x959   : > { %v3657_v41 = vmul.f32 0.03125, %v3645_v52 }
 0x95a   : > { %v3642_v37 = vpop.xlane.xlu1 %3641 }
 0x95b   : > { %v10179_v56 = vsub.f32 %v3613_v8, %v3657_v41  ;;  %v3656_v15 = vmul.f32 0.03125, %v3642_v37 }
 0x95d   : > { %v10181_v59 = vsub.f32 %v3608_v11, %v3656_v15  ;;  %v3673_v29 = vmul.f32 %v10179_v56, %v10179_v56 }
 0x95f   : > { %v3691_v33 = vsel %vm600_vm0, %v3673_v29, 0.0  ;;  %v3672_v17 = vmul.f32 %v10181_v59, %v10181_v59 }
 0x960   : > { %3692 = vadd.xlane.f32.xlu0 %v3691_v33 }
 0x961   : > { %v3688_v53 = vsel %vm600_vm0, %v3672_v17, 0.0 }
 0x962   : > { %3689 = vadd.xlane.f32.xlu1 %v3688_v53 }
 0x967   : > { %v3651_v14 = vpop.xlane.xlu0 %3650 }
 0x968   : > { %v3659_v13 = vmul.f32 0.03125, %v3651_v14 }
 0x969   : > { %v3648_v21 = vpop.xlane.xlu1 %3647 }
 0x96a   : > { %v10189_v47 = vsub.f32 %v3623_v46, %v3659_v13  ;;  %v3658_v25 = vmul.f32 0.03125, %v3648_v21 }
 0x96c   : > { %v10191_v32 = vsub.f32 %v3618_v60, %v3658_v25  ;;  %v3675_v58 = vmul.f32 %v10189_v47, %v10189_v47 }
 0x96e   : > { %v3697_v4 = vsel %vm600_vm0, %v3675_v58, 0.0  ;;  %v3674_v23 = vmul.f32 %v10191_v32, %v10191_v32 }
 0x96f   : > { %3698 = vadd.xlane.f32.xlu0 %v3697_v4 }
 0x970   : > { %v3694_v1 = vsel %vm600_vm0, %v3674_v23, 0.0 }
 0x971   : > { %3695 = vadd.xlane.f32.xlu1 %v3694_v1 }
 0x9c5   : > { %v3681_v51 = vpop.xlane.xlu0 %3680 }
 0x9c6   : > { %v3701_v7 = vmul.f32 0.03125, %v3681_v51 }
 0x9c7   : > { %v3678_v61 = vpop.xlane.xlu1 %3677 }
 0x9c8   : > { %v3709_v30 = vadd.f32 1e-05, %v3701_v7  ;;  %v3700_v0 = vmul.f32 0.03125, %v3678_v61 }
 0x9ca   : > { %8687 = vrsqrt.f32 %v3709_v30  ;;  %v3708_v55 = vadd.f32 1e-05, %v3700_v0 }
 0x9cc   : > { %8689 = vrsqrt.f32 %v3708_v55 }
 0x9d7   : > { %v8688_v22 = vpop.eup %8687 }
 0x9d8   : > { %v3725_v18 = vmul.f32 %v8688_v22, %v3661_v31 }
 0x9d9   : > { %v8690_v63 = vpop.eup %8689 }
 0x9da   : > { %v3724_v6 = vmul.f32 %v8690_v63, %v3660_v12  ;;  %v3739_v38 = vmul.f32 %v7355_v35, %v3725_v18 }
 0x9db   : > { %v3687_v49 = vpop.xlane.xlu0 %3686 }
 0x9dc   : > { %v3738_v8 = vmul.f32 %v7355_v35, %v3724_v6  ;;  %v3703_v11 = vmul.f32 0.03125, %v3687_v49  ;;  %v10207_v19 = vadd.f32 %v7356_v10, %v3739_v38 }
 0x9dd   : > { %v3684_v9 = vpop.xlane.xlu1 %3683 }
 0x9de   : > { %v10205_v39 = vadd.f32 %v7356_v10, %v3738_v8  ;;  %11711 = vst [vmem:[#allocation11_spill] sm:$0xff] %v10207_v19  ;;  %v3711_v46 = vadd.f32 1e-05, %v3703_v11  ;;  %v3702_v16 = vmul.f32 0.03125, %v3684_v9 }
 0x9e0   : > { %11710 = vst [vmem:[#allocation10_spill] sm:$0xff] %v10205_v39  ;;  %8207 = vmatprep.mubr.msk.f32.mxu0 %vm600_vm0, %v10205_v39  ;;  %8691 = vrsqrt.f32 %v3711_v46  ;;  %v3710_v60 = vadd.f32 1e-05, %v3702_v16 }
 0x9e1   : > { %8208 = vmatmul.mubr.msk.f32.vlgmr.msra.gmra.mxu0 %vm600_vm0, %v10207_v19 }
 0x9e2   : > { %8693 = vrsqrt.f32 %v3710_v60 }
 0x9e9   : > { %v3693_v24 = vpop.xlane.xlu0 %3692 }
 0x9ea   : > { %v3705_v42 = vmul.f32 0.03125, %v3693_v24 }
 0x9eb   : > { %v3690_v45 = vpop.xlane.xlu1 %3689 }
 0x9ec   : > { %v3713_v36 = vadd.f32 1e-05, %v3705_v42  ;;  %v3704_v48 = vmul.f32 0.03125, %v3690_v45 }
 0x9ed   : > { %v8692_v31 = vpop.eup %8691 }
 0x9ee   : > { %8695 = vrsqrt.f32 %v3713_v36  ;;  %v3712_v43 = vadd.f32 1e-05, %v3704_v48  ;;  %v3727_v12 = vmul.f32 %v8692_v31, %v10169_v5 }
 0x9ef   : > { %v8694_v2 = vpop.eup %8693 }
 0x9f0   : > { %8697 = vrsqrt.f32 %v3712_v43  ;;  %v3726_v20 = vmul.f32 %v8694_v2, %v10171_v44  ;;  %v3741_v40 = vmul.f32 %v7355_v35, %v3727_v12 }
 0x9f2   : > { %v3740_v54 = vmul.f32 %v7355_v35, %v3726_v20  ;;  %v10217_v26 = vadd.f32 %v7356_v10, %v3741_v40 }
 0x9f4   : > { %v10215_v3 = vadd.f32 %v7356_v10, %v3740_v54  ;;  %11713 = vst [vmem:[#allocation13_spill] sm:$0xff] %v10217_v26 }
 0x9f6   : > { %11712 = vst [vmem:[#allocation12_spill] sm:$0xff] %v10215_v3  ;;  %8210 = vmatprep.mubr.msk.f32.mxu0 %vm600_vm0, %v10215_v3 }
 0x9f7   : > { %8211 = vmatmul.mubr.msk.f32.gmra.mxu0 %vm600_vm0, %v10217_v26 }
 0x9f8   : > { %v3699_v62 = vpop.xlane.xlu0 %3698 }
 0x9f9   : > { %v3707_v50 = vmul.f32 0.03125, %v3699_v62 }
 0x9fa   : > { %v3696_v28 = vpop.xlane.xlu1 %3695 }
 0x9fb   : > { %v8696_v5 = vpop.eup %8695  ;;  %v3715_v34 = vadd.f32 1e-05, %v3707_v50  ;;  %v3706_v27 = vmul.f32 0.03125, %v3696_v28 }
 0x9fc   : > { %v3729_v44 = vmul.f32 %v8696_v5, %v10179_v56 }
 0x9fd   : > { %v8698_v57 = vpop.eup %8697  ;;  %8699 = vrsqrt.f32 %v3715_v34  ;;  %v3714_v52 = vadd.f32 1e-05, %v3706_v27 }
 0x9fe   : > { %v3728_v41 = vmul.f32 %v8698_v57, %v10181_v59  ;;  %v3743_v37 = vmul.f32 %v7355_v35, %v3729_v44 }
 0x9ff   : > { %8701 = vrsqrt.f32 %v3714_v52 }
 0xa00   : > { %v3742_v15 = vmul.f32 %v7355_v35, %v3728_v41  ;;  %v10227_v33 = vadd.f32 %v7356_v10, %v3743_v37 }
 0xa02   : > { %v10225_v29 = vadd.f32 %v7356_v10, %v3742_v15  ;;  %11715 = vst [vmem:[#allocation2_spill] sm:$0xff] %v10227_v33 }
 0xa04   : > { %11714 = vst [vmem:[#allocation3_spill] sm:$0xff] %v10225_v29  ;;  %8213 = vmatprep.mubr.msk.f32.mxu0 %vm600_vm0, %v10225_v29 }
 0xa05   : > { %8214 = vmatmul.mubr.msk.f32.gmra.mxu0 %vm600_vm0, %v10227_v33 }
 0xa0a   : > { %v8700_v17 = vpop.eup %8699 }
 0xa0b   : > { %v3731_v56 = vmul.f32 %v8700_v17, %v10189_v47  ;;  %v8867_v47 = vld [vmem:[%s11638_s4] ss:$0 sm:$0xff] }
 0xa0c   : > { %v8702_v53 = vpop.eup %8701 }
 0xa0d   : > { %v3730_v14 = vmul.f32 %v8702_v53, %v10191_v32  ;;  %v3745_v59 = vmul.f32 %v7355_v35, %v3731_v56 }
 0xa0f   : > { %v3744_v13 = vmul.f32 %v7355_v35, %v3730_v14  ;;  %v10237_v25 = vadd.f32 %v7356_v10, %v3745_v59 }
 0xa11   : > { %v10235_v21 = vadd.f32 %v7356_v10, %v3744_v13  ;;  %11717 = vst [vmem:[#allocation5_spill] sm:$0xff] %v10237_v25 }
 0xa13   : > { %11716 = vst [vmem:[#allocation4_spill] sm:$0xff] %v10235_v21  ;;  %8216 = vmatprep.mubr.msk.f32.mxu0 %vm600_vm0, %v10235_v21 }
 0xa14   : > { %8217 = vmatmul.mubr.msk.f32.gmra.mxu0 %vm600_vm0, %v10237_v25 }
 0xaa1   : > { %v8209_v58 = vpop.f32.mrf.mxu0 }
 0xaa2   : > { %v10246_v4 = vadd.f32 %v8867_v47, %v8209_v58 }
 0xaa3   : > { %v3850_v32 = vpop.f32.mrf.mxu0 }
 0xaa4   : > { %v10248_v23 = vadd.f32 %v8867_v47, %v3850_v32  ;;  %3931 = vrot.lane.b32.xlu0 %v10246_v4, %s8900_s19  ;;  %8241 = vmatprep.mubr.msk.f32.mxu0 %vm794_vm1, %v10246_v4 }
 0xaa6   : > { %3929 = vrot.lane.b32.xlu1 %v10248_v23, %s8900_s19  ;;  %8227 = vmatprep.mubr.msk.f32.mxu1 %vm794_vm1, %v10248_v23 }
 0xaa8   : > { %3897 = vrot.lane.b32.xlu0 %v10248_v23, %s8901_s1 }
 0xaaa   : > { %3913 = vrot.lane.b32.xlu1 %v10248_v23, %s8899_s18 }
 0xaae   : > { %3915 = vrot.lane.b32.xlu1 %v10246_v4, %s8899_s18 }
 0xab2   : > { %3899 = vrot.lane.b32.xlu1 %v10246_v4, %s8901_s1 }
 0xab7   : > { %v8212_v1 = vpop.f32.mrf.mxu0 }
 0xab8   : > { %v10266_v51 = vadd.f32 %v8867_v47, %v8212_v1 }
 0xab9   : > { %v3860_v7 = vpop.f32.mrf.mxu0 }
 0xaba   : > { %v10268_v61 = vadd.f32 %v8867_v47, %v3860_v7  ;;  %3935 = vrot.lane.b32.xlu1 %v10266_v51, %s8900_s19 }
 0xabc   : > { %3933 = vrot.lane.b32.xlu0 %v10268_v61, %s8900_s19 }
 0xabe   : > { %3919 = vrot.lane.b32.xlu1 %v10266_v51, %s8899_s18 }
 0xac0   : > { %3917 = vrot.lane.b32.xlu0 %v10268_v61, %s8899_s18 }
 0xac2   : > { %3903 = vrot.lane.b32.xlu1 %v10266_v51, %s8901_s1 }
 0xac4   : > { %3901 = vrot.lane.b32.xlu0 %v10268_v61, %s8901_s1 }
 0xac5   : > { %v8215_v30 = vpop.f32.mrf.mxu0 }
 0xac6   : > { %v10282_v0 = vadd.f32 %v8867_v47, %v8215_v30 }
 0xac7   : > { %v3870_v55 = vpop.f32.mrf.mxu0 }
 0xac8   : > { %v10284_v22 = vadd.f32 %v8867_v47, %v3870_v55  ;;  %3939 = vrot.lane.b32.xlu1 %v10282_v0, %s8900_s19 }
 0xaca   : > { %3937 = vrot.lane.b32.xlu0 %v10284_v22, %s8900_s19 }
 0xacc   : > { %3923 = vrot.lane.b32.xlu1 %v10282_v0, %s8899_s18 }
 0xace   : > { %3921 = vrot.lane.b32.xlu0 %v10284_v22, %s8899_s18 }
 0xad0   : > { %3907 = vrot.lane.b32.xlu1 %v10282_v0, %s8901_s1 }
 0xad2   : > { %3905 = vrot.lane.b32.xlu0 %v10284_v22, %s8901_s1 }
 0xad4   : > { %v8218_v35 = vpop.f32.mrf.mxu0 }
 0xad5   : > { %v10298_v18 = vadd.f32 %v8867_v47, %v8218_v35 }
 0xad6   : > { %v3880_v63 = vpop.f32.mrf.mxu0 }
 0xad7   : > { %v10300_v6 = vadd.f32 %v8867_v47, %v3880_v63  ;;  %3943 = vrot.lane.b32.xlu1 %v10298_v18, %s8900_s19 }
 0xad9   : > { %3941 = vrot.lane.b32.xlu0 %v10300_v6, %s8900_s19 }
 0xadb   : > { %3927 = vrot.lane.b32.xlu1 %v10298_v18, %s8899_s18 }
 0xadd   : > { %3925 = vrot.lane.b32.xlu0 %v10300_v6, %s8899_s18  ;;  %s8907_s18 = smov 32  }
 0xadf   : > { %3911 = vrot.lane.b32.xlu1 %v10298_v18, %s8901_s1 }
 0xae1   : > { %3909 = vrot.lane.b32.xlu0 %v10300_v6, %s8901_s1 }
 0xb16   : > { %v10314_v38 = vpop.permute.xlu0 %3931 }
 0xb17   : > { %4060 = vrot.lane.b32.xlu1 %v10314_v38, %s8902_s20 }
 0xb18   : > { %v10318_v10 = vpop.permute.xlu1 %3929 }
 0xb19   : > { %3951 = vrot.lane.b32.xlu0 %v10318_v10, %s8902_s20 }
 0xb1a   : > { %v10326_v49 = vpop.permute.xlu0 %3897 }
 0xb1c   : > { %v10322_v8 = vpop.permute.xlu1 %3913 }
 0xb1d   : > { %3949 = vrot.lane.b32.xlu0 %v10322_v8, %s8902_s20 }
 0xb20   : > { %v10328_v11 = vpop.permute.xlu1 %3915 }
 0xb21   : > { %3947 = vrot.lane.b32.xlu0 %v10326_v49, %s8902_s20  ;;  %4058 = vrot.lane.b32.xlu1 %v10328_v11, %s8902_s20 }
 0xb24   : > { %v10334_v9 = vpop.permute.xlu1 %3899 }
 0xb25   : > { %3945 = vrot.lane.b32.xlu0 %v10248_v23, %s8902_s20  ;;  %4056 = vrot.lane.b32.xlu1 %v10334_v9, %s8902_s20 }
 0xb29   : > { %4054 = vrot.lane.b32.xlu1 %v10246_v4, %s8902_s20 }
 0xb2c   : > { %v10342_v46 = vpop.permute.xlu1 %3935 }
 0xb2d   : > { %4278 = vrot.lane.b32.xlu1 %v10342_v46, %s8902_s20 }
 0xb2e   : > { %v10346_v16 = vpop.permute.xlu0 %3933 }
 0xb2f   : > { %4169 = vrot.lane.b32.xlu0 %v10346_v16, %s8902_s20 }
 0xb30   : > { %v10350_v60 = vpop.permute.xlu1 %3919 }
 0xb31   : > { %4276 = vrot.lane.b32.xlu1 %v10350_v60, %s8902_s20 }
 0xb32   : > { %v10354_v24 = vpop.permute.xlu0 %3917 }
 0xb33   : > { %4167 = vrot.lane.b32.xlu0 %v10354_v24, %s8902_s20 }
 0xb34   : > { %v10358_v42 = vpop.permute.xlu1 %3903 }
 0xb35   : > { %4274 = vrot.lane.b32.xlu1 %v10358_v42, %s8902_s20 }
 0xb36   : > { %v10362_v45 = vpop.permute.xlu0 %3901 }
 0xb37   : > { %4165 = vrot.lane.b32.xlu0 %v10362_v45, %s8902_s20 }
 0xb39   : > { %4272 = vrot.lane.b32.xlu1 %v10266_v51, %s8902_s20 }
 0xb3a   : > { %v10368_v36 = vpop.permute.xlu1 %3939 }
 0xb3b   : > { %4163 = vrot.lane.b32.xlu0 %v10268_v61, %s8902_s20 }
 0xb3c   : > { %v10370_v48 = vpop.permute.xlu0 %3937 }
 0xb3d   : > { %4496 = vrot.lane.b32.xlu1 %v10368_v36, %s8902_s20 }
 0xb3e   : > { %v10376_v31 = vpop.permute.xlu1 %3923 }
 0xb3f   : > { %4387 = vrot.lane.b32.xlu0 %v10370_v48, %s8902_s20 }
 0xb40   : > { %v10380_v43 = vpop.permute.xlu0 %3921 }
 0xb41   : > { %4494 = vrot.lane.b32.xlu1 %v10376_v31, %s8902_s20 }
 0xb42   : > { %v10386_v12 = vpop.permute.xlu1 %3907 }
 0xb43   : > { %4385 = vrot.lane.b32.xlu0 %v10380_v43, %s8902_s20 }
 0xb44   : > { %v10390_v2 = vpop.permute.xlu0 %3905 }
 0xb45   : > { %4492 = vrot.lane.b32.xlu1 %v10386_v12, %s8902_s20 }
 0xb47   : > { %4383 = vrot.lane.b32.xlu0 %v10390_v2, %s8902_s20 }
 0xb49   : > { %v10394_v20 = vpop.permute.xlu1 %3943  ;;  %4490 = vrot.lane.b32.xlu1 %v10282_v0, %s8902_s20 }
 0xb4b   : > { %v10398_v40 = vpop.permute.xlu0 %3941  ;;  %4381 = vrot.lane.b32.xlu0 %v10284_v22, %s8902_s20 }
 0xb4d   : > { %4714 = vrot.lane.b32.xlu1 %v10394_v20, %s8902_s20  ;;  %v10404_v54 = vpop.permute.xlu1 %3927 }
 0xb4f   : > { %4605 = vrot.lane.b32.xlu0 %v10398_v40, %s8902_s20  ;;  %v10408_v62 = vpop.permute.xlu0 %3925 }
 0xb51   : > { %4712 = vrot.lane.b32.xlu1 %v10404_v54, %s8902_s20  ;;  %v10414_v50 = vpop.permute.xlu1 %3911 }
 0xb53   : > { %4603 = vrot.lane.b32.xlu0 %v10408_v62, %s8902_s20  ;;  %v10418_v28 = vpop.permute.xlu0 %3909 }
 0xb55   : > { %4710 = vrot.lane.b32.xlu1 %v10414_v50, %s8902_s20 }
 0xb57   : > { %4601 = vrot.lane.b32.xlu0 %v10418_v28, %s8902_s20 }
 0xb59   : > { %4708 = vrot.lane.b32.xlu1 %v10298_v18, %s8902_s20 }
 0xb5b   : > { %4599 = vrot.lane.b32.xlu0 %v10300_v6, %s8902_s20 }
 0xb5d   : > { %5348 = vrot.lane.b32.xlu1 %v10314_v38, %s8903_s21 }
 0xb5f   : > { %5239 = vrot.lane.b32.xlu0 %v10318_v10, %s8903_s21 }
 0xb61   : > { %5344 = vrot.lane.b32.xlu1 %v10334_v9, %s8903_s21 }
 0xb63   : > { %5237 = vrot.lane.b32.xlu0 %v10322_v8, %s8903_s21 }
 0xb65   : > { %5566 = vrot.lane.b32.xlu1 %v10342_v46, %s8903_s21 }
 0xb67   : > { %5346 = vrot.lane.b32.xlu0 %v10328_v11, %s8903_s21 }
 0xb69   : > { %5564 = vrot.lane.b32.xlu1 %v10350_v60, %s8903_s21 }
 0xb6b   : > { %5235 = vrot.lane.b32.xlu0 %v10326_v49, %s8903_s21 }
 0xb6d   : > { %5562 = vrot.lane.b32.xlu1 %v10358_v42, %s8903_s21 }
 0xb6f   : > { %5233 = vrot.lane.b32.xlu0 %v10248_v23, %s8903_s21 }
 0xb71   : > { %5560 = vrot.lane.b32.xlu1 %v10266_v51, %s8903_s21 }
 0xb73   : > { %5342 = vrot.lane.b32.xlu0 %v10246_v4, %s8903_s21 }
 0xb75   : > { %5784 = vrot.lane.b32.xlu1 %v10368_v36, %s8903_s21 }
 0xb77   : > { %5457 = vrot.lane.b32.xlu0 %v10346_v16, %s8903_s21 }
 0xb79   : > { %5782 = vrot.lane.b32.xlu1 %v10376_v31, %s8903_s21 }
 0xb7b   : > { %5455 = vrot.lane.b32.xlu0 %v10354_v24, %s8903_s21 }
 0xb7d   : > { %5780 = vrot.lane.b32.xlu1 %v10386_v12, %s8903_s21 }
 0xb7f   : > { %5453 = vrot.lane.b32.xlu0 %v10362_v45, %s8903_s21 }
 0xb81   : > { %5778 = vrot.lane.b32.xlu1 %v10282_v0, %s8903_s21 }
 0xb83   : > { %5451 = vrot.lane.b32.xlu0 %v10268_v61, %s8903_s21 }
 0xb85   : > { %6002 = vrot.lane.b32.xlu1 %v10394_v20, %s8903_s21 }
 0xb87   : > { %5675 = vrot.lane.b32.xlu0 %v10370_v48, %s8903_s21 }
 0xb89   : > { %v4061_v5 = vpop.permute.xlu1 %4060  ;;  %6000 = vrot.lane.b32.xlu1 %v10404_v54, %s8903_s21 }
 0xb8a   : > { %8233 = vmatprep.subr.msk.mxu0 %vm794_vm1, %v4061_v5 }
 0xb8b   : > { %v3952_v34 = vpop.permute.xlu0 %3951  ;;  %8234 = vmatpush3.xpose.msk.msra.mxu0 %vm794_vm1, %v4061_v5  ;;  %5673 = vrot.lane.b32.xlu0 %v10380_v43, %s8903_s21 }
 0xb8c   : > { %8219 = vmatprep.subr.msk.mxu1 %vm794_vm1, %v3952_v34 }
 0xb8d   : > { %8220 = vmatpush3.xpose.msk.msra.mxu1 %vm794_vm1, %v3952_v34 }
 0xb8f   : > { %v3950_v27 = vpop.permute.xlu0 %3949  ;;  %5671 = vrot.lane.b32.xlu0 %v10390_v2, %s8903_s21 }
 0xb90   : > { %8221 = vmatprep.subr.msk.mxu1 %vm794_vm1, %v3950_v27 }
 0xb91   : > { %8222 = vmatpush3.xpose.msk.msra.mxu1 %vm794_vm1, %v3950_v27 }
 0xb93   : > { %v3948_v44 = vpop.permute.xlu0 %3947  ;;  %v4059_v57 = vpop.permute.xlu1 %4058  ;;  %5669 = vrot.lane.b32.xlu0 %v10284_v22, %s8903_s21 }
 0xb94   : > { %8223 = vmatprep.subr.msk.mxu1 %vm794_vm1, %v3948_v44  ;;  %8235 = vmatprep.subr.msk.mxu0 %vm794_vm1, %v4059_v57 }
 0xb95   : > { %8224 = vmatpush3.xpose.msk.msra.mxu1 %vm794_vm1, %v3948_v44  ;;  %8236 = vmatpush3.xpose.msk.msra.mxu0 %vm794_vm1, %v4059_v57 }
 0xb97   : > { %v3946_v52 = vpop.permute.xlu0 %3945  ;;  %v4057_v41 = vpop.permute.xlu1 %4056  ;;  %5893 = vrot.lane.b32.xlu0 %v10398_v40, %s8903_s21 }
 0xb98   : > { %8225 = vmatprep.subr.msk.mxu1 %vm794_vm1, %v3946_v52  ;;  %8237 = vmatprep.subr.msk.mxu0 %vm794_vm1, %v4057_v41 }
 0xb99   : > { %8226 = vmatpush3.xpose.msk.msra.mxu1 %vm794_vm1, %v3946_v52  ;;  %8238 = vmatpush3.xpose.msk.msra.mxu0 %vm794_vm1, %v4057_v41  ;;  %v10628_v52 = vld [vmem:[%s11636_s2] sm:$0xff] }
 0xb9b   : > { %v4055_v37 = vpop.permute.xlu1 %4054  ;;  %5891 = vrot.lane.b32.xlu0 %v10408_v62, %s8903_s21 }
 0xb9c   : > { %8228 = vmatmul.mubr.msk.f32.vlgmr.msra.gmra.mxu1 %vm794_vm1, %v10326_v49  ;;  %8239 = vmatprep.subr.msk.mxu0 %vm794_vm1, %v4055_v37 }
 0xb9d   : > { %8230 = vmatprep.mubr.msk.f32.mxu1 %vm794_vm1, %v10322_v8  ;;  %8240 = vmatpush3.xpose.msk.msra.mxu0 %vm794_vm1, %v4055_v37 }
 0xb9f   : > { %v4279_v15 = vpop.permute.xlu1 %4278 }
 0xba0   : > { %8231 = vmatmul.mubr.msk.f32.gmra.mxu1 %vm794_vm1, %v10318_v10  ;;  %8242 = vmatmul.mubr.msk.f32.vlgmr.msra.gmra.mxu0 %vm794_vm1, %v10334_v9 }
 0xba1   : > { %8255 = vmatprep.mubr.msk.f32.mxu1 %vm794_vm1, %v10268_v61  ;;  %8244 = vmatprep.mubr.msk.f32.mxu0 %vm794_vm1, %v10328_v11  ;;  %v4170_v17 = vpop.permute.xlu0 %4169 }
 0xba2   : > { %8261 = vmatprep.subr.msk.mxu0 %vm794_vm1, %v4279_v15  ;;  %8247 = vmatprep.subr.msk.mxu1 %vm794_vm1, %v4170_v17 }
 0xba3   : > { %8262 = vmatpush3.xpose.msk.msra.mxu0 %vm794_vm1, %v4279_v15  ;;  %8248 = vmatpush3.xpose.msk.msra.mxu1 %vm794_vm1, %v4170_v17  ;;  %v4277_v56 = vpop.permute.xlu1 %4276 }
 0xba4   : > { %8245 = vmatmul.mubr.msk.f32.gmra.mxu0 %vm794_vm1, %v10314_v38  ;;  %8263 = vmatprep.subr.msk.mxu0 %vm794_vm1, %v4277_v56 }
 0xba5   : > { %8269 = vmatprep.mubr.msk.f32.mxu0 %vm794_vm1, %v10266_v51  ;;  %v4168_v53 = vpop.permute.xlu0 %4167 }
 0xba6   : > { %8249 = vmatprep.subr.msk.mxu1 %vm794_vm1, %v4168_v53 }
 0xba7   : > { %8264 = vmatpush3.xpose.msk.msra.mxu0 %vm794_vm1, %v4277_v56  ;;  %8250 = vmatpush3.xpose.msk.msra.mxu1 %vm794_vm1, %v4168_v53  ;;  %v4275_v14 = vpop.permute.xlu1 %4274 }
 0xba8   : > { %8265 = vmatprep.subr.msk.mxu0 %vm794_vm1, %v4275_v14 }
 0xba9   : > { %v4166_v59 = vpop.permute.xlu0 %4165 }
 0xbaa   : > { %8251 = vmatprep.subr.msk.mxu1 %vm794_vm1, %v4166_v59 }
 0xbab   : > { %8266 = vmatpush3.xpose.msk.msra.mxu0 %vm794_vm1, %v4275_v14  ;;  %8252 = vmatpush3.xpose.msk.msra.mxu1 %vm794_vm1, %v4166_v59  ;;  %v4273_v13 = vpop.permute.xlu1 %4272  ;;  %v10641_v59 = vld [vmem:[%s11636_s2 + $0x10] sm:$0xff] }
 0xbac   : > { %8267 = vmatprep.subr.msk.mxu0 %vm794_vm1, %v4273_v13 }
 0xbad   : > { %v4164_v58 = vpop.permute.xlu0 %4163 }
 0xbae   : > { %8253 = vmatprep.subr.msk.mxu1 %vm794_vm1, %v4164_v58 }
 0xbaf   : > { %8268 = vmatpush3.xpose.msk.msra.mxu0 %vm794_vm1, %v4273_v13  ;;  %8254 = vmatpush3.xpose.msk.msra.mxu1 %vm794_vm1, %v4164_v58  ;;  %v4497_v47 = vpop.permute.xlu1 %4496 }
 0xbb0   : > { %8289 = vmatprep.subr.msk.mxu0 %vm794_vm1, %v4497_v47 }
 0xbb1   : > { %v4388_v4 = vpop.permute.xlu0 %4387 }
 0xbb2   : > { %8270 = vmatmul.mubr.msk.f32.vlgmr.msra.gmra.mxu0 %vm794_vm1, %v10358_v42  ;;  %8256 = vmatmul.mubr.msk.f32.vlgmr.msra.gmra.mxu1 %vm794_vm1, %v10362_v45 }
 0xbb3   : > { %8272 = vmatprep.mubr.msk.f32.mxu0 %vm794_vm1, %v10350_v60  ;;  %8290 = vmatpush3.xpose.msk.msra.mxu0 %vm794_vm1, %v4497_v47  ;;  %v4495_v32 = vpop.permute.xlu1 %4494 }
 0xbb4   : > { %8275 = vmatprep.subr.msk.mxu1 %vm794_vm1, %v4388_v4  ;;  %8258 = vmatprep.mubr.msk.f32.mxu1 %vm794_vm1, %v10354_v24 }
 0xbb5   : > { %8276 = vmatpush3.xpose.msk.msra.mxu1 %vm794_vm1, %v4388_v4  ;;  %8291 = vmatprep.subr.msk.mxu0 %vm794_vm1, %v4495_v32  ;;  %v4386_v23 = vpop.permute.xlu0 %4385 }
 0xbb6   : > { %8273 = vmatmul.mubr.msk.f32.gmra.mxu0 %vm794_vm1, %v10342_v46  ;;  %8259 = vmatmul.mubr.msk.f32.gmra.mxu1 %vm794_vm1, %v10346_v16 }
 0xbb7   : > { %8292 = vmatpush3.xpose.msk.msra.mxu0 %vm794_vm1, %v4495_v32  ;;  %8297 = vmatprep.mubr.msk.f32.mxu0 %vm794_vm1, %v10282_v0  ;;  %v4493_v1 = vpop.permute.xlu1 %4492 }
 0xbb8   : > { %8277 = vmatprep.subr.msk.mxu1 %vm794_vm1, %v4386_v23  ;;  %8283 = vmatprep.mubr.msk.f32.mxu1 %vm794_vm1, %v10284_v22 }
 0xbb9   : > { %8278 = vmatpush3.xpose.msk.msra.mxu1 %vm794_vm1, %v4386_v23  ;;  %8293 = vmatprep.subr.msk.mxu0 %vm794_vm1, %v4493_v1  ;;  %v4384_v51 = vpop.permute.xlu0 %4383  ;;  %v10656_v23 = vld [vmem:[%s11636_s2 + $0x18] sm:$0xff] }
 0xbba   : > { %8279 = vmatprep.subr.msk.mxu1 %vm794_vm1, %v4384_v51 }
 0xbbb   : > { %8294 = vmatpush3.xpose.msk.msra.mxu0 %vm794_vm1, %v4493_v1  ;;  %v4491_v7 = vpop.permute.xlu1 %4490 }
 0xbbc   : > { %8295 = vmatprep.subr.msk.mxu0 %vm794_vm1, %v4491_v7 }
 0xbbd   : > { %8280 = vmatpush3.xpose.msk.msra.mxu1 %vm794_vm1, %v4384_v51  ;;  %v4382_v61 = vpop.permute.xlu0 %4381 }
 0xbbe   : > { %8281 = vmatprep.subr.msk.mxu1 %vm794_vm1, %v4382_v61 }
 0xbbf   : > { %8296 = vmatpush3.xpose.msk.msra.mxu0 %vm794_vm1, %v4491_v7  ;;  %v4715_v30 = vpop.permute.xlu1 %4714 }
 0xbc0   : > { %8317 = vmatprep.subr.msk.mxu0 %vm794_vm1, %v4715_v30 }
 0xbc1   : > { %8282 = vmatpush3.xpose.msk.msra.mxu1 %vm794_vm1, %v4382_v61  ;;  %v4606_v0 = vpop.permute.xlu0 %4605 }
 0xbc2   : > { %8298 = vmatmul.mubr.msk.f32.vlgmr.msra.gmra.mxu0 %vm794_vm1, %v10386_v12  ;;  %8303 = vmatprep.subr.msk.mxu1 %vm794_vm1, %v4606_v0 }
 0xbc3   : > { %8300 = vmatprep.mubr.msk.f32.mxu0 %vm794_vm1, %v10376_v31  ;;  %8318 = vmatpush3.xpose.msk.msra.mxu0 %vm794_vm1, %v4715_v30  ;;  %v4713_v55 = vpop.permute.xlu1 %4712 }
 0xbc4   : > { %8284 = vmatmul.mubr.msk.f32.vlgmr.msra.gmra.mxu1 %vm794_vm1, %v10390_v2  ;;  %8319 = vmatprep.subr.msk.mxu0 %vm794_vm1, %v4713_v55 }
 0xbc5   : > { %8286 = vmatprep.mubr.msk.f32.mxu1 %vm794_vm1, %v10380_v43  ;;  %8304 = vmatpush3.xpose.msk.msra.mxu1 %vm794_vm1, %v4606_v0  ;;  %v4604_v22 = vpop.permute.xlu0 %4603  ;;  %v10615_v43 = vld [vmem:[%s11636_s2 + $0x8] sm:$0xff] }
 0xbc6   : > { %8301 = vmatmul.mubr.msk.f32.gmra.mxu0 %vm794_vm1, %v10368_v36  ;;  %8305 = vmatprep.subr.msk.mxu1 %vm794_vm1, %v4604_v22 }
 0xbc7   : > { %8320 = vmatpush3.xpose.msk.msra.mxu0 %vm794_vm1, %v4713_v55  ;;  %8325 = vmatprep.mubr.msk.f32.mxu0 %vm794_vm1, %v10298_v18  ;;  %v4711_v35 = vpop.permute.xlu1 %4710 }
 0xbc8   : > { %8287 = vmatmul.mubr.msk.f32.gmra.mxu1 %vm794_vm1, %v10370_v48  ;;  %8321 = vmatprep.subr.msk.mxu0 %vm794_vm1, %v4711_v35 }
 0xbc9   : > { %8306 = vmatpush3.xpose.msk.msra.mxu1 %vm794_vm1, %v4604_v22  ;;  %8311 = vmatprep.mubr.msk.f32.mxu1 %vm794_vm1, %v10300_v6  ;;  %v4602_v63 = vpop.permute.xlu0 %4601 }
 0xbca   : > { %8307 = vmatprep.subr.msk.mxu1 %vm794_vm1, %v4602_v63 }
 0xbcb   : > { %8322 = vmatpush3.xpose.msk.msra.mxu0 %vm794_vm1, %v4711_v35  ;;  %v4709_v38 = vpop.permute.xlu1 %4708 }
 0xbcc   : > { %8323 = vmatprep.subr.msk.mxu0 %vm794_vm1, %v4709_v38 }
 0xbcd   : > { %8308 = vmatpush3.xpose.msk.msra.mxu1 %vm794_vm1, %v4602_v63  ;;  %v4600_v10 = vpop.permute.xlu0 %4599 }
 0xbce   : > { %8309 = vmatprep.subr.msk.mxu1 %vm794_vm1, %v4600_v10 }
 0xbcf   : > { %8324 = vmatpush3.xpose.msk.msra.mxu0 %vm794_vm1, %v4709_v38  ;;  %v5349_v8 = vpop.permute.xlu1 %5348 }
 0xbd0   : > { %8345 = vmatprep.subr.mxu0 %v5349_v8 }
 0xbd1   : > { %8310 = vmatpush3.xpose.msk.msra.mxu1 %vm794_vm1, %v4600_v10  ;;  %v5240_v49 = vpop.permute.xlu0 %5239 }
 0xbd2   : > { %8326 = vmatmul.mubr.msk.f32.vlgmr.msra.gmra.mxu0 %vm794_vm1, %v10414_v50  ;;  %8331 = vmatprep.subr.mxu1 %v5240_v49 }
 0xbd3   : > { %8328 = vmatprep.mubr.msk.f32.mxu0 %vm794_vm1, %v10404_v54  ;;  %8346 = vmatpush3.msra.mxu0 %v5349_v8  ;;  %v5345_v46 = vpop.permute.xlu1 %5344 }
 0xbd4   : > { %8312 = vmatmul.mubr.msk.f32.vlgmr.msra.gmra.mxu1 %vm794_vm1, %v10418_v28 }
 0xbd5   : > { %8314 = vmatprep.mubr.msk.f32.mxu1 %vm794_vm1, %v10408_v62  ;;  %8332 = vmatpush3.msra.mxu1 %v5240_v49  ;;  %v5238_v11 = vpop.permute.xlu0 %5237 }
 0xbd6   : > { %8329 = vmatmul.mubr.msk.f32.gmra.mxu0 %vm794_vm1, %v10394_v20  ;;  %8333 = vmatprep.subr.mxu1 %v5238_v11 }
 0xbd7   : > { %8334 = vmatpush3.msra.mxu1 %v5238_v11  ;;  %v10606_v42 = vpop.permute.xlu1 %5566 }
 0xbd8   : > { %8315 = vmatmul.mubr.msk.f32.gmra.mxu1 %vm794_vm1, %v10398_v40 }
 0xbd9   : > { %v5347_v9 = vpop.permute.xlu0 %5346 }
 0xbda   : > { %8347 = vmatprep.subr.mxu0 %v5347_v9 }
 0xbdb   : > { %8348 = vmatpush3.msra.mxu0 %v5347_v9 }
 0xbdc   : > { %8349 = vmatprep.subr.mxu0 %v5345_v46 }
 0xbdd   : > { %v5236_v16 = vpop.permute.xlu0 %5235  ;;  %8350 = vmatpush3.msra.mxu0 %v5345_v46 }
 0xbde   : > { %8335 = vmatprep.subr.mxu1 %v5236_v16 }
 0xbdf   : > { %8336 = vmatpush3.msra.mxu1 %v5236_v16 }
 0xbe1   : > { %v5234_v60 = vpop.permute.xlu0 %5233 }
 0xbe2   : > { %8337 = vmatprep.subr.mxu1 %v5234_v60 }
 0xbe3   : > { %8338 = vmatpush3.msra.mxu1 %v5234_v60 }
 0xbe5   : > { %v5343_v24 = vpop.permute.xlu0 %5342 }
 0xbe6   : > { %8351 = vmatprep.subr.mxu0 %v5343_v24 }
 0xbe7   : > { %8352 = vmatpush3.msra.mxu0 %v5343_v24 }
 0xbe8   : > { %8373 = vmatprep.subr.mxu0 %v10606_v42 }
 0xbe9   : > { %v10609_v45 = vpop.permute.xlu0 %5457 }
 0xbea   : > { %8359 = vmatprep.subr.mxu1 %v10609_v45 }
 0xc5c   : > { %v8229_v36 = vpop.f32.mrf.mxu1 }
 0xc5d   : > { %v4818_v48 = vmul.f32 0.35355338, %v8229_v36 }
 0xc5e   : > { %v4035_v31 = vpop.f32.mrf.mxu1 }
 0xc5f   : > { %v10618_v12 = vadd.f32 %v10615_v43, %v4818_v48  ;;  %v4817_v57 = vmul.f32 0.35355338, %v4035_v31 }
 0xc60   : > { %v8232_v2 = vpop.f32.mrf.mxu1  ;;  %v8243_v20 = vpop.f32.mrf.mxu0 }
 0xc61   : > { %v4884_v40 = vsel %vm600_vm0, %v10618_v12, -inf  ;;  %v4822_v54 = vmul.f32 0.35355338, %v8243_v20  ;;  %v10636_v53 = vadd.f32 %v10628_v52, %v4817_v57  ;;  %v4820_v32 = vmul.f32 0.35355338, %v8232_v2 }
 0xc62   : > { %4885 = vmax.xlane.f32.xlu1 %v4884_v40  ;;  %v4144_v62 = vpop.f32.mrf.mxu0  ;;  %v4045_v27 = vpop.f32.mrf.mxu1 }
 0xc63   : > { %v10623_v5 = vadd.f32 %v10615_v43, %v4822_v54  ;;  %v4821_v34 = vmul.f32 0.35355338, %v4144_v62  ;;  %v4819_v17 = vmul.f32 0.35355338, %v4045_v27  ;;  %v4881_v51 = vsel %vm600_vm0, %v10636_v53, -inf }
 0xc64   : > { %v8246_v44 = vpop.f32.mrf.mxu0  ;;  %v10666_v61 = vadd.f32 %v10656_v23, %v4820_v32 }
 0xc65   : > { %v10631_v41 = vadd.f32 %v10628_v52, %v4821_v34  ;;  %v4896_v37 = vsel %vm600_vm0, %v10623_v5, -inf  ;;  %v4824_v14 = vmul.f32 0.35355338, %v8246_v44  ;;  %v10649_v47 = vadd.f32 %v10641_v59, %v4819_v17 }
 0xc66   : > { %4897 = vmax.xlane.f32.xlu0 %v4896_v37  ;;  %v4154_v15 = vpop.f32.mrf.mxu0  ;;  %v4890_v11 = vsel %vm600_vm0, %v10666_v61, -inf }
 0xc67   : > { %v4823_v56 = vmul.f32 0.35355338, %v4154_v15  ;;  %v4893_v58 = vsel %vm600_vm0, %v10631_v41, -inf  ;;  %v10659_v1 = vadd.f32 %v10656_v23, %v4824_v14  ;;  %v4887_v7 = vsel %vm600_vm0, %v10649_v47, -inf }
 0xc69   : > { %v10644_v13 = vadd.f32 %v10641_v59, %v4823_v56  ;;  %v4902_v0 = vsel %vm600_vm0, %v10659_v1, -inf }
 0xc6a   : > { %4894 = vmax.xlane.f32.xlu0 %v4893_v58 }
 0xc6b   : > { %v4899_v4 = vsel %vm600_vm0, %v10644_v13, -inf }
 0xc6c   : > { %4900 = vmax.xlane.f32.xlu1 %v4899_v4 }
 0xc6e   : > { %4882 = vmax.xlane.f32.xlu0 %v4881_v51 }
 0xc70   : > { %4888 = vmax.xlane.f32.xlu1 %v4887_v7 }
 0xc72   : > { %v8271_v30 = vpop.f32.mrf.mxu0  ;;  %4903 = vmax.xlane.f32.xlu0 %v4902_v0  ;;  %v8257_v22 = vpop.f32.mrf.mxu1 }
 0xc73   : > { %v4830_v55 = vmul.f32 0.35355338, %v8271_v30  ;;  %v4826_v63 = vmul.f32 0.35355338, %v8257_v22 }
 0xc74   : > { %v4362_v35 = vpop.f32.mrf.mxu0  ;;  %v4253_v8 = vpop.f32.mrf.mxu1 }
 0xc75   : > { %v4829_v38 = vmul.f32 0.35355338, %v4362_v35  ;;  %v10671_v10 = vadd.f32 %v10615_v43, %v4830_v55  ;;  %v4825_v46 = vmul.f32 0.35355338, %v4253_v8  ;;  %v10679_v24 = vadd.f32 %v10615_v43, %v4826_v63 }
 0xc76   : > { %v8274_v49 = vpop.f32.mrf.mxu0  ;;  %4891 = vmax.xlane.f32.xlu0 %v4890_v11  ;;  %v8260_v16 = vpop.f32.mrf.mxu1 }
 0xc77   : > { %v10676_v9 = vadd.f32 %v10628_v52, %v4829_v38  ;;  %v4832_v36 = vmul.f32 0.35355338, %v8274_v49  ;;  %v10682_v48 = vadd.f32 %v10628_v52, %v4825_v46  ;;  %v4920_v20 = vsel %vm600_vm0, %v10671_v10, -inf }
 0xc78   : > { %v4372_v60 = vpop.f32.mrf.mxu0  ;;  %v4263_v40 = vpop.f32.mrf.mxu1  ;;  %v4828_v62 = vmul.f32 0.35355338, %v8260_v16  ;;  %v4908_v57 = vsel %vm600_vm0, %v10679_v24, -inf }
 0xc79   : > { %v4831_v31 = vmul.f32 0.35355338, %v4372_v60  ;;  %v4917_v2 = vsel %vm600_vm0, %v10676_v9, -inf  ;;  %v10689_v54 = vadd.f32 %v10656_v23, %v4832_v36  ;;  %v4827_v27 = vmul.f32 0.35355338, %v4263_v40 }
 0xc7a   : > { %4918 = vmax.xlane.f32.xlu1 %v4917_v2  ;;  %4921 = vmax.xlane.f32.xlu0 %v4920_v20  ;;  %v4905_v44 = vsel %vm600_vm0, %v10682_v48, -inf  ;;  %v10699_v37 = vadd.f32 %v10656_v23, %v4828_v62 }
 0xc7b   : > { %v10692_v34 = vadd.f32 %v10641_v59, %v4831_v31  ;;  %v10702_v15 = vadd.f32 %v10641_v59, %v4827_v27  ;;  %v4926_v14 = vsel %vm600_vm0, %v10689_v54, -inf }
 0xc7c   : > { %v4914_v35 = vsel %vm600_vm0, %v10699_v37, -inf }
 0xc7d   : > { %v4923_v17 = vsel %vm600_vm0, %v10692_v34, -inf  ;;  %v4911_v55 = vsel %vm600_vm0, %v10702_v15, -inf }
 0xc7e   : > { %4906 = vmax.xlane.f32.xlu1 %v4905_v44  ;;  %4909 = vmax.xlane.f32.xlu0 %v4908_v57 }
 0xc82   : > { %v8299_v56 = vpop.f32.mrf.mxu0  ;;  %4924 = vmax.xlane.f32.xlu1 %v4923_v17  ;;  %4927 = vmax.xlane.f32.xlu0 %v4926_v14 }
 0xc83   : > { %v4838_v58 = vmul.f32 0.35355338, %v8299_v56 }
 0xc84   : > { %v8285_v4 = vpop.f32.mrf.mxu1  ;;  %v4580_v32 = vpop.f32.mrf.mxu0 }
 0xc85   : > { %v4834_v51 = vmul.f32 0.35355338, %v8285_v4  ;;  %v4837_v7 = vmul.f32 0.35355338, %v4580_v32  ;;  %v10709_v30 = vadd.f32 %v10615_v43, %v4838_v58 }
 0xc86   : > { %v4471_v0 = vpop.f32.mrf.mxu1  ;;  %v8302_v22 = vpop.f32.mrf.mxu0  ;;  %4912 = vmax.xlane.f32.xlu1 %v4911_v55  ;;  %4915 = vmax.xlane.f32.xlu0 %v4914_v35 }
 0xc87   : > { %v10716_v63 = vadd.f32 %v10628_v52, %v4837_v7  ;;  %v4833_v38 = vmul.f32 0.35355338, %v4471_v0  ;;  %v10719_v11 = vadd.f32 %v10615_v43, %v4834_v51  ;;  %v4840_v46 = vmul.f32 0.35355338, %v8302_v22 }
 0xc88   : > { %v8288_v8 = vpop.f32.mrf.mxu1  ;;  %v4590_v49 = vpop.f32.mrf.mxu0  ;;  %v4944_v31 = vsel %vm600_vm0, %v10709_v30, -inf }
 0xc89   : > { %v10722_v16 = vadd.f32 %v10628_v52, %v4833_v38  ;;  %v4839_v60 = vmul.f32 0.35355338, %v4590_v49  ;;  %v4941_v36 = vsel %vm600_vm0, %v10716_v63, -inf  ;;  %v10729_v20 = vadd.f32 %v10656_v23, %v4840_v46 }
 0xc8a   : > { %v4481_v2 = vpop.f32.mrf.mxu1  ;;  %4942 = vmax.xlane.f32.xlu1 %v4941_v36  ;;  %4945 = vmax.xlane.f32.xlu0 %v4944_v31  ;;  %v4836_v40 = vmul.f32 0.35355338, %v8288_v8  ;;  %v4932_v57 = vsel %vm600_vm0, %v10719_v11, -inf }
 0xc8b   : > { %v10732_v62 = vadd.f32 %v10641_v59, %v4839_v60  ;;  %v4835_v27 = vmul.f32 0.35355338, %v4481_v2  ;;  %v4929_v44 = vsel %vm600_vm0, %v10722_v16, -inf  ;;  %v4950_v4 = vsel %vm600_vm0, %v10729_v20, -inf }
 0xc8c   : > { %v10739_v17 = vadd.f32 %v10656_v23, %v4836_v40 }
 0xc8d   : > { %v10742_v56 = vadd.f32 %v10641_v59, %v4835_v27  ;;  %v4947_v14 = vsel %vm600_vm0, %v10732_v62, -inf }
 0xc8e   : > { %4930 = vmax.xlane.f32.xlu1 %v4929_v44  ;;  %4933 = vmax.xlane.f32.xlu0 %v4932_v57  ;;  %v4938_v49 = vsel %vm600_vm0, %v10739_v17, -inf }
 0xc8f   : > { %v4935_v38 = vsel %vm600_vm0, %v10742_v56, -inf }
 0xc92   : > { %v8327_v58 = vpop.f32.mrf.mxu0  ;;  %4948 = vmax.xlane.f32.xlu1 %v4947_v14  ;;  %4951 = vmax.xlane.f32.xlu0 %v4950_v4 }
 0xc93   : > { %v4846_v32 = vmul.f32 0.35355338, %v8327_v58 }
 0xc94   : > { %v8313_v51 = vpop.f32.mrf.mxu1  ;;  %v4798_v7 = vpop.f32.mrf.mxu0 }
 0xc95   : > { %v4842_v0 = vmul.f32 0.35355338, %v8313_v51  ;;  %v4845_v55 = vmul.f32 0.35355338, %v4798_v7  ;;  %v10749_v22 = vadd.f32 %v10615_v43, %v4846_v32 }
 0xc96   : > { %v4689_v35 = vpop.f32.mrf.mxu1  ;;  %v8330_v8 = vpop.f32.mrf.mxu0  ;;  %4936 = vmax.xlane.f32.xlu1 %v4935_v38  ;;  %4939 = vmax.xlane.f32.xlu0 %v4938_v49 }
 0xc97   : > { %v10756_v46 = vadd.f32 %v10628_v52, %v4845_v55  ;;  %v4841_v60 = vmul.f32 0.35355338, %v4689_v35  ;;  %v10759_v2 = vadd.f32 %v10615_v43, %v4842_v0  ;;  %v4848_v40 = vmul.f32 0.35355338, %v8330_v8 }
 0xc98   : > { %v8316_v36 = vpop.f32.mrf.mxu1  ;;  %v4808_v31 = vpop.f32.mrf.mxu0  ;;  %v4968_v14 = vsel %vm600_vm0, %v10749_v22, -inf }
 0xc99   : > { %v10762_v27 = vadd.f32 %v10628_v52, %v4841_v60  ;;  %v4847_v44 = vmul.f32 0.35355338, %v4808_v31  ;;  %v4965_v57 = vsel %vm600_vm0, %v10756_v46, -inf  ;;  %v10769_v4 = vadd.f32 %v10656_v23, %v4848_v40 }
 0xc9a   : > { %v4699_v58 = vpop.f32.mrf.mxu1  ;;  %4966 = vmax.xlane.f32.xlu1 %v4965_v57  ;;  %4969 = vmax.xlane.f32.xlu0 %v4968_v14  ;;  %v4844_v32 = vmul.f32 0.35355338, %v8316_v36  ;;  %v4956_v7 = vsel %vm600_vm0, %v10759_v2, -inf }
 0xc9b   : > { %v10772_v43 = vadd.f32 %v10641_v59, %v4847_v44  ;;  %v4843_v51 = vmul.f32 0.35355338, %v4699_v58  ;;  %v4953_v52 = vsel %vm600_vm0, %v10762_v27, -inf  ;;  %v4974_v38 = vsel %vm600_vm0, %v10769_v4, -inf }
 0xc9c   : > { %v10779_v0 = vadd.f32 %v10656_v23, %v4844_v32  ;;  %v10792_v23 = vpop.permute.xlu1 %5564 }
 0xc9d   : > { %v10782_v55 = vadd.f32 %v10641_v59, %v4843_v51  ;;  %v4971_v35 = vsel %vm600_vm0, %v10772_v43, -inf  ;;  %v10796_v59 = vpop.permute.xlu0 %5455 }
 0xc9e   : > { %4954 = vmax.xlane.f32.xlu1 %v4953_v52  ;;  %4957 = vmax.xlane.f32.xlu0 %v4956_v7  ;;  %v4962_v49 = vsel %vm600_vm0, %v10779_v0, -inf }
 0xc9f   : > { %v4959_v8 = vsel %vm600_vm0, %v10782_v55, -inf }
 0xca0   : > { %v10800_v60 = vpop.permute.xlu1 %5562 }
 0xca1   : > { %v10802_v36 = vpop.permute.xlu0 %5453 }
 0xca2   : > { %4972 = vmax.xlane.f32.xlu1 %v4971_v35  ;;  %4975 = vmax.xlane.f32.xlu0 %v4974_v38 }
 0xca4   : > { %v10804_v31 = vpop.permute.xlu1 %5560 }
 0xca5   : > { %v10806_v40 = vpop.permute.xlu0 %5451 }
 0xca6   : > { %4960 = vmax.xlane.f32.xlu1 %v4959_v8  ;;  %4963 = vmax.xlane.f32.xlu0 %v4962_v49 }
 0xca8   : > { %v10808_v44 = vpop.permute.xlu1 %5784 }
 0xca9   : > { %v10810_v57 = vpop.permute.xlu0 %5675 }
 0xcac   : > { %v10812_v14 = vpop.permute.xlu1 %5782 }
 0xcb0   : > { %v10816_v58 = vpop.permute.xlu1 %5780 }
 0xcb7   : > { %5998 = vrot.lane.b32.xlu1 %v10414_v50, %s8903_s21  ;;  %v10814_v50 = vpop.permute.xlu0 %5673 }
 0xcbb   : > { %v10818_v32 = vpop.permute.xlu0 %5671 }
 0xcbc   : > { %5889 = vrot.lane.b32.xlu0 %v10418_v28, %s8903_s21  ;;  %v10820_v28 = vpop.permute.xlu1 %5778 }
 0xcbf   : > { %v10822_v51 = vpop.permute.xlu0 %5669 }
 0xcc0   : > { %11718 = vst [vmem:[#allocation7_spill] sm:$0xff] %v10822_v51  ;;  %v10824_v52 = vpop.permute.xlu1 %6002 }
 0xcc3   : > { %v10826_v7 = vpop.permute.xlu0 %5893 }
 0xcc4   : > { %11719 = vst [vmem:[#allocation6_spill] sm:$0xff] %v10826_v7  ;;  %v10828_v35 = vpop.permute.xlu1 %6000 }
 0xcc5   : > { %11720 = vst [vmem:[#allocation9_spill] sm:$0xff] %v10828_v35 }
 0xcc7   : > { %v10830_v38 = vpop.permute.xlu0 %5891 }
 0xcc8   : > { %11721 = vst [vmem:[#allocation8_spill] sm:$0xff] %v10830_v38 }
 0xceb   : > { %v4886_v8 = vpop.xlane.xlu1 %4885 }
 0xcec   : > { %v4978_v49 = vsub.f32 %v10618_v12, %v4886_v8 }
 0xcee   : > { %v5011_v29 = vmul.f32 1.442695, %v4978_v49 }
 0xcef   : > { %v4898_v21 = vpop.xlane.xlu0 %4897 }
 0xcf0   : > { %v4982_v25 = vsub.f32 %v10623_v5, %v4898_v21 }
 0xcf2   : > { %v5019_v33 = vmul.f32 1.442695, %v4982_v25 }
 0xcf3   : > { %v4895_v26 = vpop.xlane.xlu0 %4894 }
 0xcf4   : > { %8703 = vpow2.f32 %v5019_v33  ;;  %v4981_v3 = vsub.f32 %v10631_v41, %v4895_v26 }
 0xcf5   : > { %v4901_v39 = vpop.xlane.xlu1 %4900  ;;  %8705 = vpow2.f32 %v5011_v29 }
 0xcf6   : > { %v5017_v19 = vmul.f32 1.442695, %v4981_v3  ;;  %v4983_v7 = vsub.f32 %v10644_v13, %v4901_v39 }
 0xcf7   : > { %v4883_v35 = vpop.xlane.xlu0 %4882 }
 0xcf8   : > { %8707 = vpow2.f32 %v5017_v19  ;;  %v4977_v38 = vsub.f32 %v10636_v53, %v4883_v35  ;;  %v5021_v12 = vmul.f32 1.442695, %v4983_v7 }
 0xcf9   : > { %v4889_v51 = vpop.xlane.xlu1 %4888 }
 0xcfa   : > { %v5009_v8 = vmul.f32 1.442695, %v4977_v38  ;;  %v4979_v21 = vsub.f32 %v10649_v47, %v4889_v51 }
 0xcfb   : > { %v4904_v5 = vpop.xlane.xlu0 %4903 }
 0xcfc   : > { %8709 = vpow2.f32 %v5009_v8  ;;  %v4984_v33 = vsub.f32 %v10659_v1, %v4904_v5  ;;  %v5013_v26 = vmul.f32 1.442695, %v4979_v21 }
 0xcfd   : > { %8711 = vpow2.f32 %v5021_v12 }
 0xcfe   : > { %v5023_v25 = vmul.f32 1.442695, %v4984_v33 }
 0xcff   : > { %v4892_v29 = vpop.xlane.xlu0 %4891 }
 0xd00   : > { %8713 = vpow2.f32 %v5023_v25  ;;  %v4980_v39 = vsub.f32 %v10666_v61, %v4892_v29 }
 0xd01   : > { %v10840_v3 = vpop.eup %8703  ;;  %8715 = vpow2.f32 %v5013_v26 }
 0xd02   : > { %v5015_v19 = vmul.f32 1.442695, %v4980_v39  ;;  %v5088_v41 = vsel %vm600_vm0, %v10840_v3, 0.0  ;;  %v10844_v53 = vpop.eup %8705 }
 0xd03   : > { %v4919_v13 = vpop.xlane.xlu1 %4918  ;;  %v4922_v47 = vpop.xlane.xlu0 %4921  ;;  %5089 = vadd.xlane.f32.xlu0 %v5088_v41  ;;  %v5076_v49 = vsel %vm600_vm0, %v10844_v53, 0.0 }
 0xd04   : > { %8717 = vpow2.f32 %v5015_v19  ;;  %v4989_v1 = vsub.f32 %v10676_v9, %v4919_v13  ;;  %v4990_v51 = vsub.f32 %v10671_v10, %v4922_v47 }
 0xd05   : > { %v10848_v7 = vpop.eup %8707 }
 0xd06   : > { %v5033_v61 = vmul.f32 1.442695, %v4989_v1  ;;  %v5035_v35 = vmul.f32 1.442695, %v4990_v51  ;;  %v5085_v38 = vsel %vm600_vm0, %v10848_v7, 0.0 }
 0xd07   : > { %v4907_v12 = vpop.xlane.xlu1 %4906  ;;  %v4910_v8 = vpop.xlane.xlu0 %4909  ;;  %5086 = vadd.xlane.f32.xlu1 %v5085_v38  ;;  %5077 = vadd.xlane.f32.xlu0 %v5076_v49 }
 0xd08   : > { %8719 = vpow2.f32 %v5033_v61  ;;  %v4985_v21 = vsub.f32 %v10682_v48, %v4907_v12  ;;  %v4986_v9 = vsub.f32 %v10679_v24, %v4910_v8 }
 0xd09   : > { %v10856_v10 = vpop.eup %8709  ;;  %8721 = vpow2.f32 %v5035_v35 }
 0xd0a   : > { %v5025_v5 = vmul.f32 1.442695, %v4985_v21  ;;  %v5027_v33 = vmul.f32 1.442695, %v4986_v9  ;;  %v5073_v26 = vsel %vm600_vm0, %v10856_v10, 0.0  ;;  %v10860_v25 = vpop.eup %8711 }
 0xd0b   : > { %v4925_v29 = vpop.xlane.xlu1 %4924  ;;  %v4928_v39 = vpop.xlane.xlu0 %4927  ;;  %5074 = vadd.xlane.f32.xlu1 %v5073_v26  ;;  %v5091_v1 = vsel %vm600_vm0, %v10860_v25, 0.0 }
 0xd0c   : > { %8723 = vpow2.f32 %v5025_v5  ;;  %v4991_v19 = vsub.f32 %v10692_v34, %v4925_v29  ;;  %v4992_v48 = vsub.f32 %v10689_v54, %v4928_v39 }
 0xd0d   : > { %v10864_v41 = vpop.eup %8713  ;;  %8725 = vpow2.f32 %v5027_v33 }
 0xd0e   : > { %v5037_v24 = vmul.f32 1.442695, %v4991_v19  ;;  %v5039_v13 = vmul.f32 1.442695, %v4992_v48  ;;  %v5094_v47 = vsel %vm600_vm0, %v10864_v41, 0.0  ;;  %v10870_v51 = vpop.eup %8715 }
 0xd0f   : > { %v4913_v61 = vpop.xlane.xlu1 %4912  ;;  %v4916_v35 = vpop.xlane.xlu0 %4915  ;;  %5095 = vadd.xlane.f32.xlu0 %v5094_v47  ;;  %5092 = vadd.xlane.f32.xlu1 %v5091_v1  ;;  %v5079_v21 = vsel %vm600_vm0, %v10870_v51, 0.0 }
 0xd10   : > { %8727 = vpow2.f32 %v5037_v24  ;;  %v4987_v54 = vsub.f32 %v10702_v15, %v4913_v61  ;;  %v4988_v34 = vsub.f32 %v10699_v37, %v4916_v35 }
 0xd11   : > { %v10874_v38 = vpop.eup %8717  ;;  %8729 = vpow2.f32 %v5039_v13 }
 0xd12   : > { %v5029_v49 = vmul.f32 1.442695, %v4987_v54  ;;  %v5031_v12 = vmul.f32 1.442695, %v4988_v34  ;;  %v5082_v8 = vsel %vm600_vm0, %v10874_v38, 0.0 }
 0xd13   : > { %v4943_v9 = vpop.xlane.xlu1 %4942  ;;  %v4946_v5 = vpop.xlane.xlu0 %4945  ;;  %5083 = vadd.xlane.f32.xlu0 %v5082_v8  ;;  %5080 = vadd.xlane.f32.xlu1 %v5079_v21 }
 0xd14   : > { %8731 = vpow2.f32 %v5029_v49  ;;  %v4997_v15 = vsub.f32 %v10716_v63, %v4943_v9  ;;  %v4998_v37 = vsub.f32 %v10709_v30, %v4946_v5 }
 0xd15   : > { %v10882_v33 = vpop.eup %8719  ;;  %8733 = vpow2.f32 %v5031_v12 }
 0xd16   : > { %v10884_v26 = vpop.eup %8721  ;;  %v5049_v29 = vmul.f32 1.442695, %v4997_v15  ;;  %v5051_v39 = vmul.f32 1.442695, %v4998_v37  ;;  %v5109_v19 = vsel %vm600_vm0, %v10882_v33, 0.0 }
 0xd17   : > { %v4931_v48 = vpop.xlane.xlu1 %4930  ;;  %v4934_v24 = vpop.xlane.xlu0 %4933  ;;  %v5112_v13 = vsel %vm600_vm0, %v10884_v26, 0.0  ;;  %5110 = vadd.xlane.f32.xlu1 %v5109_v19 }
 0xd18   : > { %8735 = vpow2.f32 %v5049_v29  ;;  %v4993_v63 = vsub.f32 %v10722_v16, %v4931_v48  ;;  %v4994_v30 = vsub.f32 %v10719_v11, %v4934_v24  ;;  %5113 = vadd.xlane.f32.xlu0 %v5112_v13 }
 0xd19   : > { %v10892_v47 = vpop.eup %8723  ;;  %8737 = vpow2.f32 %v5051_v39 }
 0xd1a   : > { %v10894_v1 = vpop.eup %8725  ;;  %v5041_v61 = vmul.f32 1.442695, %v4993_v63  ;;  %v5043_v35 = vmul.f32 1.442695, %v4994_v30  ;;  %v5097_v54 = vsel %vm600_vm0, %v10892_v47, 0.0 }
 0xd1b   : > { %v4949_v34 = vpop.xlane.xlu1 %4948  ;;  %v4952_v49 = vpop.xlane.xlu0 %4951  ;;  %v5100_v12 = vsel %vm600_vm0, %v10894_v1, 0.0  ;;  %5098 = vadd.xlane.f32.xlu1 %v5097_v54 }
 0xd1c   : > { %8739 = vpow2.f32 %v5041_v61  ;;  %v4999_v11 = vsub.f32 %v10732_v62, %v4949_v34  ;;  %v5000_v16 = vsub.f32 %v10729_v20, %v4952_v49  ;;  %5101 = vadd.xlane.f32.xlu0 %v5100_v12 }
 0xd1d   : > { %v10902_v8 = vpop.eup %8727  ;;  %8741 = vpow2.f32 %v5043_v35 }
 0xd1e   : > { %v10904_v21 = vpop.eup %8729  ;;  %v5055_v9 = vmul.f32 1.442695, %v5000_v16  ;;  %v5115_v5 = vsel %vm600_vm0, %v10902_v8, 0.0  ;;  %v5053_v15 = vmul.f32 1.442695, %v4999_v11 }
 0xd1f   : > { %v4937_v37 = vpop.xlane.xlu1 %4936  ;;  %v4940_v29 = vpop.xlane.xlu0 %4939  ;;  %v5118_v39 = vsel %vm600_vm0, %v10904_v21, 0.0  ;;  %5116 = vadd.xlane.f32.xlu1 %v5115_v5 }
 0xd20   : > { %v4995_v62 = vsub.f32 %v10742_v56, %v4937_v37  ;;  %v4996_v20 = vsub.f32 %v10739_v17, %v4940_v29  ;;  %5119 = vadd.xlane.f32.xlu0 %v5118_v39  ;;  %8743 = vpow2.f32 %v5055_v9 }
 0xd21   : > { %v10912_v19 = vpop.eup %8731  ;;  %8745 = vpow2.f32 %v5053_v15 }
 0xd22   : > { %v10914_v48 = vpop.eup %8733  ;;  %v5047_v24 = vmul.f32 1.442695, %v4996_v20  ;;  %v5103_v13 = vsel %vm600_vm0, %v10912_v19, 0.0  ;;  %v5045_v63 = vmul.f32 1.442695, %v4995_v62 }
 0xd23   : > { %v4967_v30 = vpop.xlane.xlu1 %4966  ;;  %v4970_v61 = vpop.xlane.xlu0 %4969  ;;  %v5106_v35 = vsel %vm600_vm0, %v10914_v48, 0.0  ;;  %5104 = vadd.xlane.f32.xlu1 %v5103_v13 }
 0xd24   : > { %v5006_v17 = vsub.f32 %v10749_v22, %v4970_v61  ;;  %5107 = vadd.xlane.f32.xlu0 %v5106_v35  ;;  %8747 = vpow2.f32 %v5047_v24  ;;  %v5005_v49 = vsub.f32 %v10756_v46, %v4967_v30 }
 0xd25   : > { %v10921_v56 = vpop.eup %8735  ;;  %8749 = vpow2.f32 %v5045_v63 }
 0xd26   : > { %v10923_v54 = vpop.eup %8737  ;;  %v5133_v34 = vsel %vm600_vm0, %v10921_v56, 0.0  ;;  %v5067_v12 = vmul.f32 1.442695, %v5006_v17  ;;  %v5065_v39 = vmul.f32 1.442695, %v5005_v49 }
 0xd27   : > { %v4955_v11 = vpop.xlane.xlu1 %4954  ;;  %v4958_v16 = vpop.xlane.xlu0 %4957  ;;  %v5136_v9 = vsel %vm600_vm0, %v10923_v54, 0.0  ;;  %5134 = vadd.xlane.f32.xlu1 %v5133_v34 }
 0xd28   : > { %v5002_v22 = vsub.f32 %v10759_v2, %v4958_v16  ;;  %5137 = vadd.xlane.f32.xlu0 %v5136_v9  ;;  %v5001_v37 = vsub.f32 %v10762_v27, %v4955_v11  ;;  %8751 = vpow2.f32 %v5067_v12 }
 0xd29   : > { %v10931_v5 = vpop.eup %8739 }
 0xd2a   : > { %v10933_v15 = vpop.eup %8741  ;;  %v5059_v29 = vmul.f32 1.442695, %v5002_v22  ;;  %v5121_v46 = vsel %vm600_vm0, %v10931_v5, 0.0  ;;  %v5057_v24 = vmul.f32 1.442695, %v5001_v37 }
 0xd2b   : > { %v4976_v62 = vpop.xlane.xlu0 %4975  ;;  %v5124_v20 = vsel %vm600_vm0, %v10933_v15, 0.0  ;;  %5122 = vadd.xlane.f32.xlu1 %v5121_v46  ;;  %v4973_v13 = vpop.xlane.xlu1 %4972 }
 0xd2c   : > { %5125 = vadd.xlane.f32.xlu0 %v5124_v20  ;;  %8753 = vpow2.f32 %v5059_v29  ;;  %v5008_v27 = vsub.f32 %v10769_v4, %v4976_v62  ;;  %v5007_v49 = vsub.f32 %v10772_v43, %v4973_v13 }
 0xd2d   : > { %v10940_v2 = vpop.eup %8743  ;;  %8755 = vpow2.f32 %v5065_v39 }
 0xd2e   : > { %v5142_v30 = vsel %vm600_vm0, %v10940_v2, 0.0  ;;  %v10945_v61 = vpop.eup %8745  ;;  %8757 = vpow2.f32 %v5057_v24  ;;  %v5071_v12 = vmul.f32 1.442695, %v5008_v27 }
 0xd2f   : > { %v4964_v63 = vpop.xlane.xlu0 %4963  ;;  %5143 = vadd.xlane.f32.xlu1 %v5142_v30  ;;  %v5139_v4 = vsel %vm600_vm0, %v10945_v61, 0.0  ;;  %v4961_v9 = vpop.xlane.xlu1 %4960 }
 0xd30   : > { %v5004_v35 = vsub.f32 %v10779_v0, %v4964_v63  ;;  %v5069_v0 = vmul.f32 1.442695, %v5007_v49  ;;  %v5003_v22 = vsub.f32 %v10782_v55, %v4961_v9 }
 0xd31   : > { %v10948_v17 = vpop.eup %8747 }
 0xd32   : > { %v5063_v34 = vmul.f32 1.442695, %v5004_v35  ;;  %v5130_v11 = vsel %vm600_vm0, %v10948_v17, 0.0  ;;  %v10955_v16 = vpop.eup %8749  ;;  %v5061_v46 = vmul.f32 1.442695, %v5003_v22 }
 0xd33   : > { %5131 = vadd.xlane.f32.xlu0 %v5130_v11  ;;  %5140 = vadd.xlane.f32.xlu1 %v5139_v4  ;;  %v5127_v43 = vsel %vm600_vm0, %v10955_v16, 0.0  ;;  %v10996_v4 = vpop.permute.xlu0 %5889  ;;  %v10998_v9 = vpop.permute.xlu1 %5998 }
 0xd34   : > { %8759 = vpow2.f32 %v5063_v34 }
 0xd35   : > { %8761 = vpow2.f32 %v5071_v12  ;;  %v10960_v37 = vpop.eup %8751 }
 0xd36   : > { %8763 = vpow2.f32 %v5069_v0  ;;  %v5160_v62 = vsel %vm600_vm0, %v10960_v37, 0.0 }
 0xd37   : > { %5128 = vadd.xlane.f32.xlu1 %v5127_v43  ;;  %8765 = vpow2.f32 %v5061_v46 }
 0xd39   : > { %v10962_v29 = vpop.eup %8753 }
 0xd3a   : > { %v5148_v39 = vsel %vm600_vm0, %v10962_v29, 0.0  ;;  %v10968_v20 = vpop.eup %8755 }
 0xd3b   : > { %5149 = vadd.xlane.f32.xlu0 %v5148_v39  ;;  %5161 = vadd.xlane.f32.xlu1 %v5160_v62  ;;  %v10970_v55 = vpop.eup %8757  ;;  %v5157_v24 = vsel %vm600_vm0, %v10968_v20, 0.0 }
 0xd3c   : > { %v5145_v63 = vsel %vm600_vm0, %v10970_v55, 0.0 }
 0xd3f   : > { %5158 = vadd.xlane.f32.xlu1 %v5157_v24 }
 0xd41   : > { %v10974_v13 = vpop.eup %8759 }
 0xd42   : > { %v5154_v27 = vsel %vm600_vm0, %v10974_v13, 0.0  ;;  %v10980_v30 = vpop.eup %8761 }
 0xd43   : > { %5155 = vadd.xlane.f32.xlu0 %v5154_v27  ;;  %5146 = vadd.xlane.f32.xlu1 %v5145_v63  ;;  %v5166_v35 = vsel %vm600_vm0, %v10980_v30, 0.0  ;;  %v10984_v34 = vpop.eup %8763 }
 0xd44   : > { %v5163_v49 = vsel %vm600_vm0, %v10984_v34, 0.0  ;;  %v10988_v12 = vpop.eup %8765 }
 0xd45   : > { %v5151_v11 = vsel %vm600_vm0, %v10988_v12, 0.0 }
 0xd47   : > { %5167 = vadd.xlane.f32.xlu1 %v5166_v35 }
 0xd4b   : > { %5164 = vadd.xlane.f32.xlu1 %v5163_v49 }
 0xd4f   : > { %5152 = vadd.xlane.f32.xlu1 %v5151_v11 }
 0xd59   : > { %5887 = vrot.lane.b32.xlu0 %v10300_v6, %s8903_s21 }
 0xd60   : > { %5996 = vrot.lane.b32.xlu1 %v10298_v18, %s8903_s21 }
 0xd8c   : > { %v5090_v0 = vpop.xlane.xlu0 %5089 }
 0xd8d   : > { %8767 = vrcp.f32 %v5090_v0 }
 0xd90   : > { %v5087_v22 = vpop.xlane.xlu1 %5086  ;;  %v5078_v43 = vpop.xlane.xlu0 %5077 }
 0xd91   : > { %8769 = vrcp.f32 %v5087_v22 }
 0xd92   : > { %8771 = vrcp.f32 %v5078_v43 }
 0xd94   : > { %v5075_v46 = vpop.xlane.xlu1 %5074 }
 0xd95   : > { %8773 = vrcp.f32 %v5075_v46 }
 0xd98   : > { %v5096_v39 = vpop.xlane.xlu0 %5095  ;;  %v5093_v62 = vpop.xlane.xlu1 %5092 }
 0xd99   : > { %8775 = vrcp.f32 %v5096_v39 }
 0xd9a   : > { %8777 = vrcp.f32 %v5093_v62  ;;  %v8768_v18 = vpop.eup %8767 }
 0xd9b   : > { %v5206_v11 = vmul.f32 %v8768_v18, %v10840_v3 }
 0xd9c   : > { %v5084_v6 = vpop.xlane.xlu0 %5083  ;;  %v5081_v24 = vpop.xlane.xlu1 %5080 }
 0xd9d   : > { %8779 = vrcp.f32 %v5084_v6 }
 0xd9e   : > { %8781 = vrcp.f32 %v5081_v24  ;;  %v8770_v27 = vpop.eup %8769 }
 0xd9f   : > { %v5205_v35 = vmul.f32 %v8770_v27, %v10848_v7  ;;  %v8772_v49 = vpop.eup %8771 }
 0xda0   : > { %v5111_v63 = vpop.xlane.xlu1 %5110  ;;  %v5202_v46 = vmul.f32 %v8772_v49, %v10844_v53 }
 0xda1   : > { %v5114_v0 = vpop.xlane.xlu0 %5113  ;;  %8783 = vrcp.f32 %v5111_v63  ;;  %8353 = vmatprep.mubr.msk.f32.mxu0 %vm600_vm0, %v5205_v35 }
 0xda2   : > { %v8774_v22 = vpop.eup %8773  ;;  %8785 = vrcp.f32 %v5114_v0  ;;  %8354 = vmatmul.mubr.msk.f32.vlgmr.msra.gmra.mxu0 %vm600_vm0, %v5206_v11 }
 0xda3   : > { %v5201_v43 = vmul.f32 %v8774_v22, %v10856_v10  ;;  %8374 = vmatpush3.msra.mxu0 %v10606_v42 }
 0xda4   : > { %v5099_v39 = vpop.xlane.xlu1 %5098  ;;  %8375 = vmatprep.subr.mxu0 %v10792_v23 }
 0xda5   : > { %v5102_v7 = vpop.xlane.xlu0 %5101  ;;  %8787 = vrcp.f32 %v5099_v39  ;;  %8339 = vmatprep.mubr.msk.f32.mxu1 %vm600_vm0, %v5201_v43  ;;  %8376 = vmatpush3.msra.mxu0 %v10792_v23  ;;  %v11723_v43 = vld [vmem:[#allocation6_spill] sm:$0xff] }
 0xda6   : > { %v8776_v3 = vpop.eup %8775  ;;  %8789 = vrcp.f32 %v5102_v7  ;;  %8340 = vmatmul.mubr.msk.f32.vlgmr.msra.gmra.mxu1 %vm600_vm0, %v5202_v46  ;;  %8377 = vmatprep.subr.mxu0 %v10800_v60 }
 0xda7   : > { %v8778_v62 = vpop.eup %8777  ;;  %8360 = vmatpush3.msra.mxu1 %v10609_v45  ;;  %8378 = vmatpush3.msra.mxu0 %v10800_v60  ;;  %v5208_v10 = vmul.f32 %v8776_v3, %v10864_v41 }
 0xda8   : > { %8361 = vmatprep.subr.mxu1 %v10796_v59  ;;  %v5117_v42 = vpop.xlane.xlu1 %5116  ;;  %v5207_v53 = vmul.f32 %v8778_v62, %v10860_v25  ;;  %8379 = vmatprep.subr.mxu0 %v10804_v31  ;;  %v11724_v62 = vld [vmem:[#allocation9_spill] sm:$0xff] }
 0xda9   : > { %v5120_v6 = vpop.xlane.xlu0 %5119  ;;  %8362 = vmatpush3.msra.mxu1 %v10796_v59  ;;  %8791 = vrcp.f32 %v5117_v42  ;;  %8380 = vmatpush3.msra.mxu0 %v10804_v31 }
 0xdaa   : > { %v8780_v23 = vpop.eup %8779  ;;  %8793 = vrcp.f32 %v5120_v6  ;;  %8356 = vmatprep.mubr.msk.f32.mxu0 %vm600_vm0, %v5207_v53  ;;  %8363 = vmatprep.subr.mxu1 %v10802_v36 }
 0xdab   : > { %v8782_v45 = vpop.eup %8781  ;;  %8401 = vmatprep.subr.mxu0 %v10808_v44  ;;  %v5204_v60 = vmul.f32 %v8780_v23, %v10874_v38  ;;  %8357 = vmatmul.mubr.msk.f32.gmra.mxu0 %vm600_vm0, %v5208_v10 }
 0xdac   : > { %8364 = vmatpush3.msra.mxu1 %v10802_v36  ;;  %v5105_v25 = vpop.xlane.xlu1 %5104  ;;  %v5203_v59 = vmul.f32 %v8782_v45, %v10870_v51 }
 0xdad   : > { %8365 = vmatprep.subr.mxu1 %v10806_v40  ;;  %v5108_v41 = vpop.xlane.xlu0 %5107  ;;  %8795 = vrcp.f32 %v5105_v25 }
 0xdae   : > { %v8784_v31 = vpop.eup %8783  ;;  %8797 = vrcp.f32 %v5108_v41  ;;  %8366 = vmatpush3.msra.mxu1 %v10806_v40  ;;  %8342 = vmatprep.mubr.msk.f32.mxu1 %vm600_vm0, %v5203_v59 }
 0xdaf   : > { %v8786_v24 = vpop.eup %8785  ;;  %8387 = vmatprep.subr.mxu1 %v10810_v57  ;;  %8343 = vmatmul.mubr.msk.f32.gmra.mxu1 %vm600_vm0, %v5204_v60  ;;  %v5213_v36 = vmul.f32 %v8784_v31, %v10882_v33 }
 0xdb0   : > { %v5214_v38 = vmul.f32 %v8786_v24, %v10884_v26  ;;  %v5135_v51 = vpop.xlane.xlu1 %5134 }
 0xdb1   : > { %v5138_v18 = vpop.xlane.xlu0 %5137  ;;  %8799 = vrcp.f32 %v5135_v51  ;;  %8381 = vmatprep.mubr.msk.f32.mxu0 %vm600_vm0, %v5213_v36 }
 0xdb2   : > { %v8788_v27 = vpop.eup %8787  ;;  %8801 = vrcp.f32 %v5138_v18  ;;  %8382 = vmatmul.mubr.msk.f32.vlgmr.msra.gmra.mxu0 %vm600_vm0, %v5214_v38 }
 0xdb3   : > { %v8790_v40 = vpop.eup %8789  ;;  %8402 = vmatpush3.msra.mxu0 %v10808_v44  ;;  %v5209_v63 = vmul.f32 %v8788_v27, %v10892_v47 }
 0xdb4   : > { %v5210_v35 = vmul.f32 %v8790_v40, %v10894_v1  ;;  %8403 = vmatprep.subr.mxu0 %v10812_v14  ;;  %v5123_v33 = vpop.xlane.xlu1 %5122 }
 0xdb5   : > { %v5126_v26 = vpop.xlane.xlu0 %5125  ;;  %8404 = vmatpush3.msra.mxu0 %v10812_v14  ;;  %8803 = vrcp.f32 %v5123_v33  ;;  %8367 = vmatprep.mubr.msk.f32.mxu1 %vm600_vm0, %v5209_v63 }
 0xdb6   : > { %v8792_v49 = vpop.eup %8791  ;;  %8805 = vrcp.f32 %v5126_v26  ;;  %8405 = vmatprep.subr.mxu0 %v10816_v58  ;;  %8368 = vmatmul.mubr.msk.f32.vlgmr.msra.gmra.mxu1 %vm600_vm0, %v5210_v35  ;;  %v8876_v35 = vld [vmem:[%s11639_s5 + $0x8] sm:$0xff] }
 0xdb7   : > { %v8794_v44 = vpop.eup %8793  ;;  %8388 = vmatpush3.msra.mxu1 %v10810_v57  ;;  %8406 = vmatpush3.msra.mxu0 %v10816_v58  ;;  %v5215_v47 = vmul.f32 %v8792_v49, %v10902_v8  ;;  %v8877_v26 = vld [vmem:[%s11643_s9 + $0x8] sm:$0xff] }
 0xdb8   : > { %8389 = vmatprep.subr.mxu1 %v10814_v50  ;;  %8407 = vmatprep.subr.mxu0 %v10820_v28  ;;  %v5216_v14 = vmul.f32 %v8794_v44, %v10904_v21  ;;  %v5144_v1 = vpop.xlane.xlu1 %5143 }
 0xdb9   : > { %8390 = vmatpush3.msra.mxu1 %v10814_v50  ;;  %8408 = vmatpush3.msra.mxu0 %v10820_v28  ;;  %v11722_v50 = vld [vmem:[#allocation7_spill] sm:$0xff]  ;;  %8807 = vrcp.f32 %v5144_v1  ;;  %v8880_v1 = vld [vmem:[%s11643_s9] sm:$0xff] }
 0xdba   : > { %v8796_v11 = vpop.eup %8795  ;;  %8384 = vmatprep.mubr.msk.f32.mxu0 %vm600_vm0, %v5215_v47  ;;  %8391 = vmatprep.subr.mxu1 %v10818_v32  ;;  %v11127_v47 = vld [vmem:[%s11645_s11 + $0x38] sm:$0xff] }
 0xdbb   : > { %v8798_v57 = vpop.eup %8797  ;;  %8429 = vmatprep.subr.mxu0 %v10824_v52  ;;  %8385 = vmatmul.mubr.msk.f32.gmra.mxu0 %vm600_vm0, %v5216_v14  ;;  %v5211_v58 = vmul.f32 %v8796_v11, %v10912_v19 }
 0xdbc   : > { %8392 = vmatpush3.msra.mxu1 %v10818_v32  ;;  %v5212_v8 = vmul.f32 %v8798_v57, %v10914_v48  ;;  %v5141_v28 = vpop.xlane.xlu1 %5140  ;;  %v5132_v0 = vpop.xlane.xlu0 %5131 }
 0xdbd   : > { %8393 = vmatprep.subr.mxu1 %v11722_v50  ;;  %8370 = vmatprep.mubr.msk.f32.mxu1 %vm600_vm0, %v5211_v58  ;;  %8809 = vrcp.f32 %v5141_v28 }
 0xdbe   : > { %v8800_v21 = vpop.eup %8799  ;;  %8394 = vmatpush3.msra.mxu1 %v11722_v50  ;;  %8811 = vrcp.f32 %v5132_v0 }
 0xdbf   : > { %v8802_v22 = vpop.eup %8801  ;;  %8415 = vmatprep.subr.mxu1 %v11723_v43  ;;  %8371 = vmatmul.mubr.msk.f32.gmra.mxu1 %vm600_vm0, %v5212_v8  ;;  %v5221_v32 = vmul.f32 %v8800_v21, %v10921_v56 }
 0xdc0   : > { %v5222_v19 = vmul.f32 %v8802_v22, %v10923_v54  ;;  %v5129_v48 = vpop.xlane.xlu1 %5128 }
 0xdc1   : > { %8409 = vmatprep.mubr.msk.f32.mxu0 %vm600_vm0, %v5221_v32  ;;  %8813 = vrcp.f32 %v5129_v48 }
 0xdc2   : > { %v8804_v46 = vpop.eup %8803  ;;  %8410 = vmatmul.mubr.msk.f32.vlgmr.msra.gmra.mxu0 %vm600_vm0, %v5222_v19 }
 0xdc3   : > { %v8806_v39 = vpop.eup %8805  ;;  %8430 = vmatpush3.msra.mxu0 %v10824_v52  ;;  %v5217_v7 = vmul.f32 %v8804_v46, %v10931_v5  ;;  %v11725_v52 = vld [vmem:[#allocation8_spill] sm:$0xff] }
 0xdc4   : > { %v5218_v3 = vmul.f32 %v8806_v39, %v10933_v15  ;;  %8431 = vmatprep.subr.mxu0 %v11724_v62  ;;  %v5162_v56 = vpop.xlane.xlu1 %5161  ;;  %v5150_v54 = vpop.xlane.xlu0 %5149 }
 0xdc5   : > { %8432 = vmatpush3.msra.mxu0 %v11724_v62  ;;  %8395 = vmatprep.mubr.msk.f32.mxu1 %vm600_vm0, %v5217_v7 }
 0xdc6   : > { %8433 = vmatprep.subr.mxu0 %v10998_v9  ;;  %8396 = vmatmul.mubr.msk.f32.vlgmr.msra.gmra.mxu1 %vm600_vm0, %v5218_v3  ;;  %v8808_v15 = vpop.eup %8807 }
 0xdc7   : > { %8416 = vmatpush3.msra.mxu1 %v11723_v43  ;;  %8434 = vmatpush3.msra.mxu0 %v10998_v9  ;;  %v5224_v9 = vmul.f32 %v8808_v15, %v10940_v2 }
 0xdc8   : > { %8417 = vmatprep.subr.mxu1 %v11725_v52  ;;  %v5159_v5 = vpop.xlane.xlu1 %5158 }
 0xdc9   : > { %8418 = vmatpush3.msra.mxu1 %v11725_v52  ;;  %8815 = vrcp.f32 %v5159_v5 }
 0xdca   : > { %8419 = vmatprep.subr.mxu1 %v10996_v4  ;;  %v8810_v42 = vpop.eup %8809  ;;  %8817 = vrcp.f32 %v5150_v54 }
 0xdcb   : > { %8420 = vmatpush3.msra.mxu1 %v10996_v4  ;;  %v5223_v6 = vmul.f32 %v8810_v42, %v10945_v61  ;;  %v8812_v23 = vpop.eup %8811  ;;  %8819 = vrcp.f32 %v5162_v56  ;;  %v8872_v61 = vld [vmem:[%s11639_s5 + $0x18] sm:$0xff] }
 0xdcc   : > { %v5156_v53 = vpop.xlane.xlu0 %5155  ;;  %v5147_v10 = vpop.xlane.xlu1 %5146  ;;  %v5220_v59 = vmul.f32 %v8812_v23, %v10948_v17 }
 0xdcd   : > { %8821 = vrcp.f32 %v5147_v10  ;;  %8412 = vmatprep.mubr.msk.f32.mxu0 %vm600_vm0, %v5223_v6 }
 0xdce   : > { %v8814_v45 = vpop.eup %8813  ;;  %8413 = vmatmul.mubr.msk.f32.gmra.mxu0 %vm600_vm0, %v5224_v9 }
 0xdcf   : > { %v5219_v60 = vmul.f32 %v8814_v45, %v10955_v16 }
 0xdd0   : > { %v5888_v25 = vpop.permute.xlu0 %5887  ;;  %v5168_v4 = vpop.xlane.xlu1 %5167 }
 0xdd1   : > { %8398 = vmatprep.mubr.msk.f32.mxu1 %vm600_vm0, %v5219_v60  ;;  %8421 = vmatprep.subr.mxu1 %v5888_v25  ;;  %8823 = vrcp.f32 %v5168_v4 }
 0xdd2   : > { %8399 = vmatmul.mubr.msk.f32.gmra.mxu1 %vm600_vm0, %v5220_v59 }
 0xdd3   : > { %8422 = vmatpush3.msra.mxu1 %v5888_v25 }
 0xdd4   : > { %v5165_v2 = vpop.xlane.xlu1 %5164  ;;  %8443 = vmatprep.subr.mxu1 %v8872_v61 }
 0xdd5   : > { %8825 = vrcp.f32 %v5165_v2 }
 0xdd6   : > { %v8816_v41 = vpop.eup %8815  ;;  %8827 = vrcp.f32 %v5156_v53 }
 0xdd7   : > { %v5229_v16 = vmul.f32 %v8816_v41, %v10968_v20  ;;  %v8818_v17 = vpop.eup %8817  ;;  %v8873_v20 = vld [vmem:[%s11643_s9 + $0x18] sm:$0xff] }
 0xdd8   : > { %v5153_v31 = vpop.xlane.xlu1 %5152  ;;  %v8820_v24 = vpop.eup %8819  ;;  %v5226_v18 = vmul.f32 %v8818_v17, %v10962_v29  ;;  %v8874_v29 = vld [vmem:[%s11639_s5 + $0x10] sm:$0xff] }
 0xdd9   : > { %8829 = vrcp.f32 %v5153_v31  ;;  %8437 = vmatprep.mubr.msk.f32.mxu0 %vm600_vm0, %v5229_v16  ;;  %v5230_v27 = vmul.f32 %v8820_v24, %v10960_v37 }
 0xdda   : > { %v8822_v36 = vpop.eup %8821 }
 0xddb   : > { %v5225_v51 = vmul.f32 %v8822_v36, %v10970_v55  ;;  %v8875_v55 = vld [vmem:[%s11643_s9 + $0x10] sm:$0xff] }
 0xddc   : > { %v5997_v38 = vpop.permute.xlu1 %5996 }
 0xddd   : > { %8435 = vmatprep.subr.mxu0 %v5997_v38  ;;  %8423 = vmatprep.mubr.msk.f32.mxu1 %vm600_vm0, %v5225_v51  ;;  %v8881_v51 = vld [vmem:[%s11645_s11 + $0x30] sm:$0xff] }
 0xdde   : > { %8436 = vmatpush3.msra.mxu0 %v5997_v38  ;;  %8424 = vmatmul.mubr.msk.f32.vlgmr.msra.gmra.mxu1 %vm600_vm0, %v5226_v18  ;;  %v8824_v40 = vpop.eup %8823 }
 0xddf   : > { %8438 = vmatmul.mubr.msk.f32.vlgmr.msra.gmra.mxu0 %vm600_vm0, %v5230_v27  ;;  %8444 = vmatpush3.msra.mxu1 %v8872_v61  ;;  %v5232_v33 = vmul.f32 %v8824_v40, %v10980_v30  ;;  %v8883_v40 = vld [vmem:[%s11645_s11 + $0x20] sm:$0xff] }
 0xde0   : > { %8463 = vmatprep.subr.mxu0 %v8873_v20  ;;  %8445 = vmatprep.subr.mxu1 %v8874_v29 }
 0xde1   : > { %8464 = vmatpush3.msra.mxu0 %v8873_v20  ;;  %8446 = vmatpush3.msra.mxu1 %v8874_v29  ;;  %v8882_v20 = vld [vmem:[%s11645_s11 + $0x28] sm:$0xff] }
 0xde2   : > { %v8826_v37 = vpop.eup %8825  ;;  %8465 = vmatprep.subr.mxu0 %v8875_v55  ;;  %8447 = vmatprep.subr.mxu1 %v8876_v35 }
 0xde3   : > { %v5231_v63 = vmul.f32 %v8826_v37, %v10984_v34  ;;  %8466 = vmatpush3.msra.mxu0 %v8875_v55  ;;  %8448 = vmatpush3.msra.mxu1 %v8876_v35  ;;  %v8828_v49 = vpop.eup %8827  ;;  %v8878_v34 = vld [vmem:[%s11639_s5] sm:$0xff]  ;;  %v8884_v37 = vld [vmem:[%s11645_s11 + $0x18] sm:$0xff] }
 0xde4   : > { %8467 = vmatprep.subr.mxu0 %v8877_v26  ;;  %8449 = vmatprep.subr.mxu1 %v8878_v34  ;;  %v5228_v14 = vmul.f32 %v8828_v49, %v10974_v13 }
 0xde5   : > { %8440 = vmatprep.mubr.msk.f32.mxu0 %vm600_vm0, %v5231_v63  ;;  %8450 = vmatpush3.msra.mxu1 %v8878_v34  ;;  %v8885_v63 = vld [vmem:[%s11645_s11 + $0x10] sm:$0xff]  ;;  %v8886_v34 = vld [vmem:[%s11645_s11 + $0x8] sm:$0xff] }
 0xde6   : > { %v8830_v44 = vpop.eup %8829  ;;  %8441 = vmatmul.mubr.msk.f32.gmra.mxu0 %vm600_vm0, %v5232_v33  ;;  %8483 = vmatprep.subr.mxu1 %v11127_v47 }
 0xde7   : > { %v5227_v30 = vmul.f32 %v8830_v44, %v10988_v12  ;;  %8468 = vmatpush3.msra.mxu0 %v8877_v26 }
 0xde8   : > { %8469 = vmatprep.subr.mxu0 %v8880_v1 }
 0xde9   : > { %8426 = vmatprep.mubr.msk.f32.mxu1 %vm600_vm0, %v5227_v30  ;;  %8470 = vmatpush3.msra.mxu0 %v8880_v1 }
 0xdea   : > { %8427 = vmatmul.mubr.msk.f32.gmra.mxu1 %vm600_vm0, %v5228_v14 }
 0xe62   : > { %v8355_v12 = vpop.f32.mrf.mxu0 }
 0xe63   : > { %6115 = vrot.lane.b32.xlu1 %v8355_v12, %s11726_s22 }
 0xe64   : > { %v5432_v57 = vpop.f32.mrf.mxu0 }
 0xe66   : > { %v8341_v11 = vpop.f32.mrf.mxu1 }
 0xe67   : > { %6113 = vrot.lane.b32.xlu0 %v8341_v11, %s11726_s22 }
 0xe68   : > { %v5323_v8 = vpop.f32.mrf.mxu1 }
 0xe6b   : > { %v8358_v58 = vpop.f32.mrf.mxu0 }
 0xe6c   : > { %6179 = vrot.lane.b32.xlu1 %v8358_v58, %s11727_s28 }
 0xe6d   : > { %v5442_v50 = vpop.f32.mrf.mxu0 }
 0xe6f   : > { %v8344_v13 = vpop.f32.mrf.mxu1 }
 0xe70   : > { %6177 = vrot.lane.b32.xlu0 %v8344_v13, %s11727_s28  ;;  %6147 = vrot.lane.b32.xlu1 %v5442_v50, %s11728_s29 }
 0xe71   : > { %v5333_v21 = vpop.f32.mrf.mxu1 }
 0xe72   : > { %v8383_v28 = vpop.f32.mrf.mxu0 }
 0xe74   : > { %6145 = vrot.lane.b32.xlu0 %v5333_v21, %s11728_s29  ;;  %6119 = vrot.lane.b32.xlu1 %v8383_v28, %s11726_s22  ;;  %v11144_v22 = vpop.f32.mrf.mxu0 }
 0xe76   : > { %v8369_v0 = vpop.f32.mrf.mxu1 }
 0xe78   : > { %6117 = vrot.lane.b32.xlu0 %v8369_v0, %s11726_s22  ;;  %v11147_v32 = vpop.f32.mrf.mxu1 }
 0xe7b   : > { %v8386_v43 = vpop.f32.mrf.mxu0 }
 0xe7c   : > { %6183 = vrot.lane.b32.xlu1 %v8386_v43, %s11727_s28 }
 0xe7d   : > { %v5660_v19 = vpop.f32.mrf.mxu0 }
 0xe7f   : > { %v8372_v48 = vpop.f32.mrf.mxu1 }
 0xe80   : > { %6151 = vrot.lane.b32.xlu1 %v5660_v19, %s11728_s29  ;;  %6181 = vrot.lane.b32.xlu0 %v8372_v48, %s11727_s28 }
 0xe81   : > { %v5551_v39 = vpop.f32.mrf.mxu1 }
 0xe82   : > { %v8411_v46 = vpop.f32.mrf.mxu0 }
 0xe84   : > { %6149 = vrot.lane.b32.xlu0 %v5551_v39, %s11728_s29  ;;  %6123 = vrot.lane.b32.xlu1 %v8411_v46, %s11726_s22  ;;  %v11154_v3 = vpop.f32.mrf.mxu0 }
 0xe86   : > { %v8397_v7 = vpop.f32.mrf.mxu1 }
 0xe88   : > { %6121 = vrot.lane.b32.xlu0 %v8397_v7, %s11726_s22  ;;  %v11156_v56 = vpop.f32.mrf.mxu1 }
 0xe8e   : > { %v8414_v62 = vpop.f32.mrf.mxu0 }
 0xe8f   : > { %6187 = vrot.lane.b32.xlu1 %v8414_v62, %s11727_s28 }
 0xe90   : > { %v5878_v54 = vpop.f32.mrf.mxu0 }
 0xe92   : > { %v8400_v52 = vpop.f32.mrf.mxu1 }
 0xe93   : > { %6185 = vrot.lane.b32.xlu0 %v8400_v52, %s11727_s28  ;;  %6155 = vrot.lane.b32.xlu1 %v5878_v54, %s11728_s29 }
 0xe94   : > { %v5769_v5 = vpop.f32.mrf.mxu1 }
 0xe97   : > { %6153 = vrot.lane.b32.xlu0 %v5769_v5, %s11728_s29 }
 0xe9e   : > { %v8425_v15 = vpop.f32.mrf.mxu1 }
 0xe9f   : > { %v8439_v42 = vpop.f32.mrf.mxu0  ;;  %6125 = vrot.lane.b32.xlu0 %v8425_v15, %s11726_s22  ;;  %v8888_v15 = vld [vmem:[%s11640_s6] ss:$0 sm:$0xff] }
 0xea0   : > { %6127 = vrot.lane.b32.xlu1 %v8439_v42, %s11726_s22  ;;  %v11166_v6 = vpop.f32.mrf.mxu1 }
 0xea1   : > { %v11164_v53 = vpop.f32.mrf.mxu0 }
 0xea6   : > { %v8442_v10 = vpop.f32.mrf.mxu0 }
 0xea8   : > { %v6096_v23 = vpop.f32.mrf.mxu0 }
 0xea9   : > { %6159 = vrot.lane.b32.xlu1 %v6096_v23, %s11728_s29 }
 0xeaa   : > { %v8428_v9 = vpop.f32.mrf.mxu1 }
 0xeac   : > { %v5987_v45 = vpop.f32.mrf.mxu1 }
 0xead   : > { %6157 = vrot.lane.b32.xlu0 %v5987_v45, %s11728_s29  ;;  %6191 = vrot.lane.b32.xlu1 %v8442_v10, %s11727_s28  ;;  %v11729_v10 = vld [vmem:[#allocation11_spill] sm:$0xff] }
 0xeb1   : > { %6189 = vrot.lane.b32.xlu0 %v8428_v9, %s11727_s28  ;;  %v11730_v9 = vld [vmem:[#allocation10_spill] sm:$0xff] }
 0xed5   : > { %v6116_v60 = vpop.permute.xlu1 %6115 }
 0xed6   : > { %v6202_v61 = vsel %vm794_vm1, %v5432_v57, %v6116_v60 }
 0xed9   : > { %v6114_v25 = vpop.permute.xlu0 %6113 }
 0xeda   : > { %v6201_v41 = vsel %vm794_vm1, %v5323_v8, %v6114_v25 }
 0xede   : > { %v6180_v4 = vpop.permute.xlu1 %6179 }
 0xee2   : > { %v6178_v59 = vpop.permute.xlu0 %6177  ;;  %v6148_v2 = vpop.permute.xlu1 %6147 }
 0xee3   : > { %v6210_v16 = vsel %vm3051_vm2, %v6202_v61, %v6148_v2 }
 0xee4   : > { %v6218_v36 = vsel %vm3060_vm3, %v6210_v16, %v6180_v4 }
 0xee6   : > { %v6146_v31 = vpop.permute.xlu0 %6145  ;;  %v6120_v38 = vpop.permute.xlu1 %6119 }
 0xee7   : > { %v6209_v17 = vsel %vm3051_vm2, %v6201_v41, %v6146_v31  ;;  %v6204_v35 = vsel %vm794_vm1, %v11144_v22, %v6120_v38  ;;  %v11731_v41 = vld [vmem:[#allocation12_spill] sm:$0xff]  ;;  %v11732_v31 = vld [vmem:[#allocation13_spill] sm:$0xff] }
 0xee8   : > { %v6217_v24 = vsel %vm3060_vm3, %v6209_v17, %v6178_v59 }
 0xee9   : > { %8451 = vmatprep.mubr.msk.f32.mxu1 %vm600_vm0, %v6217_v24 }
 0xeea   : > { %8452 = vmatmul.mubr.msk.f32.vlgmr.msra.gmra.mxu1 %vm600_vm0, %v6218_v36  ;;  %v6118_v18 = vpop.permute.xlu0 %6117 }
 0xeeb   : > { %8484 = vmatpush3.msra.mxu1 %v11127_v47  ;;  %v6203_v33 = vsel %vm794_vm1, %v11147_v32, %v6118_v18  ;;  %v8887_v47 = vld [vmem:[%s11645_s11] sm:$0xff] }
 0xeec   : > { %8485 = vmatprep.subr.mxu1 %v8881_v51 }
 0xeed   : > { %8486 = vmatpush3.msra.mxu1 %v8881_v51 }
 0xeee   : > { %v6184_v27 = vpop.permute.xlu1 %6183  ;;  %8487 = vmatprep.subr.mxu1 %v8882_v20 }
 0xeef   : > { %8488 = vmatpush3.msra.mxu1 %v8882_v20 }
 0xef0   : > { %8489 = vmatprep.subr.mxu1 %v8883_v40 }
 0xef1   : > { %8490 = vmatpush3.msra.mxu1 %v8883_v40 }
 0xef2   : > { %v6182_v29 = vpop.permute.xlu0 %6181  ;;  %8491 = vmatprep.subr.mxu1 %v8884_v37  ;;  %v6152_v55 = vpop.permute.xlu1 %6151 }
 0xef3   : > { %8492 = vmatpush3.msra.mxu1 %v8884_v37  ;;  %v6212_v26 = vsel %vm3051_vm2, %v6204_v35, %v6152_v55 }
 0xef4   : > { %8493 = vmatprep.subr.mxu1 %v8885_v63  ;;  %v6220_v14 = vsel %vm3060_vm3, %v6212_v26, %v6184_v27  ;;  %v11733_v27 = vld [vmem:[#allocation2_spill] sm:$0xff] }
 0xef5   : > { %8494 = vmatpush3.msra.mxu1 %v8885_v63 }
 0xef6   : > { %v6150_v49 = vpop.permute.xlu0 %6149  ;;  %8495 = vmatprep.subr.mxu1 %v8886_v34  ;;  %v6124_v1 = vpop.permute.xlu1 %6123 }
 0xef7   : > { %v6211_v44 = vsel %vm3051_vm2, %v6203_v33, %v6150_v49  ;;  %8496 = vmatpush3.msra.mxu1 %v8886_v34  ;;  %v6206_v8 = vsel %vm794_vm1, %v11154_v3, %v6124_v1  ;;  %v11735_v49 = vld [vmem:[#allocation5_spill] sm:$0xff] }
 0xef8   : > { %v6219_v30 = vsel %vm3060_vm3, %v6211_v44, %v6182_v29  ;;  %8497 = vmatprep.subr.mxu1 %v8887_v47  ;;  %v11734_v29 = vld [vmem:[#allocation3_spill] sm:$0xff] }
 0xef9   : > { %8454 = vmatprep.mubr.msk.f32.mxu1 %vm600_vm0, %v6219_v30  ;;  %8498 = vmatpush3.msra.mxu1 %v8887_v47  ;;  %v11736_v30 = vld [vmem:[#allocation4_spill] sm:$0xff] }
 0xefa   : > { %8455 = vmatmul.mubr.msk.f32.gmra.mxu1 %vm600_vm0, %v6220_v14  ;;  %v6122_v12 = vpop.permute.xlu0 %6121 }
 0xefb   : > { %v6205_v13 = vsel %vm794_vm1, %v11156_v56, %v6122_v12 }
 0xf01   : > { %v6188_v11 = vpop.permute.xlu1 %6187 }
 0xf05   : > { %v6186_v57 = vpop.permute.xlu0 %6185  ;;  %v6156_v58 = vpop.permute.xlu1 %6155 }
 0xf06   : > { %v6214_v50 = vsel %vm3051_vm2, %v6206_v8, %v6156_v58 }
 0xf07   : > { %v6222_v22 = vsel %vm3060_vm3, %v6214_v50, %v6188_v11 }
 0xf09   : > { %v6154_v28 = vpop.permute.xlu0 %6153 }
 0xf0a   : > { %v6213_v21 = vsel %vm3051_vm2, %v6205_v13, %v6154_v28 }
 0xf0b   : > { %v6221_v0 = vsel %vm3060_vm3, %v6213_v21, %v6186_v57 }
 0xf0c   : > { %8457 = vmatprep.mubr.msk.f32.mxu1 %vm600_vm0, %v6221_v0 }
 0xf0d   : > { %8458 = vmatmul.mubr.msk.f32.gmra.mxu1 %vm600_vm0, %v6222_v22 }
 0xf11   : > { %v6126_v32 = vpop.permute.xlu0 %6125 }
 0xf12   : > { %v6128_v43 = vpop.permute.xlu1 %6127  ;;  %v6207_v46 = vsel %vm794_vm1, %v11166_v6, %v6126_v32 }
 0xf13   : > { %v6208_v7 = vsel %vm794_vm1, %v11164_v53, %v6128_v43 }
 0xf1b   : > { %v6160_v19 = vpop.permute.xlu1 %6159 }
 0xf1c   : > { %v6216_v56 = vsel %vm3051_vm2, %v6208_v7, %v6160_v19 }
 0xf1f   : > { %v6158_v48 = vpop.permute.xlu0 %6157  ;;  %v6192_v39 = vpop.permute.xlu1 %6191 }
 0xf20   : > { %v6215_v3 = vsel %vm3051_vm2, %v6207_v46, %v6158_v48  ;;  %v6224_v54 = vsel %vm3060_vm3, %v6216_v56, %v6192_v39 }
 0xf23   : > { %v6190_v62 = vpop.permute.xlu0 %6189 }
 0xf24   : > { %v6223_v52 = vsel %vm3060_vm3, %v6215_v3, %v6190_v62 }
 0xf25   : > { %8460 = vmatprep.mubr.msk.f32.mxu1 %vm600_vm0, %v6223_v52 }
 0xf26   : > { %8461 = vmatmul.mubr.msk.f32.gmra.mxu1 %vm600_vm0, %v6224_v54 }
 0xfaa   : > { %v8453_v5 = vpop.f32.mrf.mxu1 }
 0xfab   : > { %v6321_v42 = vadd.f32 %v8888_v15, %v8453_v5 }
 0xfac   : > { %v6315_v53 = vpop.f32.mrf.mxu1 }
 0xfad   : > { %v6355_v6 = vadd.f32 %v6321_v42, %v11729_v10  ;;  %v6316_v23 = vadd.f32 %v8888_v15, %v6315_v53 }
 0xfaf   : > { %v6354_v45 = vadd.f32 %v6316_v23, %v11730_v9  ;;  %v6367_v60 = vsel %vm600_vm0, %v6355_v6, 0.0 }
 0xfb0   : > { %6368 = vadd.xlane.f32.xlu1 %v6367_v60 }
 0xfb1   : > { %v6364_v25 = vsel %vm600_vm0, %v6354_v45, 0.0 }
 0xfb2   : > { %6365 = vadd.xlane.f32.xlu0 %v6364_v25 }
 0xfba   : > { %v8456_v4 = vpop.f32.mrf.mxu1 }
 0xfbb   : > { %v6331_v2 = vadd.f32 %v8888_v15, %v8456_v4 }
 0xfbc   : > { %v6325_v59 = vpop.f32.mrf.mxu1 }
 0xfbd   : > { %v6326_v61 = vadd.f32 %v8888_v15, %v6325_v59  ;;  %v6357_v17 = vadd.f32 %v6331_v2, %v11732_v31 }
 0xfbf   : > { %v6356_v16 = vadd.f32 %v6326_v61, %v11731_v41  ;;  %v6373_v36 = vsel %vm600_vm0, %v6357_v17, 0.0 }
 0xfc1   : > { %v6370_v24 = vsel %vm600_vm0, %v6356_v16, 0.0 }
 0xfc2   : > { %6371 = vadd.xlane.f32.xlu0 %v6370_v24 }
 0xfc6   : > { %6374 = vadd.xlane.f32.xlu0 %v6373_v36 }
 0xfcd   : > { %v8459_v38 = vpop.f32.mrf.mxu1 }
 0xfce   : > { %v6341_v51 = vadd.f32 %v8888_v15, %v8459_v38 }
 0xfcf   : > { %v6335_v18 = vpop.f32.mrf.mxu1 }
 0xfd0   : > { %v6359_v20 = vadd.f32 %v6341_v51, %v11733_v27  ;;  %v6336_v40 = vadd.f32 %v8888_v15, %v6335_v18 }
 0xfd2   : > { %v6358_v37 = vadd.f32 %v6336_v40, %v11734_v29  ;;  %v6379_v55 = vsel %vm600_vm0, %v6359_v20, 0.0 }
 0xfd3   : > { %6380 = vadd.xlane.f32.xlu0 %v6379_v55 }
 0xfd4   : > { %v6376_v63 = vsel %vm600_vm0, %v6358_v37, 0.0 }
 0xfd5   : > { %6377 = vadd.xlane.f32.xlu1 %v6376_v63 }
 0xfe6   : > { %v8462_v35 = vpop.f32.mrf.mxu1 }
 0xfe7   : > { %v6351_v33 = vadd.f32 %v8888_v15, %v8462_v35 }
 0xfe8   : > { %v6345_v26 = vpop.f32.mrf.mxu1 }
 0xfe9   : > { %v6361_v34 = vadd.f32 %v6351_v33, %v11735_v49  ;;  %v6346_v44 = vadd.f32 %v8888_v15, %v6345_v26  ;;  %v7470_v49 = vld [vmem:[%s11642_s8] ss:$0 sm:$0xff] }
 0xfeb   : > { %v6360_v47 = vadd.f32 %v6346_v44, %v11736_v30  ;;  %v6385_v14 = vsel %vm600_vm0, %v6361_v34, 0.0 }
 0xfec   : > { %6386 = vadd.xlane.f32.xlu0 %v6385_v14 }
 0xfed   : > { %v6382_v1 = vsel %vm600_vm0, %v6360_v47, 0.0 }
 0xfee   : > { %6383 = vadd.xlane.f32.xlu1 %v6382_v1 }
0x1039   : > { %v6369_v12 = vpop.xlane.xlu1 %6368 }
0x103a   : > { %v6389_v11 = vmul.f32 0.03125, %v6369_v12 }
0x103b   : > { %v6366_v57 = vpop.xlane.xlu0 %6365 }
0x103c   : > { %v6397_v58 = vsub.f32 %v6355_v6, %v6389_v11  ;;  %v6388_v8 = vmul.f32 0.03125, %v6366_v57 }
0x103e   : > { %v6396_v13 = vsub.f32 %v6354_v45, %v6388_v8  ;;  %v6405_v50 = vmul.f32 %v6397_v58, %v6397_v58 }
0x1040   : > { %v6415_v28 = vsel %vm600_vm0, %v6405_v50, 0.0  ;;  %v6404_v21 = vmul.f32 %v6396_v13, %v6396_v13 }
0x1041   : > { %6416 = vadd.xlane.f32.xlu0 %v6415_v28 }
0x1042   : > { %v6412_v0 = vsel %vm600_vm0, %v6404_v21, 0.0 }
0x1043   : > { %6413 = vadd.xlane.f32.xlu1 %v6412_v0 }
0x104b   : > { %v6372_v22 = vpop.xlane.xlu0 %6371 }
0x104c   : > { %v6390_v43 = vmul.f32 0.03125, %v6372_v22 }
0x104e   : > { %v11253_v32 = vsub.f32 %v6356_v16, %v6390_v43 }
0x104f   : > { %v6375_v19 = vpop.xlane.xlu0 %6374 }
0x1050   : > { %v6391_v48 = vmul.f32 0.03125, %v6375_v19  ;;  %v6406_v46 = vmul.f32 %v11253_v32, %v11253_v32 }
0x1052   : > { %v11257_v39 = vsub.f32 %v6357_v17, %v6391_v48  ;;  %v6418_v7 = vsel %vm600_vm0, %v6406_v46, 0.0 }
0x1053   : > { %6419 = vadd.xlane.f32.xlu1 %v6418_v7 }
0x1054   : > { %v6407_v3 = vmul.f32 %v11257_v39, %v11257_v39 }
0x1056   : > { %v6421_v62 = vsel %vm600_vm0, %v6407_v3, 0.0 }
0x1057   : > { %6422 = vadd.xlane.f32.xlu0 %v6421_v62 }
0x105c   : > { %v6381_v56 = vpop.xlane.xlu0 %6380 }
0x105d   : > { %v6393_v52 = vmul.f32 0.03125, %v6381_v56 }
0x105e   : > { %v6378_v54 = vpop.xlane.xlu1 %6377 }
0x105f   : > { %v11263_v5 = vsub.f32 %v6359_v20, %v6393_v52  ;;  %v6392_v15 = vmul.f32 0.03125, %v6378_v54  ;;  %v7469_v20 = vld [vmem:[%s11641_s7] ss:$0 sm:$0xff] }
0x1061   : > { %v11265_v42 = vsub.f32 %v6358_v37, %v6392_v15  ;;  %v6409_v53 = vmul.f32 %v11263_v5, %v11263_v5 }
0x1063   : > { %v6427_v10 = vsel %vm600_vm0, %v6409_v53, 0.0  ;;  %v6408_v6 = vmul.f32 %v11265_v42, %v11265_v42 }
0x1064   : > { %6428 = vadd.xlane.f32.xlu0 %v6427_v10 }
0x1065   : > { %v6424_v23 = vsel %vm600_vm0, %v6408_v6, 0.0 }
0x1066   : > { %6425 = vadd.xlane.f32.xlu1 %v6424_v23 }
0x1075   : > { %v6387_v9 = vpop.xlane.xlu0 %6386 }
0x1076   : > { %v6395_v45 = vmul.f32 0.03125, %v6387_v9 }
0x1077   : > { %v6384_v60 = vpop.xlane.xlu1 %6383 }
0x1078   : > { %v11273_v25 = vsub.f32 %v6361_v34, %v6395_v45  ;;  %v6394_v4 = vmul.f32 0.03125, %v6384_v60 }
0x107a   : > { %v11275_v59 = vsub.f32 %v6360_v47, %v6394_v4  ;;  %v6411_v2 = vmul.f32 %v11273_v25, %v11273_v25 }
0x107c   : > { %v6433_v61 = vsel %vm600_vm0, %v6411_v2, 0.0  ;;  %v6410_v41 = vmul.f32 %v11275_v59, %v11275_v59 }
0x107d   : > { %6434 = vadd.xlane.f32.xlu0 %v6433_v61  ;;  %v8889_v61 = vld [vmem:[%s11644_s10] ss:$0 sm:$0xff] }
0x107e   : > { %v6430_v16 = vsel %vm600_vm0, %v6410_v41, 0.0 }
0x107f   : > { %6431 = vadd.xlane.f32.xlu1 %v6430_v16 }
0x10ca   : > { %v6417_v31 = vpop.xlane.xlu0 %6416 }
0x10cb   : > { %v6437_v17 = vmul.f32 0.03125, %v6417_v31 }
0x10cc   : > { %v6414_v24 = vpop.xlane.xlu1 %6413 }
0x10cd   : > { %v6445_v36 = vadd.f32 1e-05, %v6437_v17  ;;  %v6436_v38 = vmul.f32 0.03125, %v6414_v24 }
0x10cf   : > { %8831 = vrsqrt.f32 %v6445_v36  ;;  %v6444_v51 = vadd.f32 1e-05, %v6436_v38 }
0x10d1   : > { %8833 = vrsqrt.f32 %v6444_v51 }
0x10dc   : > { %v8832_v18 = vpop.eup %8831  ;;  %v6420_v27 = vpop.xlane.xlu1 %6419 }
0x10dd   : > { %v6461_v40 = vmul.f32 %v8832_v18, %v6397_v58  ;;  %v6438_v29 = vmul.f32 0.03125, %v6420_v27 }
0x10de   : > { %v8834_v37 = vpop.eup %8833 }
0x10df   : > { %v6446_v55 = vadd.f32 1e-05, %v6438_v29  ;;  %v6460_v63 = vmul.f32 %v8834_v37, %v6396_v13  ;;  %v6475_v35 = vmul.f32 %v7469_v20, %v6461_v40 }
0x10e0   : > { %v6423_v33 = vpop.xlane.xlu0 %6422 }
0x10e1   : > { %8835 = vrsqrt.f32 %v6446_v55  ;;  %v6439_v26 = vmul.f32 0.03125, %v6423_v33  ;;  %v6474_v34 = vmul.f32 %v7469_v20, %v6460_v63  ;;  %v6489_v47 = vadd.f32 %v7470_v49, %v6475_v35 }
0x10e3   : > { %v6447_v44 = vadd.f32 1e-05, %v6439_v26  ;;  %v6488_v30 = vadd.f32 %v7470_v49, %v6474_v34 }
0x10e5   : > { %8837 = vrsqrt.f32 %v6447_v44  ;;  %8471 = vmatprep.mubr.msk.f32.mxu0 %vm600_vm0, %v6488_v30  ;;  %v8890_v30 = vld [vmem:[%s11646_s12] ss:$0 sm:$0xff] }
0x10e6   : > { %8472 = vmatmul.mubr.msk.f32.vlgmr.msra.gmra.mxu0 %vm600_vm0, %v6489_v47 }
0x10ed   : > { %v6429_v1 = vpop.xlane.xlu0 %6428 }
0x10ee   : > { %v8836_v14 = vpop.eup %8835  ;;  %v6441_v12 = vmul.f32 0.03125, %v6429_v1 }
0x10ef   : > { %v6462_v11 = vmul.f32 %v8836_v14, %v11253_v32  ;;  %v6426_v57 = vpop.xlane.xlu1 %6425 }
0x10f0   : > { %v6449_v58 = vadd.f32 1e-05, %v6441_v12  ;;  %v6440_v8 = vmul.f32 0.03125, %v6426_v57 }
0x10f1   : > { %v6476_v13 = vmul.f32 %v7469_v20, %v6462_v11 }
0x10f2   : > { %v8838_v50 = vpop.eup %8837  ;;  %8839 = vrsqrt.f32 %v6449_v58  ;;  %v6448_v28 = vadd.f32 1e-05, %v6440_v8 }
0x10f3   : > { %v6490_v21 = vadd.f32 %v7470_v49, %v6476_v13  ;;  %v6463_v0 = vmul.f32 %v8838_v50, %v11257_v39 }
0x10f4   : > { %8841 = vrsqrt.f32 %v6448_v28 }
0x10f5   : > { %8474 = vmatprep.mubr.msk.f32.mxu0 %vm600_vm0, %v6490_v21  ;;  %v6477_v22 = vmul.f32 %v7469_v20, %v6463_v0 }
0x10f7   : > { %v6491_v43 = vadd.f32 %v7470_v49, %v6477_v22 }
0x10f9   : > { %8475 = vmatmul.mubr.msk.f32.gmra.mxu0 %vm600_vm0, %v6491_v43 }
0x10ff   : > { %v8840_v19 = vpop.eup %8839 }
0x1100   : > { %v6465_v32 = vmul.f32 %v8840_v19, %v11263_v5 }
0x1101   : > { %v8842_v48 = vpop.eup %8841 }
0x1102   : > { %v6464_v46 = vmul.f32 %v8842_v48, %v11265_v42  ;;  %v6479_v7 = vmul.f32 %v7469_v20, %v6465_v32 }
0x1104   : > { %v6478_v3 = vmul.f32 %v7469_v20, %v6464_v46  ;;  %v6493_v54 = vadd.f32 %v7470_v49, %v6479_v7 }
0x1106   : > { %v6435_v62 = vpop.xlane.xlu0 %6434  ;;  %v6492_v56 = vadd.f32 %v7470_v49, %v6478_v3 }
0x1107   : > { %v6443_v52 = vmul.f32 0.03125, %v6435_v62 }
0x1108   : > { %8477 = vmatprep.mubr.msk.f32.mxu0 %vm600_vm0, %v6492_v56  ;;  %v6432_v39 = vpop.xlane.xlu1 %6431 }
0x1109   : > { %v6451_v15 = vadd.f32 1e-05, %v6443_v52  ;;  %v6442_v53 = vmul.f32 0.03125, %v6432_v39  ;;  %8478 = vmatmul.mubr.msk.f32.gmra.mxu0 %vm600_vm0, %v6493_v54 }
0x110b   : > { %8843 = vrsqrt.f32 %v6451_v15  ;;  %v6450_v10 = vadd.f32 1e-05, %v6442_v53 }
0x110d   : > { %8845 = vrsqrt.f32 %v6450_v10 }
0x1118   : > { %v8844_v5 = vpop.eup %8843 }
0x1119   : > { %v6467_v6 = vmul.f32 %v8844_v5, %v11273_v25 }
0x111a   : > { %v8846_v42 = vpop.eup %8845 }
0x111b   : > { %v6466_v23 = vmul.f32 %v8846_v42, %v11275_v59  ;;  %v6481_v9 = vmul.f32 %v7469_v20, %v6467_v6 }
0x111d   : > { %v6480_v45 = vmul.f32 %v7469_v20, %v6466_v23  ;;  %v6495_v4 = vadd.f32 %v7470_v49, %v6481_v9 }
0x111f   : > { %v6494_v60 = vadd.f32 %v7470_v49, %v6480_v45 }
0x1121   : > { %8480 = vmatprep.mubr.msk.f32.mxu0 %vm600_vm0, %v6494_v60 }
0x1122   : > { %8481 = vmatmul.mubr.msk.f32.gmra.mxu0 %vm600_vm0, %v6495_v4 }
0x11a6   : > { %v8473_v2 = vpop.f32.mrf.mxu0 }
0x11a7   : > { %v6592_v41 = vadd.f32 %v8889_v61, %v8473_v2 }
0x11a8   : > { %v6586_v16 = vpop.f32.mrf.mxu0 }
0x11a9   : > { %v6587_v31 = vadd.f32 %v8889_v61, %v6586_v16  ;;  %v6626_v17 = vmax.f32 %v6592_v41, 0.0 }
0x11ab   : > { %v6625_v25 = vmax.f32 %v6587_v31, 0.0 }
0x11ad   : > { %8499 = vmatprep.mubr.msk.f32.mxu1 %vm3496_vm4, %v6625_v25 }
0x11ae   : > { %8500 = vmatmul.mubr.msk.f32.vlgmr.msra.gmra.mxu1 %vm3496_vm4, %v6626_v17 }
0x11b9   : > { %v8476_v59 = vpop.f32.mrf.mxu0 }
0x11ba   : > { %v6602_v24 = vadd.f32 %v8889_v61, %v8476_v59 }
0x11bb   : > { %v6596_v36 = vpop.f32.mrf.mxu0 }
0x11bc   : > { %v6597_v38 = vadd.f32 %v8889_v61, %v6596_v36  ;;  %v6628_v18 = vmax.f32 %v6602_v24, 0.0 }
0x11be   : > { %v6627_v51 = vmax.f32 %v6597_v38, 0.0 }
0x11c0   : > { %8502 = vmatprep.mubr.msk.f32.mxu1 %vm3496_vm4, %v6627_v51 }
0x11c1   : > { %8503 = vmatmul.mubr.msk.f32.gmra.mxu1 %vm3496_vm4, %v6628_v18 }
0x11c9   : > { %v8479_v27 = vpop.f32.mrf.mxu0 }
0x11ca   : > { %v6612_v20 = vadd.f32 %v8889_v61, %v8479_v27 }
0x11cb   : > { %v6606_v40 = vpop.f32.mrf.mxu0 }
0x11cc   : > { %v6607_v29 = vadd.f32 %v8889_v61, %v6606_v40  ;;  %v6630_v55 = vmax.f32 %v6612_v20, 0.0 }
0x11ce   : > { %v6629_v37 = vmax.f32 %v6607_v29, 0.0 }
0x11d0   : > { %8505 = vmatprep.mubr.msk.f32.mxu1 %vm3496_vm4, %v6629_v37 }
0x11d1   : > { %8506 = vmatmul.mubr.msk.f32.gmra.mxu1 %vm3496_vm4, %v6630_v55 }
0x11e2   : > { %v8482_v63 = vpop.f32.mrf.mxu0 }
0x11e3   : > { %v6622_v35 = vadd.f32 %v8889_v61, %v8482_v63 }
0x11e4   : > { %v6616_v33 = vpop.f32.mrf.mxu0 }
0x11e5   : > { %v6617_v26 = vadd.f32 %v8889_v61, %v6616_v33  ;;  %v6632_v34 = vmax.f32 %v6622_v35, 0.0 }
0x11e7   : > { %v6631_v49 = vmax.f32 %v6617_v26, 0.0 }
0x11e9   : > { %8508 = vmatprep.mubr.msk.f32.mxu1 %vm3496_vm4, %v6631_v49 }
0x11ea   : > { %8509 = vmatmul.mubr.msk.f32.gmra.mxu1 %vm3496_vm4, %v6632_v34 }
0x126e   : > { %v8501_v44 = vpop.f32.mrf.mxu1 }
0x126f   : > { %v6729_v47 = vadd.f32 %v8890_v30, %v8501_v44 }
0x1270   : > { %v6723_v14 = vpop.f32.mrf.mxu1 }
0x1271   : > { %v6724_v1 = vadd.f32 %v8890_v30, %v6723_v14  ;;  %v6767_v12 = vsel %vm600_vm0, %v6729_v47, 0.0  ;;  %v7080_v14 = vld [vmem:[%s11649_s15 + $0xf0] sm:$0xff] }
0x1272   : > { %6768 = vadd.xlane.f32.xlu0 %v6767_v12  ;;  %v7079_v12 = vld [vmem:[%s11649_s15 + $0xe8] sm:$0xff] }
0x1273   : > { %v6764_v11 = vsel %vm600_vm0, %v6724_v1, 0.0 }
0x1274   : > { %6765 = vadd.xlane.f32.xlu1 %v6764_v11  ;;  %v7063_v11 = vld [vmem:[%s11649_s15 + $0x68] sm:$0xff] }
0x1281   : > { %v8504_v57 = vpop.f32.mrf.mxu1 }
0x1282   : > { %v6739_v58 = vadd.f32 %v8890_v30, %v8504_v57  ;;  %v7078_v57 = vld [vmem:[%s11649_s15 + $0xe0] sm:$0xff] }
0x1283   : > { %v6733_v8 = vpop.f32.mrf.mxu1 }
0x1284   : > { %v6734_v13 = vadd.f32 %v8890_v30, %v6733_v8  ;;  %v6773_v50 = vsel %vm600_vm0, %v6739_v58, 0.0  ;;  %v7077_v8 = vld [vmem:[%s11649_s15 + $0xd8] sm:$0xff] }
0x1285   : > { %6774 = vadd.xlane.f32.xlu0 %v6773_v50  ;;  %v7076_v50 = vld [vmem:[%s11649_s15 + $0xd0] sm:$0xff] }
0x1286   : > { %v6770_v28 = vsel %vm600_vm0, %v6734_v13, 0.0 }
0x1287   : > { %6771 = vadd.xlane.f32.xlu1 %v6770_v28  ;;  %v7060_v28 = vld [vmem:[%s11649_s15 + $0x50] sm:$0xff] }
0x1291   : > { %v8507_v21 = vpop.f32.mrf.mxu1 }
0x1292   : > { %v6749_v0 = vadd.f32 %v8890_v30, %v8507_v21  ;;  %v7075_v21 = vld [vmem:[%s11649_s15 + $0xc8] sm:$0xff] }
0x1293   : > { %v6743_v22 = vpop.f32.mrf.mxu1 }
0x1294   : > { %v6744_v43 = vadd.f32 %v8890_v30, %v6743_v22  ;;  %v6779_v19 = vsel %vm600_vm0, %v6749_v0, 0.0  ;;  %v7074_v22 = vld [vmem:[%s11649_s15 + $0xc0] sm:$0xff] }
0x1295   : > { %6780 = vadd.xlane.f32.xlu0 %v6779_v19  ;;  %v7073_v19 = vld [vmem:[%s11649_s15 + $0xb8] sm:$0xff] }
0x1296   : > { %v6776_v32 = vsel %vm600_vm0, %v6744_v43, 0.0 }
0x1297   : > { %6777 = vadd.xlane.f32.xlu1 %v6776_v32  ;;  %v7057_v32 = vld [vmem:[%s11649_s15 + $0x38] sm:$0xff] }
0x12aa   : > { %v8510_v48 = vpop.f32.mrf.mxu1 }
0x12ab   : > { %v6759_v46 = vadd.f32 %v8890_v30, %v8510_v48  ;;  %v7072_v48 = vld [vmem:[%s11649_s15 + $0xb0] sm:$0xff] }
0x12ac   : > { %v6753_v7 = vpop.f32.mrf.mxu1 }
0x12ad   : > { %v6754_v3 = vadd.f32 %v8890_v30, %v6753_v7  ;;  %v6785_v62 = vsel %vm600_vm0, %v6759_v46, 0.0  ;;  %v7081_v30 = vld [vmem:[%s11649_s15 + $0xf8] sm:$0xff]  ;;  %v7071_v7 = vld [vmem:[%s11649_s15 + $0xa8] sm:$0xff] }
0x12ae   : > { %6786 = vadd.xlane.f32.xlu0 %v6785_v62  ;;  %7852 = vmatprep.subr.mxu0 %v7081_v30  ;;  %v7070_v62 = vld [vmem:[%s11649_s15 + $0xa0] sm:$0xff] }
0x12af   : > { %v6782_v56 = vsel %vm600_vm0, %v6754_v3, 0.0 }
0x12b0   : > { %6783 = vadd.xlane.f32.xlu1 %v6782_v56  ;;  %v7054_v56 = vld [vmem:[%s11649_s15 + $0x20] sm:$0xff] }
0x12fb   : > { %v6769_v52 = vpop.xlane.xlu0 %6768 }
0x12fc   : > { %v6789_v54 = vmul.f32 0.03125, %v6769_v52 }
0x12fd   : > { %v6766_v39 = vpop.xlane.xlu1 %6765 }
0x12fe   : > { %v11325_v15 = vsub.f32 %v6729_v47, %v6789_v54  ;;  %v6788_v53 = vmul.f32 0.03125, %v6766_v39  ;;  %v7065_v47 = vld [vmem:[%s11649_s15 + $0x78] sm:$0xff] }
0x12ff   : > { %7853 = vmatpush3.msra.mxu0 %v7065_v47 }
0x1300   : > { %v11327_v10 = vsub.f32 %v6724_v1, %v6788_v53  ;;  %v6805_v5 = vmul.f32 %v11325_v15, %v11325_v15  ;;  %v7064_v1 = vld [vmem:[%s11649_s15 + $0x70] sm:$0xff]  ;;  %7854 = vmatprep.subr.mxu0 %v7080_v14 }
0x1301   : > { %7855 = vmatpush3.msra.mxu0 %v7064_v1 }
0x1302   : > { %v6815_v6 = vsel %vm600_vm0, %v6805_v5, 0.0  ;;  %v6804_v42 = vmul.f32 %v11327_v10, %v11327_v10  ;;  %7856 = vmatprep.subr.mxu0 %v7079_v12 }
0x1303   : > { %6816 = vadd.xlane.f32.xlu0 %v6815_v6  ;;  %7857 = vmatpush3.msra.mxu0 %v7063_v11 }
0x1304   : > { %v6812_v23 = vsel %vm600_vm0, %v6804_v42, 0.0  ;;  %7858 = vmatprep.subr.mxu0 %v7078_v57 }
0x1305   : > { %6813 = vadd.xlane.f32.xlu1 %v6812_v23  ;;  %v11440_v23 = vld [vmem:[%s11647_s13] ss:$0 sm:$0xff] }
0x130e   : > { %v6775_v9 = vpop.xlane.xlu0 %6774 }
0x130f   : > { %v6791_v45 = vmul.f32 0.03125, %v6775_v9 }
0x1310   : > { %v6772_v60 = vpop.xlane.xlu1 %6771 }
0x1311   : > { %v11335_v4 = vsub.f32 %v6739_v58, %v6791_v45  ;;  %v6790_v2 = vmul.f32 0.03125, %v6772_v60  ;;  %v7062_v58 = vld [vmem:[%s11649_s15 + $0x60] sm:$0xff] }
0x1312   : > { %7859 = vmatpush3.msra.mxu0 %v7062_v58 }
0x1313   : > { %v11337_v61 = vsub.f32 %v6734_v13, %v6790_v2  ;;  %v6807_v41 = vmul.f32 %v11335_v4, %v11335_v4  ;;  %v7061_v13 = vld [vmem:[%s11649_s15 + $0x58] sm:$0xff]  ;;  %7860 = vmatprep.subr.mxu0 %v7077_v8  ;;  %v11446_v2 = vld [vmem:[%s11648_s14] ss:$0 sm:$0xff] }
0x1314   : > { %7861 = vmatpush3.msra.mxu0 %v7061_v13 }
0x1315   : > { %v6821_v16 = vsel %vm600_vm0, %v6807_v41, 0.0  ;;  %v6806_v31 = vmul.f32 %v11337_v61, %v11337_v61  ;;  %7862 = vmatprep.subr.mxu0 %v7076_v50 }
0x1316   : > { %6822 = vadd.xlane.f32.xlu0 %v6821_v16  ;;  %7863 = vmatpush3.msra.mxu0 %v7060_v28 }
0x1317   : > { %v6818_v25 = vsel %vm600_vm0, %v6806_v31, 0.0  ;;  %7864 = vmatprep.subr.mxu0 %v7075_v21 }
0x1318   : > { %6819 = vadd.xlane.f32.xlu1 %v6818_v25 }
0x131e   : > { %v6781_v17 = vpop.xlane.xlu0 %6780 }
0x131f   : > { %v6793_v59 = vmul.f32 0.03125, %v6781_v17 }
0x1320   : > { %v6778_v24 = vpop.xlane.xlu1 %6777 }
0x1321   : > { %v11345_v36 = vsub.f32 %v6749_v0, %v6793_v59  ;;  %v6792_v38 = vmul.f32 0.03125, %v6778_v24  ;;  %v7059_v0 = vld [vmem:[%s11649_s15 + $0x48] sm:$0xff] }
0x1322   : > { %7865 = vmatpush3.msra.mxu0 %v7059_v0 }
0x1323   : > { %v11347_v51 = vsub.f32 %v6744_v43, %v6792_v38  ;;  %v6809_v18 = vmul.f32 %v11345_v36, %v11345_v36  ;;  %v7058_v43 = vld [vmem:[%s11649_s15 + $0x40] sm:$0xff]  ;;  %7866 = vmatprep.subr.mxu0 %v7074_v22 }
0x1324   : > { %7867 = vmatpush3.msra.mxu0 %v7058_v43 }
0x1325   : > { %v6827_v27 = vsel %vm600_vm0, %v6809_v18, 0.0  ;;  %v6808_v20 = vmul.f32 %v11347_v51, %v11347_v51  ;;  %7868 = vmatprep.subr.mxu0 %v7073_v19 }
0x1326   : > { %6828 = vadd.xlane.f32.xlu0 %v6827_v27  ;;  %7869 = vmatpush3.msra.mxu0 %v7057_v32 }
0x1327   : > { %v6824_v40 = vsel %vm600_vm0, %v6808_v20, 0.0  ;;  %7870 = vmatprep.subr.mxu0 %v7072_v48 }
0x1328   : > { %6825 = vadd.xlane.f32.xlu1 %v6824_v40 }
0x1337   : > { %v6787_v29 = vpop.xlane.xlu0 %6786 }
0x1338   : > { %v6795_v37 = vmul.f32 0.03125, %v6787_v29 }
0x1339   : > { %v6784_v55 = vpop.xlane.xlu1 %6783 }
0x133a   : > { %v11355_v63 = vsub.f32 %v6759_v46, %v6795_v37  ;;  %v6794_v35 = vmul.f32 0.03125, %v6784_v55  ;;  %v7056_v46 = vld [vmem:[%s11649_s15 + $0x30] sm:$0xff] }
0x133b   : > { %7871 = vmatpush3.msra.mxu0 %v7056_v46 }
0x133c   : > { %v11357_v33 = vsub.f32 %v6754_v3, %v6794_v35  ;;  %v6811_v26 = vmul.f32 %v11355_v63, %v11355_v63  ;;  %v7055_v3 = vld [vmem:[%s11649_s15 + $0x28] sm:$0xff]  ;;  %7872 = vmatprep.subr.mxu0 %v7071_v7 }
0x133d   : > { %7873 = vmatpush3.msra.mxu0 %v7055_v3 }
0x133e   : > { %v6833_v49 = vsel %vm600_vm0, %v6811_v26, 0.0  ;;  %v6810_v34 = vmul.f32 %v11357_v33, %v11357_v33  ;;  %7874 = vmatprep.subr.mxu0 %v7070_v62 }
0x133f   : > { %6834 = vadd.xlane.f32.xlu0 %v6833_v49  ;;  %7875 = vmatpush3.msra.mxu0 %v7054_v56 }
0x1340   : > { %v6830_v44 = vsel %vm600_vm0, %v6810_v34, 0.0 }
0x1341   : > { %6831 = vadd.xlane.f32.xlu1 %v6830_v44 }
0x138c   : > { %v6817_v52 = vpop.xlane.xlu0 %6816 }
0x138d   : > { %v6837_v54 = vmul.f32 0.03125, %v6817_v52 }
0x138e   : > { %v6814_v39 = vpop.xlane.xlu1 %6813 }
0x138f   : > { %v6845_v53 = vadd.f32 1e-05, %v6837_v54  ;;  %v6836_v5 = vmul.f32 0.03125, %v6814_v39 }
0x1391   : > { %8847 = vrsqrt.f32 %v6845_v53  ;;  %v6844_v6 = vadd.f32 1e-05, %v6836_v5 }
0x1393   : > { %8849 = vrsqrt.f32 %v6844_v6 }
0x139e   : > { %v8848_v42 = vpop.eup %8847 }
0x139f   : > { %v6861_v9 = vmul.f32 %v8848_v42, %v11325_v15  ;;  %v6823_v45 = vpop.xlane.xlu0 %6822 }
0x13a0   : > { %v8850_v60 = vpop.eup %8849  ;;  %v6839_v41 = vmul.f32 0.03125, %v6823_v45 }
0x13a1   : > { %v6875_v16 = vmul.f32 %v11440_v23, %v6861_v9  ;;  %v6860_v31 = vmul.f32 %v8850_v60, %v11327_v10  ;;  %v6820_v25 = vpop.xlane.xlu1 %6819 }
0x13a2   : > { %v6847_v17 = vadd.f32 1e-05, %v6839_v41  ;;  %v6838_v59 = vmul.f32 0.03125, %v6820_v25 }
0x13a3   : > { %v11451_v24 = vadd.f32 %v11446_v2, %v6875_v16  ;;  %v6874_v15 = vmul.f32 %v11440_v23, %v6860_v31 }
0x13a4   : > { %8851 = vrsqrt.f32 %v6847_v17  ;;  %v6846_v38 = vadd.f32 1e-05, %v6838_v59 }
0x13a5   : > { %v11455_v18 = vadd.f32 %v11446_v2, %v6874_v15  ;;  %v6904_v27 = vrot.slane %v11451_v24, 7  ;;  %v6978_v40 = vrot.slane %v11451_v24, 3  ;;  %v6993_v53 = vrot.slane %v11451_v24, 4 }
0x13a6   : > { %8853 = vrsqrt.f32 %v6846_v38  ;;  %v6961_v59 = vrot.slane %v11451_v24, 2  ;;  %v7027_v15 = vrot.slane %v11451_v24, 6 }
0x13a7   : > { %v6906_v10 = vsel %vm6905_vm5, %v6904_v27, %v11455_v18  ;;  %v6977_v20 = vrot.slane %v11455_v18, 4  ;;  %v6943_v5 = vrot.slane %v11455_v18, 2  ;;  %v7009_v6 = vrot.slane %v11455_v18, 6 }
0x13a8   : > { %v6926_v9 = vrot.slane %v11455_v18, 1  ;;  %v6992_v16 = vrot.slane %v11455_v18, 5  ;;  %v6960_v31 = vrot.slane %v11455_v18, 3  ;;  %v7026_v25 = vrot.slane %v11455_v18, 7 }
0x13a9   : > { %v6979_v29 = vsel %vm6905_vm5, %v6978_v40, %v6977_v20 }
0x13af   : > { %v6829_v37 = vpop.xlane.xlu0 %6828 }
0x13b0   : > { %v6841_v35 = vmul.f32 0.03125, %v6829_v37 }
0x13b1   : > { %v8852_v55 = vpop.eup %8851  ;;  %v6826_v49 = vpop.xlane.xlu1 %6825 }
0x13b2   : > { %v6863_v26 = vmul.f32 %v8852_v55, %v11335_v4  ;;  %v6849_v44 = vadd.f32 1e-05, %v6841_v35  ;;  %v6840_v30 = vmul.f32 0.03125, %v6826_v49  ;;  %v6927_v35 = vsel %vm6905_vm5, %v11451_v24, %v6926_v9 }
0x13b3   : > { %v8854_v34 = vpop.eup %8853  ;;  %v6962_v49 = vsel %vm6905_vm5, %v6961_v59, %v6960_v31 }
0x13b4   : > { %v6862_v47 = vmul.f32 %v8854_v34, %v11337_v61  ;;  %v6877_v14 = vmul.f32 %v11440_v23, %v6863_v26  ;;  %8855 = vrsqrt.f32 %v6849_v44  ;;  %v6848_v1 = vadd.f32 1e-05, %v6840_v30 }
0x13b5   : > { %v6994_v26 = vsel %vm6905_vm5, %v6993_v53, %v6992_v16  ;;  %v7028_v34 = vsel %vm6905_vm5, %v7027_v15, %v7026_v25 }
0x13b6   : > { %v6876_v12 = vmul.f32 %v11440_v23, %v6862_v47  ;;  %8857 = vrsqrt.f32 %v6848_v1  ;;  %v11471_v57 = vadd.f32 %v11446_v2, %v6877_v14 }
0x13b8   : > { %v11468_v11 = vadd.f32 %v11446_v2, %v6876_v12  ;;  %v6910_v61 = vrot.slane %v11471_v57, 5  ;;  %v6982_v8 = vrot.slane %v11471_v57, 1  ;;  %v6947_v30 = vrot.slane %v11471_v57, 7 }
0x13b9   : > { %v7014_v47 = vrot.slane %v11471_v57, 3  ;;  %v6930_v14 = vrot.slane %v11471_v57, 6 }
0x13ba   : > { %v6907_v4 = vrot.slane %v11468_v11, 6  ;;  %v6980_v58 = vrot.slane %v11468_v11, 2  ;;  %v6928_v20 = vrot.slane %v11468_v11, 7  ;;  %v6995_v40 = vrot.slane %v11468_v11, 3 }
0x13bb   : > { %v6963_v18 = vrot.slane %v11468_v11, 1  ;;  %v7029_v55 = vrot.slane %v11468_v11, 5 }
0x13bc   : > { %v6909_v13 = vsel %vm6908_vm6, %v6907_v4, %v6906_v10  ;;  %v6981_v50 = vsel %vm6908_vm6, %v6980_v58, %v6979_v29  ;;  %v7012_v10 = vrot.slane %v11468_v11, 4  ;;  %v6929_v12 = vsel %vm6908_vm6, %v6928_v20, %v6927_v35 }
0x13bd   : > { %v6912_v28 = vsel %vm6911_vm7, %v6910_v61, %v6909_v13  ;;  %v6983_v21 = vsel %vm6911_vm7, %v6982_v8, %v6981_v50  ;;  %v6964_v4 = vsel %vm6908_vm6, %v6963_v18, %v6962_v49  ;;  %v7030_v8 = vsel %vm6908_vm6, %v7029_v55, %v7028_v34  ;;  %v7051_v55 = vld [vmem:[%s11649_s15 + $0x8] sm:$0xff]  ;;  %v7066_v34 = vld [vmem:[%s11649_s15 + $0x80] sm:$0xff] }
0x13be   : > { %v6997_v13 = vrot.slane %v11471_v57, 2 }
0x13c1   : > { %v8856_v0 = vpop.eup %8855 }
0x13c2   : > { %v6865_v43 = vmul.f32 %v8856_v0, %v11345_v36  ;;  %v6944_v36 = vrot.slane %v11451_v24, 1 }
0x13c3   : > { %v8858_v22 = vpop.eup %8857 }
0x13c4   : > { %v6864_v19 = vmul.f32 %v8858_v22, %v11347_v51  ;;  %v6879_v48 = vmul.f32 %v11440_v23, %v6865_v43  ;;  %v7010_v51 = vrot.slane %v11451_v24, 5  ;;  %v6945_v29 = vsel %vm6905_vm5, %v6944_v36, %v6943_v5 }
0x13c5   : > { %v6946_v44 = vsel %vm6908_vm6, %v11468_v11, %v6945_v29  ;;  %v6996_v24 = vsel %vm6908_vm6, %v6995_v40, %v6994_v26 }
0x13c6   : > { %v6878_v32 = vmul.f32 %v11440_v23, %v6864_v19  ;;  %v11489_v54 = vadd.f32 %v11446_v2, %v6879_v48  ;;  %v7011_v37 = vsel %vm6905_vm5, %v7010_v51, %v7009_v6  ;;  %v6948_v22 = vsel %vm6911_vm7, %v6947_v30, %v6946_v44 }
0x13c7   : > { %v7013_v1 = vsel %vm6908_vm6, %v7012_v10, %v7011_v37  ;;  %v6931_v19 = vsel %vm6911_vm7, %v6930_v14, %v6929_v12  ;;  %v7050_v14 = vld [vmem:[%s11649_s15] sm:$0xff] }
0x13c8   : > { %v6835_v46 = vpop.xlane.xlu0 %6834  ;;  %v11486_v62 = vadd.f32 %v11446_v2, %v6878_v32  ;;  %v6916_v45 = vrot.slane %v11489_v54, 3  ;;  %v6985_v41 = vrot.slane %v11489_v54, 7  ;;  %v7015_v43 = vsel %vm6911_vm7, %v7014_v47, %v7013_v1 }
0x13c9   : > { %v6843_v7 = vmul.f32 0.03125, %v6835_v46  ;;  %v6998_v46 = vsel %vm6911_vm7, %v6997_v13, %v6996_v24  ;;  %v6934_v6 = vrot.slane %v11489_v54, 4  ;;  %v7035_v25 = vrot.slane %v11489_v54, 2 }
0x13ca   : > { %v6832_v3 = vpop.xlane.xlu1 %6831  ;;  %v6913_v42 = vrot.slane %v11486_v62, 4  ;;  %v6984_v60 = vsel %vm6914_vm8, %v11486_v62, %v6983_v21  ;;  %v6949_v58 = vrot.slane %v11486_v62, 6  ;;  %v7016_v61 = vrot.slane %v11486_v62, 2 }
0x13cb   : > { %v6851_v56 = vadd.f32 1e-05, %v6843_v7  ;;  %v6842_v52 = vmul.f32 0.03125, %v6832_v3  ;;  %v11512_v27 = vsel %vm6917_vm9, %v6985_v41, %v6984_v60  ;;  %v6932_v11 = vrot.slane %v11486_v62, 5  ;;  %v7068_v60 = vld [vmem:[%s11649_s15 + $0x90] sm:$0xff] }
0x13cc   : > { %v6915_v17 = vsel %vm6914_vm8, %v6913_v42, %v6912_v28  ;;  %v6999_v50 = vrot.slane %v11486_v62, 1  ;;  %v6966_v28 = vrot.slane %v11486_v62, 7  ;;  %v7031_v21 = vrot.slane %v11471_v57, 4 }
0x13cd   : > { %8859 = vrsqrt.f32 %v6851_v56  ;;  %v6850_v39 = vadd.f32 1e-05, %v6842_v52  ;;  %v11509_v38 = vsel %vm6917_vm9, %v6916_v45, %v6915_v17  ;;  %v7033_v32 = vrot.slane %v11486_v62, 3  ;;  %v7069_v45 = vld [vmem:[%s11649_s15 + $0x98] sm:$0xff]  ;;  %v7052_v17 = vld [vmem:[%s11649_s15 + $0x10] sm:$0xff] }
0x13ce   : > { %v6965_v7 = vsel %vm6911_vm7, %v11471_v57, %v6964_v4  ;;  %v7032_v3 = vsel %vm6911_vm7, %v7031_v21, %v7030_v8  ;;  %v6950_v52 = vsel %vm6914_vm8, %v6949_v58, %v6948_v22  ;;  %v7017_v36 = vsel %vm6914_vm8, %v7016_v61, %v7015_v43  ;;  %7876 = vmatprep.subr.mxu0 %v7069_v45 }
0x13cf   : > { %8861 = vrsqrt.f32 %v6850_v39  ;;  %v6951_v39 = vrot.slane %v11489_v54, 5  ;;  %v6933_v51 = vsel %vm6914_vm8, %v6932_v11, %v6931_v19  ;;  %v7000_v53 = vsel %vm6914_vm8, %v6999_v50, %v6998_v46 }
0x13d0   : > { %v6967_v5 = vsel %vm6914_vm8, %v6966_v28, %v6965_v7  ;;  %v7018_v57 = vrot.slane %v11489_v54, 1  ;;  %v6968_v42 = vrot.slane %v11489_v54, 6  ;;  %v7034_v9 = vsel %vm6914_vm8, %v7033_v32, %v7032_v3 }
0x13d1   : > { %v6952_v31 = vsel %vm6917_vm9, %v6951_v39, %v6950_v52  ;;  %v6935_v15 = vsel %vm6917_vm9, %v6934_v6, %v6933_v51  ;;  %v7001_v10 = vsel %vm6917_vm9, %v11489_v54, %v7000_v53  ;;  %v7036_v37 = vsel %vm6917_vm9, %v7035_v25, %v7034_v9 }
0x13d2   : > { %v7019_v59 = vsel %vm6917_vm9, %v7018_v57, %v7017_v36  ;;  %v6969_v20 = vsel %vm6917_vm9, %v6968_v42, %v6967_v5 }
0x13da   : > { %v8860_v0 = vpop.eup %8859 }
0x13db   : > { %v6867_v48 = vmul.f32 %v8860_v0, %v11355_v63 }
0x13dc   : > { %v8862_v56 = vpop.eup %8861 }
0x13dd   : > { %v6881_v62 = vmul.f32 %v11440_v23, %v6867_v48  ;;  %v6866_v63 = vmul.f32 %v8862_v56, %v11357_v33  ;;  %v7053_v33 = vld [vmem:[%s11649_s15 + $0x18] sm:$0xff] }
0x13de   : > { %7877 = vmatpush3.msra.mxu0 %v7053_v33 }
0x13df   : > { %v6895_v41 = vadd.f32 %v11446_v2, %v6881_v62  ;;  %v6880_v16 = vmul.f32 %v11440_v23, %v6866_v63  ;;  %v7067_v23 = vld [vmem:[%s11649_s15 + $0x88] sm:$0xff]  ;;  %7878 = vmatprep.subr.mxu0 %v7068_v60 }
0x13e0   : > { %7879 = vmatpush3.msra.mxu0 %v7052_v17 }
0x13e1   : > { %v6894_v40 = vadd.f32 %v11446_v2, %v6880_v16  ;;  %v6955_v18 = vrot.slane %v6895_v41, 3  ;;  %v7021_v29 = vrot.slane %v6895_v41, 7  ;;  %v6938_v35 = vrot.slane %v6895_v41, 2  ;;  %7880 = vmatprep.subr.mxu0 %v7067_v23 }
0x13e2   : > { %v7004_v54 = vrot.slane %v6895_v41, 6  ;;  %v6972_v26 = vrot.slane %v6895_v41, 4  ;;  %v6922_v49 = vrot.slane %v6895_v41, 1  ;;  %7881 = vmatpush3.msra.mxu0 %v7051_v55  ;;  %v6989_v19 = vrot.slane %v6895_v41, 5 }
0x13e3   : > { %v6953_v44 = vrot.slane %v6894_v40, 4  ;;  %v7020_v2 = vsel %vm6920_vm10, %v6894_v40, %v7019_v59  ;;  %v6936_v30 = vrot.slane %v6894_v40, 3  ;;  %v7002_v47 = vrot.slane %v6894_v40, 7  ;;  %7882 = vmatprep.subr.mxu0 %v7066_v34 }
0x13e4   : > { %v7022_v1 = vsel %vm6923_vm11, %v7021_v29, %v7020_v2  ;;  %v6970_v12 = vrot.slane %v6894_v40, 5  ;;  %v7037_v24 = vrot.slane %v6894_v40, 1  ;;  %v6919_v4 = vrot.slane %v6894_v40, 2  ;;  %7883 = vmatpush3.msra.mxu0 %v7050_v14 }
0x13e5   : > { %v6954_v58 = vsel %vm6920_vm10, %v6953_v44, %v6952_v31  ;;  %v6937_v61 = vsel %vm6920_vm10, %v6936_v30, %v6935_v15  ;;  %v7003_v11 = vsel %vm6920_vm10, %v7002_v47, %v7001_v10  ;;  %v6987_v8 = vrot.slane %v6894_v40, 6 }
0x13e6   : > { %v6956_v13 = vsel %vm6923_vm11, %v6955_v18, %v6954_v58  ;;  %v6939_v50 = vsel %vm6923_vm11, %v6938_v35, %v6937_v61  ;;  %v7005_v28 = vsel %vm6923_vm11, %v7004_v54, %v7003_v11  ;;  %v6971_v21 = vsel %vm6920_vm10, %v6970_v12, %v6969_v20 }
0x13e7   : > { %v8533_v0 = vpack.i.bf16 %v6956_v13, %v7022_v1  ;;  %v8528_v22 = vpack.i.bf16 %v6939_v50, %v7005_v28  ;;  %v7038_v43 = vsel %vm6920_vm10, %v7037_v24, %v7036_v37  ;;  %v6973_v32 = vsel %vm6923_vm11, %v6972_v26, %v6971_v21 }
0x13e8   : > { %v7039_v48 = vsel %vm6923_vm11, %v6895_v41, %v7038_v43  ;;  %v6921_v46 = vsel %vm6920_vm10, %v6919_v4, %v11509_v38  ;;  %v6988_v7 = vsel %vm6920_vm10, %v6987_v8, %v11512_v27  ;;  %v7489_v41 = vld [vmem:[%s11650_s16] ss:$0 sm:$0xff] }
0x13e9   : > { %8534 = vrot.lane.b32.xlu0 %v8533_v0, %s8903_s21  ;;  %8529 = vrot.lane.b32.xlu1 %v8528_v22, %s8907_s18  ;;  %v6924_v3 = vsel %vm6923_vm11, %v6922_v49, %v6921_v46  ;;  %v6990_v56 = vsel %vm6923_vm11, %v6989_v19, %v6988_v7  ;;  %v8538_v52 = vpack.i.bf16 %v6973_v32, %v7039_v48 }
0x13ed   : > { %8539 = vrot.lane.b32.xlu1 %v8538_v52, %s8902_s20  ;;  %s7220_s20 = sshll.u32 %s11740_s25, 3 }
0x13ee   : > { %s548_s22 = scalar_lea.vmem %s11651_s17, %s7220_s20 }
0x145b   : > { %v8535_v39 = vpop.permute.xlu0 %8534  ;;  %v8530_v36 = vpop.permute.xlu1 %8529 }
0x145c   : > { %v8532_v51 = vunpack.i.h.bf16 %v8530_v36  ;;  %v8531_v62 = vunpack.i.l.bf16 %v8530_v36  ;;  %v8537_v38 = vunpack.i.h.bf16 %v8535_v39  ;;  %v8536_v63 = vunpack.i.l.bf16 %v8535_v39 }
0x145e   : > { %v7043_v27 = vsel %vm600_vm0, %v6924_v3, %v8532_v51  ;;  %v7047_v53 = vsel %vm600_vm0, %v6990_v56, %v8531_v62 }
0x145f   : > { %v8540_v5 = vpop.permute.xlu1 %8539  ;;  %v7048_v42 = vsel %vm3496_vm4, %v7047_v53, %v8536_v63  ;;  %v7044_v9 = vsel %vm3496_vm4, %v7043_v27, %v8537_v38 }
0x1460   : > { %v8542_v57 = vunpack.i.h.bf16 %v8540_v5  ;;  %v8541_v6 = vunpack.i.l.bf16 %v8540_v5 }
0x1462   : > { %v7049_v45 = vsel %vm7045_vm12, %v7048_v42, %v8541_v6  ;;  %v7046_v33 = vsel %vm7045_vm12, %v7044_v9, %v8542_v57 }
0x1463   : > { %7153 = vmatprep.mubr.f32.mxu0 %v7049_v45 }
0x1464   : > { %7154 = vmatmul.mubr.f32.vlgmr.msra.gmra.mxu0 %v7046_v33 }
0x1524   : > { %v7884_v60 = vpop.f32.mrf.mxu0 }
0x1526   : > { %v7885_v16 = vpop.f32.mrf.mxu0 }
0x1527   : > { %v7886_v31 = vadd.f32 %v7885_v16, %v7884_v60 }
0x1529   : > { %v7156_v25 = vadd.f32 %v7886_v31, %v7489_v41 }
0x152b   : > { %7159 = vst [vmem:[%s548_s22] sm:$0xff] %v7156_v25 }
0x152c PF: > { %s27_s24 = sadd.s32 1, %s8897_s24  }
0x152d   : > { %p24_p5 = scmp.ge.s32.totalorder %s27_s24, 4  }
0x152f   :  { %26 = sbr.rel (!%p24_p5) target bundleno = 3 (0x3), region = 118 }

</bundles_post_ra>
